<compile_context>
chip_gen: v6e
topology: v6e:2x2x1
jax: 0.10.0
libtpu: 0.0.40
codegen_flags: <defaults>
</compile_context>

<pallas_src>
import functools

import numpy as np
import jax
import jax.numpy as jnp
from jax import lax
from jax.experimental import pallas as pl
from jax.experimental.pallas import tpu as pltpu


_UNROLL_THRESHOLD = 16   # fully unroll the RK4 time loop up to this many steps


# ----------------------------------------------------------------------------
# Fused kernel: encoder MLP -> RK4 over t_eval with
#   g(z)_i = C_i + A_ij z_j + B_ijk z_j z_k   (single fused matmul form)
# -> decoder MLP.  Everything stays in VMEM / registers.
# ----------------------------------------------------------------------------
def _fused_solver_kernel(dt_ref, x0_ref, *refs, n_enc, n_dec, n_t):
    # ---- unpack refs (inputs ..., then outputs) ----
    idx = 0
    enc = []
    for _ in range(n_enc):
        enc.append((refs[idx], refs[idx + 1]))
        idx += 2
    e1_ref, f1_ref, e0_ref, f0_ref, wg_ref = refs[idx:idx + 5]
    idx += 5
    dec = []
    for _ in range(n_dec):
        dec.append((refs[idx], refs[idx + 1]))
        idx += 2
    ns_ref, zs_ref = refs[idx], refs[idx + 1]

    bt = x0_ref.shape[0]            # batch tile (multiple of 8)
    zd = zs_ref.shape[-1]
    nd = ns_ref.shape[-1]

    # ---- encoder: tanh MLP, M = bt rows ----
    h = x0_ref[...]                                            # (bt, p+n)
    for (w_r, b_r) in enc:
        h = jnp.tanh(
            jnp.dot(h, w_r[...], preferred_element_type=jnp.float32) + b_r[...])
    z0 = h                                                     # (bt, zd)

    # ---- ODE right-hand side: one fused matmul for C + Az + B:zz ----
    e1 = e1_ref[...]     # (zd, 1+zd+zd^2)
    f1 = f1_ref[...]     # (zd, 1+zd+zd^2)
    e0 = e0_ref[...]     # (1,  1+zd+zd^2)
    f0 = f0_ref[...]     # (1,  1+zd+zd^2)
    wg = wg_ref[...]     # (1+zd+zd^2, zd)   == [C ; A^T ; B_flat^T]

    def g(z):            # z: (bt, zd)
        pz = jnp.dot(z, e1, preferred_element_type=jnp.float32) + e0
        qz = jnp.dot(z, f1, preferred_element_type=jnp.float32) + f0
        feat = pz * qz                       # = [1 | z | outer(z, z)]
        return jnp.dot(feat, wg, preferred_element_type=jnp.float32)

    def rk4(z, dt):
        half = dt * 0.5
        k1 = g(z)
        k2 = g(z + half * k1)
        k3 = g(z + half * k2)
        k4 = g(z + dt * k3)
        return z + (dt * (1.0 / 6.0)) * (k1 + 2.0 * (k2 + k3) + k4)

    if n_t <= _UNROLL_THRESHOLD:
        # Fully unrolled; trajectory kept in registers, single dense store.
        z = z0
        zs = [z0]
        for k in range(1, n_t):
            z = rk4(z, dt_ref[k])            # dt from SMEM (precomputed delta t)
            zs.append(z)
        traj = jnp.concatenate(zs, axis=0) if n_t > 1 else zs[0]   # (n_t*bt, zd)
        zs_ref[...] = traj.reshape(n_t, bt, zd)
    else:
        # Long horizons: per-step full-tile stores (bt % 8 == 0 -> no RMW).
        zs_ref[0] = z0

        def body(k, z):
            z_new = rk4(z, dt_ref[k])
            zs_ref[k] = z_new
            return z_new

        lax.fori_loop(1, n_t, body, z0, unroll=8)
        traj = zs_ref[...].reshape(n_t * bt, zd)

    # ---- decoder: tanh MLP on the whole trajectory (M = n_t*bt rows) ----
    h = traj
    for li, (w_r, b_r) in enumerate(dec):
        h = jnp.dot(h, w_r[...], preferred_element_type=jnp.float32) + b_r[...]
        if li < n_dec - 1:
            h = jnp.tanh(h)
    ns_ref[...] = h.reshape(n_t, bt, nd).astype(ns_ref.dtype)


# ----------------------------------------------------------------------------
# Solver (MACE architecture): encoder -> neural ODE (G) -> decoder.
# ----------------------------------------------------------------------------
class SolverPallas:
    def __init__(self, p_dim, z_dim, n_dim, nb_hidden, key):
        self.p_dim = p_dim
        self.z_dim = z_dim
        self.n_dim = n_dim
        input_ae_dim = n_dim + p_dim          # g_nn = False branch
        self.input_ae_dim = input_ae_dim

        keys = jax.random.split(key, 16)
        ki = iter(keys)

        # ---- G parameters (torch.randn in the reference) ----
        self.C = jax.random.normal(next(ki), (z_dim,), jnp.float32)
        self.A = jax.random.normal(next(ki), (z_dim, z_dim), jnp.float32)
        self.B = jax.random.normal(next(ki), (z_dim, z_dim, z_dim), jnp.float32)

        # ---- fused-RHS constant operands (wrapper-side, no in-loop concat) ----
        zd = z_dim
        D = 1 + zd + zd * zd
        E = np.kron(np.eye(zd), np.ones((1, zd))).astype(np.float32)   # lane m=j*zd+k -> z_j
        F = np.kron(np.ones((1, zd)), np.eye(zd)).astype(np.float32)   # lane m=j*zd+k -> z_k
        E1 = np.zeros((zd, D), np.float32)
        E1[:, 1:1 + zd] = np.eye(zd, dtype=np.float32)
        E1[:, 1 + zd:] = E
        F1 = np.zeros((zd, D), np.float32)
        F1[:, 1 + zd:] = F
        e0 = np.zeros((1, D), np.float32); e0[0, 0] = 1.0
        f0 = np.zeros((1, D), np.float32); f0[0, 0] = 1.0; f0[0, 1:1 + zd] = 1.0
        Wg = np.zeros((D, zd), np.float32)
        Wg[0, :] = np.asarray(self.C)
        Wg[1:1 + zd, :] = np.asarray(self.A).T
        Wg[1 + zd:, :] = np.asarray(self.B).reshape(zd, zd * zd).T
        self.E1 = jnp.asarray(E1)
        self.F1 = jnp.asarray(F1)
        self.e0 = jnp.asarray(e0)
        self.f0 = jnp.asarray(f0)
        self.Wg = jnp.asarray(Wg)

        # ---- Encoder / Decoder MLPs (tanh, nb_hidden hidden layers) ----
        hidden = max(2 * z_dim, (input_ae_dim + z_dim) // 2)

        def init_mlp(dims, kiter):
            params = []
            for din, dout in zip(dims[:-1], dims[1:]):
                w = 0.1 * jax.random.normal(next(kiter), (din, dout), jnp.float32)
                b = 0.01 * jax.random.normal(next(kiter), (1, dout), jnp.float32)
                params.append((w, b))
            return params

        enc_dims = [input_ae_dim] + [hidden] * nb_hidden + [z_dim]
        dec_dims = [z_dim] + [hidden] * nb_hidden + [n_dim]
        self.enc_params = init_mlp(enc_dims, ki)
        self.dec_params = init_mlp(dec_dims, ki)

    # ---- single fused, batched pallas_call for the whole forward pass ----
    def _fused_call(self, x0_pad, dt, bt):
        B_pad, in_dim = x0_pad.shape
        n_t = int(dt.shape[0])
        zd, nd = self.z_dim, self.n_dim
        grid = (B_pad // bt,)

        const2d = lambda i, dts: (0, 0)    # full-array constant operands

        inputs = [x0_pad]
        in_specs = [pl.BlockSpec((bt, in_dim), lambda i, dts: (i, 0))]
        for (w, b) in self.enc_params:
            inputs += [w, b]
            in_specs += [pl.BlockSpec(w.shape, const2d), pl.BlockSpec(b.shape, const2d)]
        g_consts = (self.E1, self.F1, self.e0, self.f0, self.Wg)
        inputs += list(g_consts)
        in_specs += [pl.BlockSpec(a.shape, const2d) for a in g_consts]
        for (w, b) in self.dec_params:
            inputs += [w, b]
            in_specs += [pl.BlockSpec(w.shape, const2d), pl.BlockSpec(b.shape, const2d)]

        out_shape = (jax.ShapeDtypeStruct((n_t, B_pad, nd), jnp.float32),
                     jax.ShapeDtypeStruct((n_t, B_pad, zd), jnp.float32))
        out_specs = (pl.BlockSpec((n_t, bt, nd), lambda i, dts: (0, i, 0)),
                     pl.BlockSpec((n_t, bt, zd), lambda i, dts: (0, i, 0)))

        # ---- cost estimate (advisory for the surrounding XLA schedule) ----
        D = 1 + zd + zd * zd
        enc_mm = sum(int(w.shape[0] * w.shape[1]) for (w, _) in self.enc_params)
        dec_mm = sum(int(w.shape[0] * w.shape[1]) for (w, _) in self.dec_params)
        flops = (2 * B_pad * enc_mm
                 + 24 * B_pad * zd * D * max(n_t - 1, 0)
                 + 2 * n_t * B_pad * dec_mm)
        trans = (B_pad * sum(int(w.shape[1]) for (w, _) in self.enc_params)
                 + n_t * B_pad * sum(int(w.shape[1]) for (w, _) in self.dec_params[:-1]))
        in_bytes = sum(int(np.prod(a.shape)) * 4 for a in inputs) + int(dt.shape[0]) * 4
        out_bytes = 4 * (n_t * B_pad * nd + n_t * B_pad * zd)
        cost = pl.CostEstimate(flops=int(flops), transcendentals=int(trans),
                               bytes_accessed=int(in_bytes + out_bytes))

        kernel = functools.partial(
            _fused_solver_kernel,
            n_enc=len(self.enc_params),
            n_dec=len(self.dec_params),
            n_t=n_t,
        )
        ns3, zs3 = pl.pallas_call(
            kernel,
            out_shape=out_shape,
            grid_spec=pltpu.PrefetchScalarGridSpec(
                num_scalar_prefetch=1,      # dt -> SMEM
                grid=grid,
                in_specs=in_specs,
                out_specs=out_specs,
            ),
            compiler_params=pltpu.CompilerParams(
                dimension_semantics=("parallel",)),   # v7x: shard batch over 2 TCs
            cost_estimate=cost,
        )(dt, *inputs)
        return ns3, zs3                     # (n_t, B_pad, n_dim), (n_t, B_pad, zd)

    def forward(self, n_0, p, tstep):
        """
        n_0:   (b, n_dim)  initial abundances
        p:     (b, p_dim)  physical parameters
        tstep: (n_t,)      evaluation times
        returns (n_s, z_s, status); for b=1 these match the PyTorch Solver.forward.
        """
        b = n_0.shape[0]
        x_0 = jnp.concatenate([p, n_0], axis=-1).astype(jnp.float32)   # (b, p+n)

        t_eval = tstep.reshape(-1).astype(jnp.float32)                 # (n_t,)
        n_t = int(t_eval.shape[0])
        dt = jnp.concatenate(
            [jnp.zeros((1,), jnp.float32), t_eval[1:] - t_eval[:-1]])

        # Pad batch to a sublane-aligned tile (multiple of 8, up to 128/block).
        bt = 128 if b > 128 else max(8, -(-b // 8) * 8)
        B_pad = -(-b // bt) * bt
        pad = B_pad - b
        x_pad = jnp.pad(x_0, ((0, pad), (0, 0))) if pad else x_0

        ns3, zs3 = self._fused_call(x_pad, dt, bt)    # time-major (n_t, B_pad, .)

        n_s = jnp.transpose(ns3[:, :b, :], (1, 0, 2))        # (b, n_t, n_dim)
        z_traj = jnp.transpose(zs3[:, :b, :], (1, 0, 2))     # (b, n_t, z_dim)
        z_s = z_traj.reshape(-1, self.z_dim)                 # == solution.ys.view(-1, zd)

        finite = (jnp.all(jnp.isfinite(n_s), axis=(1, 2))
                  & jnp.all(jnp.isfinite(z_traj), axis=(1, 2)))
        status = jnp.where(finite, 0, 1).astype(jnp.int32)   # 0 = success
        return n_s, z_s, status


# ----------------------------------------------------------------------------
# Pure-JAX reference of the same encoder -> RK4(G) -> decoder math.
# ----------------------------------------------------------------------------
def _reference_forward(solver, n_0, p, tstep):
    with jax.default_matmul_precision("highest"):
        x0 = jnp.concatenate([p, n_0], axis=-1)
        h = x0
        for (w, b) in solver.enc_params:
            h = jnp.tanh(h @ w + b)
        z = h
        A, Bt, C = solver.A, solver.B, solver.C

        def g(z):
            lin = jnp.einsum('ij,bj->bi', A, z)
            quad = jnp.einsum('ijk,bj,bk->bi', Bt, z, z)
            return C + lin + quad

        t = tstep.reshape(-1)
        zs = [z]
        for k in range(1, int(t.shape[0])):
            dt = t[k] - t[k - 1]
            k1 = g(z); k2 = g(z + 0.5 * dt * k1)
            k3 = g(z + 0.5 * dt * k2); k4 = g(z + dt * k3)
            z = z + (dt / 6.0) * (k1 + 2.0 * (k2 + k3) + k4)
            zs.append(z)
        ztraj = jnp.stack(zs, axis=1)                         # (b, n_t, zd)
        h = ztraj.reshape(-1, solver.z_dim)
        for li, (w, b) in enumerate(solver.dec_params):
            h = h @ w + b
            if li < len(solver.dec_params) - 1:
                h = jnp.tanh(h)
        n_s = h.reshape(n_0.shape[0], int(t.shape[0]), solver.n_dim)
        return n_s, ztraj.reshape(-1, solver.z_dim)


if __name__ == "__main__":
    key = jax.random.PRNGKey(0)
    k_params, k_n0, k_p = jax.random.split(key, 3)

    p_dim, z_dim, n_dim, nb_hidden = 4, 8, 32, 1
    n_t = 8

    solver = SolverPallas(p_dim, z_dim, n_dim, nb_hidden, k_params)

    n_0 = jax.random.uniform(k_n0, (1, n_dim), jnp.float32)
    p = jax.random.uniform(k_p, (1, p_dim), jnp.float32)
    tstep = jnp.linspace(0.0, 0.05, n_t).astype(jnp.float32)

    n_s, z_s, status = solver.forward(n_0, p, tstep)
    jax.block_until_ready((n_s, z_s, status))

    assert n_s.shape == (1, n_t, n_dim)
    assert z_s.shape == (n_t, z_dim)
    assert status.shape == (1,)
    assert bool(jnp.all(jnp.isfinite(n_s))) and bool(jnp.all(jnp.isfinite(z_s)))

    # numeric check vs a pure-JAX reference of the same math
    n_ref, z_ref = _reference_forward(solver, n_0, p, tstep)
    np.testing.assert_allclose(np.asarray(n_s), np.asarray(n_ref), rtol=2e-2, atol=2e-2)
    np.testing.assert_allclose(np.asarray(z_s), np.asarray(z_ref), rtol=2e-2, atol=2e-2)

    # batched path (pads 3 -> 8 rows; exercises M>1 matmuls and the grid plumbing)
    b2 = 3
    n_0b = jax.random.uniform(jax.random.PRNGKey(1), (b2, n_dim), jnp.float32)
    p_b = jax.random.uniform(jax.random.PRNGKey(2), (b2, p_dim), jnp.float32)
    n_sb, z_sb, status_b = solver.forward(n_0b, p_b, tstep)
    jax.block_until_ready((n_sb, z_sb, status_b))
    assert n_sb.shape == (b2, n_t, n_dim)
    assert z_sb.shape == (b2 * n_t, z_dim)
    assert bool(jnp.all(jnp.isfinite(n_sb)))

    print("KERNEL_OK")
</pallas_src>

<mosaic_0001>
module attributes {stable_mosaic.version = 11 : i64} {
  func.func @_fused_solver_kernel(%arg0: i32, %arg1: memref<8xf32, #tpu.memory_space<smem>>, %arg2: memref<8x36xf32, #tpu.memory_space<vmem>>, %arg3: memref<36x22xf32, #tpu.memory_space<vmem>>, %arg4: memref<1x22xf32, #tpu.memory_space<vmem>>, %arg5: memref<22x8xf32, #tpu.memory_space<vmem>>, %arg6: memref<1x8xf32, #tpu.memory_space<vmem>>, %arg7: memref<8x73xf32, #tpu.memory_space<vmem>>, %arg8: memref<8x73xf32, #tpu.memory_space<vmem>>, %arg9: memref<1x73xf32, #tpu.memory_space<vmem>>, %arg10: memref<1x73xf32, #tpu.memory_space<vmem>>, %arg11: memref<73x8xf32, #tpu.memory_space<vmem>>, %arg12: memref<8x22xf32, #tpu.memory_space<vmem>>, %arg13: memref<1x22xf32, #tpu.memory_space<vmem>>, %arg14: memref<22x32xf32, #tpu.memory_space<vmem>>, %arg15: memref<1x32xf32, #tpu.memory_space<vmem>>, %arg16: memref<8x8x32xf32, #tpu.memory_space<vmem>>, %arg17: memref<8x8x8xf32, #tpu.memory_space<vmem>>) attributes {dimension_semantics = [#tpu.dimension_semantics<parallel>], iteration_bounds = array<i64: 1>, scalar_prefetch = 1 : i64, scratch_operands = 0 : i64, tpu.core_type = #tpu.core_type<tc>, window_params = [{transform_indices = @transform_0, window_bounds = array<i64: 8, 36>}, {pipeline_mode = #tpu.pipeline_mode<synchronous>, transform_indices = @transform_1, window_bounds = array<i64: 36, 22>}, {pipeline_mode = #tpu.pipeline_mode<synchronous>, transform_indices = @transform_2, window_bounds = array<i64: 1, 22>}, {pipeline_mode = #tpu.pipeline_mode<synchronous>, transform_indices = @transform_3, window_bounds = array<i64: 22, 8>}, {pipeline_mode = #tpu.pipeline_mode<synchronous>, transform_indices = @transform_4, window_bounds = array<i64: 1, 8>}, {pipeline_mode = #tpu.pipeline_mode<synchronous>, transform_indices = @transform_5, window_bounds = array<i64: 8, 73>}, {pipeline_mode = #tpu.pipeline_mode<synchronous>, transform_indices = @transform_6, window_bounds = array<i64: 8, 73>}, {pipeline_mode = #tpu.pipeline_mode<synchronous>, transform_indices = @transform_7, window_bounds = array<i64: 1, 73>}, {pipeline_mode = #tpu.pipeline_mode<synchronous>, transform_indices = @transform_8, window_bounds = array<i64: 1, 73>}, {pipeline_mode = #tpu.pipeline_mode<synchronous>, transform_indices = @transform_9, window_bounds = array<i64: 73, 8>}, {pipeline_mode = #tpu.pipeline_mode<synchronous>, transform_indices = @transform_10, window_bounds = array<i64: 8, 22>}, {pipeline_mode = #tpu.pipeline_mode<synchronous>, transform_indices = @transform_11, window_bounds = array<i64: 1, 22>}, {pipeline_mode = #tpu.pipeline_mode<synchronous>, transform_indices = @transform_12, window_bounds = array<i64: 22, 32>}, {pipeline_mode = #tpu.pipeline_mode<synchronous>, transform_indices = @transform_13, window_bounds = array<i64: 1, 32>}, {transform_indices = @transform_14, window_bounds = array<i64: 8, 8, 32>}, {transform_indices = @transform_15, window_bounds = array<i64: 8, 8, 8>}]} {
    %c0 = arith.constant 0 : index
    %c0_0 = arith.constant 0 : index
    %0 = vector.load %arg2[%c0, %c0_0] : memref<8x36xf32, #tpu.memory_space<vmem>>, vector<8x36xf32>
    %c0_1 = arith.constant 0 : index
    %c0_2 = arith.constant 0 : index
    %1 = vector.load %arg3[%c0_1, %c0_2] : memref<36x22xf32, #tpu.memory_space<vmem>>, vector<36x22xf32>
    %cst = arith.constant dense<0.000000e+00> : vector<8x22xf32>
    %2 = tpu.matmul %0, %1, %cst {dimension_numbers = #tpu.dot_dimension_numbers<[1], [0], [0], [1], [0, 0, 1, 1], [], []>} : vector<8x36xf32>, vector<36x22xf32>, vector<8x22xf32> -> vector<8x22xf32>
    %c0_3 = arith.constant 0 : index
    %c0_4 = arith.constant 0 : index
    %3 = vector.load %arg4[%c0_3, %c0_4] : memref<1x22xf32, #tpu.memory_space<vmem>>, vector<1x22xf32>
    %4 = vector.broadcast %3 : vector<1x22xf32> to vector<8x22xf32>
    %5 = arith.addf %2, %4 : vector<8x22xf32>
    %6 = math.tanh %5 : vector<8x22xf32>
    %c0_5 = arith.constant 0 : index
    %c0_6 = arith.constant 0 : index
    %7 = vector.load %arg5[%c0_5, %c0_6] : memref<22x8xf32, #tpu.memory_space<vmem>>, vector<22x8xf32>
    %cst_7 = arith.constant dense<0.000000e+00> : vector<8x8xf32>
    %8 = tpu.matmul %6, %7, %cst_7 {dimension_numbers = #tpu.dot_dimension_numbers<[1], [0], [0], [1], [0, 0, 1, 1], [], []>} : vector<8x22xf32>, vector<22x8xf32>, vector<8x8xf32> -> vector<8x8xf32>
    %c0_8 = arith.constant 0 : index
    %c0_9 = arith.constant 0 : index
    %9 = vector.load %arg6[%c0_8, %c0_9] : memref<1x8xf32, #tpu.memory_space<vmem>>, vector<1x8xf32>
    %10 = vector.broadcast %9 : vector<1x8xf32> to vector<8x8xf32>
    %11 = arith.addf %8, %10 : vector<8x8xf32>
    %12 = math.tanh %11 : vector<8x8xf32>
    %c0_10 = arith.constant 0 : index
    %c0_11 = arith.constant 0 : index
    %13 = vector.load %arg7[%c0_10, %c0_11] : memref<8x73xf32, #tpu.memory_space<vmem>>, vector<8x73xf32>
    %c0_12 = arith.constant 0 : index
    %c0_13 = arith.constant 0 : index
    %14 = vector.load %arg8[%c0_12, %c0_13] : memref<8x73xf32, #tpu.memory_space<vmem>>, vector<8x73xf32>
    %c0_14 = arith.constant 0 : index
    %c0_15 = arith.constant 0 : index
    %15 = vector.load %arg9[%c0_14, %c0_15] : memref<1x73xf32, #tpu.memory_space<vmem>>, vector<1x73xf32>
    %c0_16 = arith.constant 0 : index
    %c0_17 = arith.constant 0 : index
    %16 = vector.load %arg10[%c0_16, %c0_17] : memref<1x73xf32, #tpu.memory_space<vmem>>, vector<1x73xf32>
    %c0_18 = arith.constant 0 : index
    %c0_19 = arith.constant 0 : index
    %17 = vector.load %arg11[%c0_18, %c0_19] : memref<73x8xf32, #tpu.memory_space<vmem>>, vector<73x8xf32>
    %c1 = arith.constant 1 : index
    %18 = memref.load %arg1[%c1] : memref<8xf32, #tpu.memory_space<smem>>
    %cst_20 = arith.constant 5.000000e-01 : f32
    %19 = arith.mulf %18, %cst_20 : f32
    %cst_21 = arith.constant dense<0.000000e+00> : vector<8x73xf32>
    %20 = tpu.matmul %12, %13, %cst_21 {dimension_numbers = #tpu.dot_dimension_numbers<[1], [0], [0], [1], [0, 0, 1, 1], [], []>} : vector<8x8xf32>, vector<8x73xf32>, vector<8x73xf32> -> vector<8x73xf32>
    %21 = vector.broadcast %15 : vector<1x73xf32> to vector<8x73xf32>
    %22 = arith.addf %20, %21 : vector<8x73xf32>
    %cst_22 = arith.constant dense<0.000000e+00> : vector<8x73xf32>
    %23 = tpu.matmul %12, %14, %cst_22 {dimension_numbers = #tpu.dot_dimension_numbers<[1], [0], [0], [1], [0, 0, 1, 1], [], []>} : vector<8x8xf32>, vector<8x73xf32>, vector<8x73xf32> -> vector<8x73xf32>
    %24 = vector.broadcast %16 : vector<1x73xf32> to vector<8x73xf32>
    %25 = arith.addf %23, %24 : vector<8x73xf32>
    %26 = arith.mulf %22, %25 : vector<8x73xf32>
    %cst_23 = arith.constant dense<0.000000e+00> : vector<8x8xf32>
    %27 = tpu.matmul %26, %17, %cst_23 {dimension_numbers = #tpu.dot_dimension_numbers<[1], [0], [0], [1], [0, 0, 1, 1], [], []>} : vector<8x73xf32>, vector<73x8xf32>, vector<8x8xf32> -> vector<8x8xf32>
    %28 = vector.broadcast %19 : f32 to vector<8x8xf32>
    %29 = arith.mulf %28, %27 : vector<8x8xf32>
    %30 = arith.addf %12, %29 : vector<8x8xf32>
    %cst_24 = arith.constant dense<0.000000e+00> : vector<8x73xf32>
    %31 = tpu.matmul %30, %13, %cst_24 {dimension_numbers = #tpu.dot_dimension_numbers<[1], [0], [0], [1], [0, 0, 1, 1], [], []>} : vector<8x8xf32>, vector<8x73xf32>, vector<8x73xf32> -> vector<8x73xf32>
    %32 = vector.broadcast %15 : vector<1x73xf32> to vector<8x73xf32>
    %33 = arith.addf %31, %32 : vector<8x73xf32>
    %cst_25 = arith.constant dense<0.000000e+00> : vector<8x73xf32>
    %34 = tpu.matmul %30, %14, %cst_25 {dimension_numbers = #tpu.dot_dimension_numbers<[1], [0], [0], [1], [0, 0, 1, 1], [], []>} : vector<8x8xf32>, vector<8x73xf32>, vector<8x73xf32> -> vector<8x73xf32>
    %35 = vector.broadcast %16 : vector<1x73xf32> to vector<8x73xf32>
    %36 = arith.addf %34, %35 : vector<8x73xf32>
    %37 = arith.mulf %33, %36 : vector<8x73xf32>
    %cst_26 = arith.constant dense<0.000000e+00> : vector<8x8xf32>
    %38 = tpu.matmul %37, %17, %cst_26 {dimension_numbers = #tpu.dot_dimension_numbers<[1], [0], [0], [1], [0, 0, 1, 1], [], []>} : vector<8x73xf32>, vector<73x8xf32>, vector<8x8xf32> -> vector<8x8xf32>
    %39 = vector.broadcast %19 : f32 to vector<8x8xf32>
    %40 = arith.mulf %39, %38 : vector<8x8xf32>
    %41 = arith.addf %12, %40 : vector<8x8xf32>
    %cst_27 = arith.constant dense<0.000000e+00> : vector<8x73xf32>
    %42 = tpu.matmul %41, %13, %cst_27 {dimension_numbers = #tpu.dot_dimension_numbers<[1], [0], [0], [1], [0, 0, 1, 1], [], []>} : vector<8x8xf32>, vector<8x73xf32>, vector<8x73xf32> -> vector<8x73xf32>
    %43 = vector.broadcast %15 : vector<1x73xf32> to vector<8x73xf32>
    %44 = arith.addf %42, %43 : vector<8x73xf32>
    %cst_28 = arith.constant dense<0.000000e+00> : vector<8x73xf32>
    %45 = tpu.matmul %41, %14, %cst_28 {dimension_numbers = #tpu.dot_dimension_numbers<[1], [0], [0], [1], [0, 0, 1, 1], [], []>} : vector<8x8xf32>, vector<8x73xf32>, vector<8x73xf32> -> vector<8x73xf32>
    %46 = vector.broadcast %16 : vector<1x73xf32> to vector<8x73xf32>
    %47 = arith.addf %45, %46 : vector<8x73xf32>
    %48 = arith.mulf %44, %47 : vector<8x73xf32>
    %cst_29 = arith.constant dense<0.000000e+00> : vector<8x8xf32>
    %49 = tpu.matmul %48, %17, %cst_29 {dimension_numbers = #tpu.dot_dimension_numbers<[1], [0], [0], [1], [0, 0, 1, 1], [], []>} : vector<8x73xf32>, vector<73x8xf32>, vector<8x8xf32> -> vector<8x8xf32>
    %50 = vector.broadcast %18 : f32 to vector<8x8xf32>
    %51 = arith.mulf %50, %49 : vector<8x8xf32>
    %52 = arith.addf %12, %51 : vector<8x8xf32>
    %cst_30 = arith.constant dense<0.000000e+00> : vector<8x73xf32>
    %53 = tpu.matmul %52, %13, %cst_30 {dimension_numbers = #tpu.dot_dimension_numbers<[1], [0], [0], [1], [0, 0, 1, 1], [], []>} : vector<8x8xf32>, vector<8x73xf32>, vector<8x73xf32> -> vector<8x73xf32>
    %54 = vector.broadcast %15 : vector<1x73xf32> to vector<8x73xf32>
    %55 = arith.addf %53, %54 : vector<8x73xf32>
    %cst_31 = arith.constant dense<0.000000e+00> : vector<8x73xf32>
    %56 = tpu.matmul %52, %14, %cst_31 {dimension_numbers = #tpu.dot_dimension_numbers<[1], [0], [0], [1], [0, 0, 1, 1], [], []>} : vector<8x8xf32>, vector<8x73xf32>, vector<8x73xf32> -> vector<8x73xf32>
    %57 = vector.broadcast %16 : vector<1x73xf32> to vector<8x73xf32>
    %58 = arith.addf %56, %57 : vector<8x73xf32>
    %59 = arith.mulf %55, %58 : vector<8x73xf32>
    %cst_32 = arith.constant dense<0.000000e+00> : vector<8x8xf32>
    %60 = tpu.matmul %59, %17, %cst_32 {dimension_numbers = #tpu.dot_dimension_numbers<[1], [0], [0], [1], [0, 0, 1, 1], [], []>} : vector<8x73xf32>, vector<73x8xf32>, vector<8x8xf32> -> vector<8x8xf32>
    %cst_33 = arith.constant 0.166666672 : f32
    %61 = arith.mulf %18, %cst_33 : f32
    %62 = arith.addf %38, %49 : vector<8x8xf32>
    %cst_34 = arith.constant 2.000000e+00 : f32
    %63 = vector.broadcast %cst_34 : f32 to vector<8x8xf32>
    %64 = arith.mulf %63, %62 : vector<8x8xf32>
    %65 = arith.addf %27, %64 : vector<8x8xf32>
    %66 = arith.addf %65, %60 : vector<8x8xf32>
    %67 = vector.broadcast %61 : f32 to vector<8x8xf32>
    %68 = arith.mulf %67, %66 : vector<8x8xf32>
    %69 = arith.addf %12, %68 : vector<8x8xf32>
    %c2 = arith.constant 2 : index
    %70 = memref.load %arg1[%c2] : memref<8xf32, #tpu.memory_space<smem>>
    %cst_35 = arith.constant 5.000000e-01 : f32
    %71 = arith.mulf %70, %cst_35 : f32
    %cst_36 = arith.constant dense<0.000000e+00> : vector<8x73xf32>
    %72 = tpu.matmul %69, %13, %cst_36 {dimension_numbers = #tpu.dot_dimension_numbers<[1], [0], [0], [1], [0, 0, 1, 1], [], []>} : vector<8x8xf32>, vector<8x73xf32>, vector<8x73xf32> -> vector<8x73xf32>
    %73 = vector.broadcast %15 : vector<1x73xf32> to vector<8x73xf32>
    %74 = arith.addf %72, %73 : vector<8x73xf32>
    %cst_37 = arith.constant dense<0.000000e+00> : vector<8x73xf32>
    %75 = tpu.matmul %69, %14, %cst_37 {dimension_numbers = #tpu.dot_dimension_numbers<[1], [0], [0], [1], [0, 0, 1, 1], [], []>} : vector<8x8xf32>, vector<8x73xf32>, vector<8x73xf32> -> vector<8x73xf32>
    %76 = vector.broadcast %16 : vector<1x73xf32> to vector<8x73xf32>
    %77 = arith.addf %75, %76 : vector<8x73xf32>
    %78 = arith.mulf %74, %77 : vector<8x73xf32>
    %cst_38 = arith.constant dense<0.000000e+00> : vector<8x8xf32>
    %79 = tpu.matmul %78, %17, %cst_38 {dimension_numbers = #tpu.dot_dimension_numbers<[1], [0], [0], [1], [0, 0, 1, 1], [], []>} : vector<8x73xf32>, vector<73x8xf32>, vector<8x8xf32> -> vector<8x8xf32>
    %80 = vector.broadcast %71 : f32 to vector<8x8xf32>
    %81 = arith.mulf %80, %79 : vector<8x8xf32>
    %82 = arith.addf %69, %81 : vector<8x8xf32>
    %cst_39 = arith.constant dense<0.000000e+00> : vector<8x73xf32>
    %83 = tpu.matmul %82, %13, %cst_39 {dimension_numbers = #tpu.dot_dimension_numbers<[1], [0], [0], [1], [0, 0, 1, 1], [], []>} : vector<8x8xf32>, vector<8x73xf32>, vector<8x73xf32> -> vector<8x73xf32>
    %84 = vector.broadcast %15 : vector<1x73xf32> to vector<8x73xf32>
    %85 = arith.addf %83, %84 : vector<8x73xf32>
    %cst_40 = arith.constant dense<0.000000e+00> : vector<8x73xf32>
    %86 = tpu.matmul %82, %14, %cst_40 {dimension_numbers = #tpu.dot_dimension_numbers<[1], [0], [0], [1], [0, 0, 1, 1], [], []>} : vector<8x8xf32>, vector<8x73xf32>, vector<8x73xf32> -> vector<8x73xf32>
    %87 = vector.broadcast %16 : vector<1x73xf32> to vector<8x73xf32>
    %88 = arith.addf %86, %87 : vector<8x73xf32>
    %89 = arith.mulf %85, %88 : vector<8x73xf32>
    %cst_41 = arith.constant dense<0.000000e+00> : vector<8x8xf32>
    %90 = tpu.matmul %89, %17, %cst_41 {dimension_numbers = #tpu.dot_dimension_numbers<[1], [0], [0], [1], [0, 0, 1, 1], [], []>} : vector<8x73xf32>, vector<73x8xf32>, vector<8x8xf32> -> vector<8x8xf32>
    %91 = vector.broadcast %71 : f32 to vector<8x8xf32>
    %92 = arith.mulf %91, %90 : vector<8x8xf32>
    %93 = arith.addf %69, %92 : vector<8x8xf32>
    %cst_42 = arith.constant dense<0.000000e+00> : vector<8x73xf32>
    %94 = tpu.matmul %93, %13, %cst_42 {dimension_numbers = #tpu.dot_dimension_numbers<[1], [0], [0], [1], [0, 0, 1, 1], [], []>} : vector<8x8xf32>, vector<8x73xf32>, vector<8x73xf32> -> vector<8x73xf32>
    %95 = vector.broadcast %15 : vector<1x73xf32> to vector<8x73xf32>
    %96 = arith.addf %94, %95 : vector<8x73xf32>
    %cst_43 = arith.constant dense<0.000000e+00> : vector<8x73xf32>
    %97 = tpu.matmul %93, %14, %cst_43 {dimension_numbers = #tpu.dot_dimension_numbers<[1], [0], [0], [1], [0, 0, 1, 1], [], []>} : vector<8x8xf32>, vector<8x73xf32>, vector<8x73xf32> -> vector<8x73xf32>
    %98 = vector.broadcast %16 : vector<1x73xf32> to vector<8x73xf32>
    %99 = arith.addf %97, %98 : vector<8x73xf32>
    %100 = arith.mulf %96, %99 : vector<8x73xf32>
    %cst_44 = arith.constant dense<0.000000e+00> : vector<8x8xf32>
    %101 = tpu.matmul %100, %17, %cst_44 {dimension_numbers = #tpu.dot_dimension_numbers<[1], [0], [0], [1], [0, 0, 1, 1], [], []>} : vector<8x73xf32>, vector<73x8xf32>, vector<8x8xf32> -> vector<8x8xf32>
    %102 = vector.broadcast %70 : f32 to vector<8x8xf32>
    %103 = arith.mulf %102, %101 : vector<8x8xf32>
    %104 = arith.addf %69, %103 : vector<8x8xf32>
    %cst_45 = arith.constant dense<0.000000e+00> : vector<8x73xf32>
    %105 = tpu.matmul %104, %13, %cst_45 {dimension_numbers = #tpu.dot_dimension_numbers<[1], [0], [0], [1], [0, 0, 1, 1], [], []>} : vector<8x8xf32>, vector<8x73xf32>, vector<8x73xf32> -> vector<8x73xf32>
    %106 = vector.broadcast %15 : vector<1x73xf32> to vector<8x73xf32>
    %107 = arith.addf %105, %106 : vector<8x73xf32>
    %cst_46 = arith.constant dense<0.000000e+00> : vector<8x73xf32>
    %108 = tpu.matmul %104, %14, %cst_46 {dimension_numbers = #tpu.dot_dimension_numbers<[1], [0], [0], [1], [0, 0, 1, 1], [], []>} : vector<8x8xf32>, vector<8x73xf32>, vector<8x73xf32> -> vector<8x73xf32>
    %109 = vector.broadcast %16 : vector<1x73xf32> to vector<8x73xf32>
    %110 = arith.addf %108, %109 : vector<8x73xf32>
    %111 = arith.mulf %107, %110 : vector<8x73xf32>
    %cst_47 = arith.constant dense<0.000000e+00> : vector<8x8xf32>
    %112 = tpu.matmul %111, %17, %cst_47 {dimension_numbers = #tpu.dot_dimension_numbers<[1], [0], [0], [1], [0, 0, 1, 1], [], []>} : vector<8x73xf32>, vector<73x8xf32>, vector<8x8xf32> -> vector<8x8xf32>
    %cst_48 = arith.constant 0.166666672 : f32
    %113 = arith.mulf %70, %cst_48 : f32
    %114 = arith.addf %90, %101 : vector<8x8xf32>
    %cst_49 = arith.constant 2.000000e+00 : f32
    %115 = vector.broadcast %cst_49 : f32 to vector<8x8xf32>
    %116 = arith.mulf %115, %114 : vector<8x8xf32>
    %117 = arith.addf %79, %116 : vector<8x8xf32>
    %118 = arith.addf %117, %112 : vector<8x8xf32>
    %119 = vector.broadcast %113 : f32 to vector<8x8xf32>
    %120 = arith.mulf %119, %118 : vector<8x8xf32>
    %121 = arith.addf %69, %120 : vector<8x8xf32>
    %c3 = arith.constant 3 : index
    %122 = memref.load %arg1[%c3] : memref<8xf32, #tpu.memory_space<smem>>
    %cst_50 = arith.constant 5.000000e-01 : f32
    %123 = arith.mulf %122, %cst_50 : f32
    %cst_51 = arith.constant dense<0.000000e+00> : vector<8x73xf32>
    %124 = tpu.matmul %121, %13, %cst_51 {dimension_numbers = #tpu.dot_dimension_numbers<[1], [0], [0], [1], [0, 0, 1, 1], [], []>} : vector<8x8xf32>, vector<8x73xf32>, vector<8x73xf32> -> vector<8x73xf32>
    %125 = vector.broadcast %15 : vector<1x73xf32> to vector<8x73xf32>
    %126 = arith.addf %124, %125 : vector<8x73xf32>
    %cst_52 = arith.constant dense<0.000000e+00> : vector<8x73xf32>
    %127 = tpu.matmul %121, %14, %cst_52 {dimension_numbers = #tpu.dot_dimension_numbers<[1], [0], [0], [1], [0, 0, 1, 1], [], []>} : vector<8x8xf32>, vector<8x73xf32>, vector<8x73xf32> -> vector<8x73xf32>
    %128 = vector.broadcast %16 : vector<1x73xf32> to vector<8x73xf32>
    %129 = arith.addf %127, %128 : vector<8x73xf32>
    %130 = arith.mulf %126, %129 : vector<8x73xf32>
    %cst_53 = arith.constant dense<0.000000e+00> : vector<8x8xf32>
    %131 = tpu.matmul %130, %17, %cst_53 {dimension_numbers = #tpu.dot_dimension_numbers<[1], [0], [0], [1], [0, 0, 1, 1], [], []>} : vector<8x73xf32>, vector<73x8xf32>, vector<8x8xf32> -> vector<8x8xf32>
    %132 = vector.broadcast %123 : f32 to vector<8x8xf32>
    %133 = arith.mulf %132, %131 : vector<8x8xf32>
    %134 = arith.addf %121, %133 : vector<8x8xf32>
    %cst_54 = arith.constant dense<0.000000e+00> : vector<8x73xf32>
    %135 = tpu.matmul %134, %13, %cst_54 {dimension_numbers = #tpu.dot_dimension_numbers<[1], [0], [0], [1], [0, 0, 1, 1], [], []>} : vector<8x8xf32>, vector<8x73xf32>, vector<8x73xf32> -> vector<8x73xf32>
    %136 = vector.broadcast %15 : vector<1x73xf32> to vector<8x73xf32>
    %137 = arith.addf %135, %136 : vector<8x73xf32>
    %cst_55 = arith.constant dense<0.000000e+00> : vector<8x73xf32>
    %138 = tpu.matmul %134, %14, %cst_55 {dimension_numbers = #tpu.dot_dimension_numbers<[1], [0], [0], [1], [0, 0, 1, 1], [], []>} : vector<8x8xf32>, vector<8x73xf32>, vector<8x73xf32> -> vector<8x73xf32>
    %139 = vector.broadcast %16 : vector<1x73xf32> to vector<8x73xf32>
    %140 = arith.addf %138, %139 : vector<8x73xf32>
    %141 = arith.mulf %137, %140 : vector<8x73xf32>
    %cst_56 = arith.constant dense<0.000000e+00> : vector<8x8xf32>
    %142 = tpu.matmul %141, %17, %cst_56 {dimension_numbers = #tpu.dot_dimension_numbers<[1], [0], [0], [1], [0, 0, 1, 1], [], []>} : vector<8x73xf32>, vector<73x8xf32>, vector<8x8xf32> -> vector<8x8xf32>
    %143 = vector.broadcast %123 : f32 to vector<8x8xf32>
    %144 = arith.mulf %143, %142 : vector<8x8xf32>
    %145 = arith.addf %121, %144 : vector<8x8xf32>
    %cst_57 = arith.constant dense<0.000000e+00> : vector<8x73xf32>
    %146 = tpu.matmul %145, %13, %cst_57 {dimension_numbers = #tpu.dot_dimension_numbers<[1], [0], [0], [1], [0, 0, 1, 1], [], []>} : vector<8x8xf32>, vector<8x73xf32>, vector<8x73xf32> -> vector<8x73xf32>
    %147 = vector.broadcast %15 : vector<1x73xf32> to vector<8x73xf32>
    %148 = arith.addf %146, %147 : vector<8x73xf32>
    %cst_58 = arith.constant dense<0.000000e+00> : vector<8x73xf32>
    %149 = tpu.matmul %145, %14, %cst_58 {dimension_numbers = #tpu.dot_dimension_numbers<[1], [0], [0], [1], [0, 0, 1, 1], [], []>} : vector<8x8xf32>, vector<8x73xf32>, vector<8x73xf32> -> vector<8x73xf32>
    %150 = vector.broadcast %16 : vector<1x73xf32> to vector<8x73xf32>
    %151 = arith.addf %149, %150 : vector<8x73xf32>
    %152 = arith.mulf %148, %151 : vector<8x73xf32>
    %cst_59 = arith.constant dense<0.000000e+00> : vector<8x8xf32>
    %153 = tpu.matmul %152, %17, %cst_59 {dimension_numbers = #tpu.dot_dimension_numbers<[1], [0], [0], [1], [0, 0, 1, 1], [], []>} : vector<8x73xf32>, vector<73x8xf32>, vector<8x8xf32> -> vector<8x8xf32>
    %154 = vector.broadcast %122 : f32 to vector<8x8xf32>
    %155 = arith.mulf %154, %153 : vector<8x8xf32>
    %156 = arith.addf %121, %155 : vector<8x8xf32>
    %cst_60 = arith.constant dense<0.000000e+00> : vector<8x73xf32>
    %157 = tpu.matmul %156, %13, %cst_60 {dimension_numbers = #tpu.dot_dimension_numbers<[1], [0], [0], [1], [0, 0, 1, 1], [], []>} : vector<8x8xf32>, vector<8x73xf32>, vector<8x73xf32> -> vector<8x73xf32>
    %158 = vector.broadcast %15 : vector<1x73xf32> to vector<8x73xf32>
    %159 = arith.addf %157, %158 : vector<8x73xf32>
    %cst_61 = arith.constant dense<0.000000e+00> : vector<8x73xf32>
    %160 = tpu.matmul %156, %14, %cst_61 {dimension_numbers = #tpu.dot_dimension_numbers<[1], [0], [0], [1], [0, 0, 1, 1], [], []>} : vector<8x8xf32>, vector<8x73xf32>, vector<8x73xf32> -> vector<8x73xf32>
    %161 = vector.broadcast %16 : vector<1x73xf32> to vector<8x73xf32>
    %162 = arith.addf %160, %161 : vector<8x73xf32>
    %163 = arith.mulf %159, %162 : vector<8x73xf32>
    %cst_62 = arith.constant dense<0.000000e+00> : vector<8x8xf32>
    %164 = tpu.matmul %163, %17, %cst_62 {dimension_numbers = #tpu.dot_dimension_numbers<[1], [0], [0], [1], [0, 0, 1, 1], [], []>} : vector<8x73xf32>, vector<73x8xf32>, vector<8x8xf32> -> vector<8x8xf32>
    %cst_63 = arith.constant 0.166666672 : f32
    %165 = arith.mulf %122, %cst_63 : f32
    %166 = arith.addf %142, %153 : vector<8x8xf32>
    %cst_64 = arith.constant 2.000000e+00 : f32
    %167 = vector.broadcast %cst_64 : f32 to vector<8x8xf32>
    %168 = arith.mulf %167, %166 : vector<8x8xf32>
    %169 = arith.addf %131, %168 : vector<8x8xf32>
    %170 = arith.addf %169, %164 : vector<8x8xf32>
    %171 = vector.broadcast %165 : f32 to vector<8x8xf32>
    %172 = arith.mulf %171, %170 : vector<8x8xf32>
    %173 = arith.addf %121, %172 : vector<8x8xf32>
    %c4 = arith.constant 4 : index
    %174 = memref.load %arg1[%c4] : memref<8xf32, #tpu.memory_space<smem>>
    %cst_65 = arith.constant 5.000000e-01 : f32
    %175 = arith.mulf %174, %cst_65 : f32
    %cst_66 = arith.constant dense<0.000000e+00> : vector<8x73xf32>
    %176 = tpu.matmul %173, %13, %cst_66 {dimension_numbers = #tpu.dot_dimension_numbers<[1], [0], [0], [1], [0, 0, 1, 1], [], []>} : vector<8x8xf32>, vector<8x73xf32>, vector<8x73xf32> -> vector<8x73xf32>
    %177 = vector.broadcast %15 : vector<1x73xf32> to vector<8x73xf32>
    %178 = arith.addf %176, %177 : vector<8x73xf32>
    %cst_67 = arith.constant dense<0.000000e+00> : vector<8x73xf32>
    %179 = tpu.matmul %173, %14, %cst_67 {dimension_numbers = #tpu.dot_dimension_numbers<[1], [0], [0], [1], [0, 0, 1, 1], [], []>} : vector<8x8xf32>, vector<8x73xf32>, vector<8x73xf32> -> vector<8x73xf32>
    %180 = vector.broadcast %16 : vector<1x73xf32> to vector<8x73xf32>
    %181 = arith.addf %179, %180 : vector<8x73xf32>
    %182 = arith.mulf %178, %181 : vector<8x73xf32>
    %cst_68 = arith.constant dense<0.000000e+00> : vector<8x8xf32>
    %183 = tpu.matmul %182, %17, %cst_68 {dimension_numbers = #tpu.dot_dimension_numbers<[1], [0], [0], [1], [0, 0, 1, 1], [], []>} : vector<8x73xf32>, vector<73x8xf32>, vector<8x8xf32> -> vector<8x8xf32>
    %184 = vector.broadcast %175 : f32 to vector<8x8xf32>
    %185 = arith.mulf %184, %183 : vector<8x8xf32>
    %186 = arith.addf %173, %185 : vector<8x8xf32>
    %cst_69 = arith.constant dense<0.000000e+00> : vector<8x73xf32>
    %187 = tpu.matmul %186, %13, %cst_69 {dimension_numbers = #tpu.dot_dimension_numbers<[1], [0], [0], [1], [0, 0, 1, 1], [], []>} : vector<8x8xf32>, vector<8x73xf32>, vector<8x73xf32> -> vector<8x73xf32>
    %188 = vector.broadcast %15 : vector<1x73xf32> to vector<8x73xf32>
    %189 = arith.addf %187, %188 : vector<8x73xf32>
    %cst_70 = arith.constant dense<0.000000e+00> : vector<8x73xf32>
    %190 = tpu.matmul %186, %14, %cst_70 {dimension_numbers = #tpu.dot_dimension_numbers<[1], [0], [0], [1], [0, 0, 1, 1], [], []>} : vector<8x8xf32>, vector<8x73xf32>, vector<8x73xf32> -> vector<8x73xf32>
    %191 = vector.broadcast %16 : vector<1x73xf32> to vector<8x73xf32>
    %192 = arith.addf %190, %191 : vector<8x73xf32>
    %193 = arith.mulf %189, %192 : vector<8x73xf32>
    %cst_71 = arith.constant dense<0.000000e+00> : vector<8x8xf32>
    %194 = tpu.matmul %193, %17, %cst_71 {dimension_numbers = #tpu.dot_dimension_numbers<[1], [0], [0], [1], [0, 0, 1, 1], [], []>} : vector<8x73xf32>, vector<73x8xf32>, vector<8x8xf32> -> vector<8x8xf32>
    %195 = vector.broadcast %175 : f32 to vector<8x8xf32>
    %196 = arith.mulf %195, %194 : vector<8x8xf32>
    %197 = arith.addf %173, %196 : vector<8x8xf32>
    %cst_72 = arith.constant dense<0.000000e+00> : vector<8x73xf32>
    %198 = tpu.matmul %197, %13, %cst_72 {dimension_numbers = #tpu.dot_dimension_numbers<[1], [0], [0], [1], [0, 0, 1, 1], [], []>} : vector<8x8xf32>, vector<8x73xf32>, vector<8x73xf32> -> vector<8x73xf32>
    %199 = vector.broadcast %15 : vector<1x73xf32> to vector<8x73xf32>
    %200 = arith.addf %198, %199 : vector<8x73xf32>
    %cst_73 = arith.constant dense<0.000000e+00> : vector<8x73xf32>
    %201 = tpu.matmul %197, %14, %cst_73 {dimension_numbers = #tpu.dot_dimension_numbers<[1], [0], [0], [1], [0, 0, 1, 1], [], []>} : vector<8x8xf32>, vector<8x73xf32>, vector<8x73xf32> -> vector<8x73xf32>
    %202 = vector.broadcast %16 : vector<1x73xf32> to vector<8x73xf32>
    %203 = arith.addf %201, %202 : vector<8x73xf32>
    %204 = arith.mulf %200, %203 : vector<8x73xf32>
    %cst_74 = arith.constant dense<0.000000e+00> : vector<8x8xf32>
    %205 = tpu.matmul %204, %17, %cst_74 {dimension_numbers = #tpu.dot_dimension_numbers<[1], [0], [0], [1], [0, 0, 1, 1], [], []>} : vector<8x73xf32>, vector<73x8xf32>, vector<8x8xf32> -> vector<8x8xf32>
    %206 = vector.broadcast %174 : f32 to vector<8x8xf32>
    %207 = arith.mulf %206, %205 : vector<8x8xf32>
    %208 = arith.addf %173, %207 : vector<8x8xf32>
    %cst_75 = arith.constant dense<0.000000e+00> : vector<8x73xf32>
    %209 = tpu.matmul %208, %13, %cst_75 {dimension_numbers = #tpu.dot_dimension_numbers<[1], [0], [0], [1], [0, 0, 1, 1], [], []>} : vector<8x8xf32>, vector<8x73xf32>, vector<8x73xf32> -> vector<8x73xf32>
    %210 = vector.broadcast %15 : vector<1x73xf32> to vector<8x73xf32>
    %211 = arith.addf %209, %210 : vector<8x73xf32>
    %cst_76 = arith.constant dense<0.000000e+00> : vector<8x73xf32>
    %212 = tpu.matmul %208, %14, %cst_76 {dimension_numbers = #tpu.dot_dimension_numbers<[1], [0], [0], [1], [0, 0, 1, 1], [], []>} : vector<8x8xf32>, vector<8x73xf32>, vector<8x73xf32> -> vector<8x73xf32>
    %213 = vector.broadcast %16 : vector<1x73xf32> to vector<8x73xf32>
    %214 = arith.addf %212, %213 : vector<8x73xf32>
    %215 = arith.mulf %211, %214 : vector<8x73xf32>
    %cst_77 = arith.constant dense<0.000000e+00> : vector<8x8xf32>
    %216 = tpu.matmul %215, %17, %cst_77 {dimension_numbers = #tpu.dot_dimension_numbers<[1], [0], [0], [1], [0, 0, 1, 1], [], []>} : vector<8x73xf32>, vector<73x8xf32>, vector<8x8xf32> -> vector<8x8xf32>
    %cst_78 = arith.constant 0.166666672 : f32
    %217 = arith.mulf %174, %cst_78 : f32
    %218 = arith.addf %194, %205 : vector<8x8xf32>
    %cst_79 = arith.constant 2.000000e+00 : f32
    %219 = vector.broadcast %cst_79 : f32 to vector<8x8xf32>
    %220 = arith.mulf %219, %218 : vector<8x8xf32>
    %221 = arith.addf %183, %220 : vector<8x8xf32>
    %222 = arith.addf %221, %216 : vector<8x8xf32>
    %223 = vector.broadcast %217 : f32 to vector<8x8xf32>
    %224 = arith.mulf %223, %222 : vector<8x8xf32>
    %225 = arith.addf %173, %224 : vector<8x8xf32>
    %c5 = arith.constant 5 : index
    %226 = memref.load %arg1[%c5] : memref<8xf32, #tpu.memory_space<smem>>
    %cst_80 = arith.constant 5.000000e-01 : f32
    %227 = arith.mulf %226, %cst_80 : f32
    %cst_81 = arith.constant dense<0.000000e+00> : vector<8x73xf32>
    %228 = tpu.matmul %225, %13, %cst_81 {dimension_numbers = #tpu.dot_dimension_numbers<[1], [0], [0], [1], [0, 0, 1, 1], [], []>} : vector<8x8xf32>, vector<8x73xf32>, vector<8x73xf32> -> vector<8x73xf32>
    %229 = vector.broadcast %15 : vector<1x73xf32> to vector<8x73xf32>
    %230 = arith.addf %228, %229 : vector<8x73xf32>
    %cst_82 = arith.constant dense<0.000000e+00> : vector<8x73xf32>
    %231 = tpu.matmul %225, %14, %cst_82 {dimension_numbers = #tpu.dot_dimension_numbers<[1], [0], [0], [1], [0, 0, 1, 1], [], []>} : vector<8x8xf32>, vector<8x73xf32>, vector<8x73xf32> -> vector<8x73xf32>
    %232 = vector.broadcast %16 : vector<1x73xf32> to vector<8x73xf32>
    %233 = arith.addf %231, %232 : vector<8x73xf32>
    %234 = arith.mulf %230, %233 : vector<8x73xf32>
    %cst_83 = arith.constant dense<0.000000e+00> : vector<8x8xf32>
    %235 = tpu.matmul %234, %17, %cst_83 {dimension_numbers = #tpu.dot_dimension_numbers<[1], [0], [0], [1], [0, 0, 1, 1], [], []>} : vector<8x73xf32>, vector<73x8xf32>, vector<8x8xf32> -> vector<8x8xf32>
    %236 = vector.broadcast %227 : f32 to vector<8x8xf32>
    %237 = arith.mulf %236, %235 : vector<8x8xf32>
    %238 = arith.addf %225, %237 : vector<8x8xf32>
    %cst_84 = arith.constant dense<0.000000e+00> : vector<8x73xf32>
    %239 = tpu.matmul %238, %13, %cst_84 {dimension_numbers = #tpu.dot_dimension_numbers<[1], [0], [0], [1], [0, 0, 1, 1], [], []>} : vector<8x8xf32>, vector<8x73xf32>, vector<8x73xf32> -> vector<8x73xf32>
    %240 = vector.broadcast %15 : vector<1x73xf32> to vector<8x73xf32>
    %241 = arith.addf %239, %240 : vector<8x73xf32>
    %cst_85 = arith.constant dense<0.000000e+00> : vector<8x73xf32>
    %242 = tpu.matmul %238, %14, %cst_85 {dimension_numbers = #tpu.dot_dimension_numbers<[1], [0], [0], [1], [0, 0, 1, 1], [], []>} : vector<8x8xf32>, vector<8x73xf32>, vector<8x73xf32> -> vector<8x73xf32>
    %243 = vector.broadcast %16 : vector<1x73xf32> to vector<8x73xf32>
    %244 = arith.addf %242, %243 : vector<8x73xf32>
    %245 = arith.mulf %241, %244 : vector<8x73xf32>
    %cst_86 = arith.constant dense<0.000000e+00> : vector<8x8xf32>
    %246 = tpu.matmul %245, %17, %cst_86 {dimension_numbers = #tpu.dot_dimension_numbers<[1], [0], [0], [1], [0, 0, 1, 1], [], []>} : vector<8x73xf32>, vector<73x8xf32>, vector<8x8xf32> -> vector<8x8xf32>
    %247 = vector.broadcast %227 : f32 to vector<8x8xf32>
    %248 = arith.mulf %247, %246 : vector<8x8xf32>
    %249 = arith.addf %225, %248 : vector<8x8xf32>
    %cst_87 = arith.constant dense<0.000000e+00> : vector<8x73xf32>
    %250 = tpu.matmul %249, %13, %cst_87 {dimension_numbers = #tpu.dot_dimension_numbers<[1], [0], [0], [1], [0, 0, 1, 1], [], []>} : vector<8x8xf32>, vector<8x73xf32>, vector<8x73xf32> -> vector<8x73xf32>
    %251 = vector.broadcast %15 : vector<1x73xf32> to vector<8x73xf32>
    %252 = arith.addf %250, %251 : vector<8x73xf32>
    %cst_88 = arith.constant dense<0.000000e+00> : vector<8x73xf32>
    %253 = tpu.matmul %249, %14, %cst_88 {dimension_numbers = #tpu.dot_dimension_numbers<[1], [0], [0], [1], [0, 0, 1, 1], [], []>} : vector<8x8xf32>, vector<8x73xf32>, vector<8x73xf32> -> vector<8x73xf32>
    %254 = vector.broadcast %16 : vector<1x73xf32> to vector<8x73xf32>
    %255 = arith.addf %253, %254 : vector<8x73xf32>
    %256 = arith.mulf %252, %255 : vector<8x73xf32>
    %cst_89 = arith.constant dense<0.000000e+00> : vector<8x8xf32>
    %257 = tpu.matmul %256, %17, %cst_89 {dimension_numbers = #tpu.dot_dimension_numbers<[1], [0], [0], [1], [0, 0, 1, 1], [], []>} : vector<8x73xf32>, vector<73x8xf32>, vector<8x8xf32> -> vector<8x8xf32>
    %258 = vector.broadcast %226 : f32 to vector<8x8xf32>
    %259 = arith.mulf %258, %257 : vector<8x8xf32>
    %260 = arith.addf %225, %259 : vector<8x8xf32>
    %cst_90 = arith.constant dense<0.000000e+00> : vector<8x73xf32>
    %261 = tpu.matmul %260, %13, %cst_90 {dimension_numbers = #tpu.dot_dimension_numbers<[1], [0], [0], [1], [0, 0, 1, 1], [], []>} : vector<8x8xf32>, vector<8x73xf32>, vector<8x73xf32> -> vector<8x73xf32>
    %262 = vector.broadcast %15 : vector<1x73xf32> to vector<8x73xf32>
    %263 = arith.addf %261, %262 : vector<8x73xf32>
    %cst_91 = arith.constant dense<0.000000e+00> : vector<8x73xf32>
    %264 = tpu.matmul %260, %14, %cst_91 {dimension_numbers = #tpu.dot_dimension_numbers<[1], [0], [0], [1], [0, 0, 1, 1], [], []>} : vector<8x8xf32>, vector<8x73xf32>, vector<8x73xf32> -> vector<8x73xf32>
    %265 = vector.broadcast %16 : vector<1x73xf32> to vector<8x73xf32>
    %266 = arith.addf %264, %265 : vector<8x73xf32>
    %267 = arith.mulf %263, %266 : vector<8x73xf32>
    %cst_92 = arith.constant dense<0.000000e+00> : vector<8x8xf32>
    %268 = tpu.matmul %267, %17, %cst_92 {dimension_numbers = #tpu.dot_dimension_numbers<[1], [0], [0], [1], [0, 0, 1, 1], [], []>} : vector<8x73xf32>, vector<73x8xf32>, vector<8x8xf32> -> vector<8x8xf32>
    %cst_93 = arith.constant 0.166666672 : f32
    %269 = arith.mulf %226, %cst_93 : f32
    %270 = arith.addf %246, %257 : vector<8x8xf32>
    %cst_94 = arith.constant 2.000000e+00 : f32
    %271 = vector.broadcast %cst_94 : f32 to vector<8x8xf32>
    %272 = arith.mulf %271, %270 : vector<8x8xf32>
    %273 = arith.addf %235, %272 : vector<8x8xf32>
    %274 = arith.addf %273, %268 : vector<8x8xf32>
    %275 = vector.broadcast %269 : f32 to vector<8x8xf32>
    %276 = arith.mulf %275, %274 : vector<8x8xf32>
    %277 = arith.addf %225, %276 : vector<8x8xf32>
    %c6 = arith.constant 6 : index
    %278 = memref.load %arg1[%c6] : memref<8xf32, #tpu.memory_space<smem>>
    %cst_95 = arith.constant 5.000000e-01 : f32
    %279 = arith.mulf %278, %cst_95 : f32
    %cst_96 = arith.constant dense<0.000000e+00> : vector<8x73xf32>
    %280 = tpu.matmul %277, %13, %cst_96 {dimension_numbers = #tpu.dot_dimension_numbers<[1], [0], [0], [1], [0, 0, 1, 1], [], []>} : vector<8x8xf32>, vector<8x73xf32>, vector<8x73xf32> -> vector<8x73xf32>
    %281 = vector.broadcast %15 : vector<1x73xf32> to vector<8x73xf32>
    %282 = arith.addf %280, %281 : vector<8x73xf32>
    %cst_97 = arith.constant dense<0.000000e+00> : vector<8x73xf32>
    %283 = tpu.matmul %277, %14, %cst_97 {dimension_numbers = #tpu.dot_dimension_numbers<[1], [0], [0], [1], [0, 0, 1, 1], [], []>} : vector<8x8xf32>, vector<8x73xf32>, vector<8x73xf32> -> vector<8x73xf32>
    %284 = vector.broadcast %16 : vector<1x73xf32> to vector<8x73xf32>
    %285 = arith.addf %283, %284 : vector<8x73xf32>
    %286 = arith.mulf %282, %285 : vector<8x73xf32>
    %cst_98 = arith.constant dense<0.000000e+00> : vector<8x8xf32>
    %287 = tpu.matmul %286, %17, %cst_98 {dimension_numbers = #tpu.dot_dimension_numbers<[1], [0], [0], [1], [0, 0, 1, 1], [], []>} : vector<8x73xf32>, vector<73x8xf32>, vector<8x8xf32> -> vector<8x8xf32>
    %288 = vector.broadcast %279 : f32 to vector<8x8xf32>
    %289 = arith.mulf %288, %287 : vector<8x8xf32>
    %290 = arith.addf %277, %289 : vector<8x8xf32>
    %cst_99 = arith.constant dense<0.000000e+00> : vector<8x73xf32>
    %291 = tpu.matmul %290, %13, %cst_99 {dimension_numbers = #tpu.dot_dimension_numbers<[1], [0], [0], [1], [0, 0, 1, 1], [], []>} : vector<8x8xf32>, vector<8x73xf32>, vector<8x73xf32> -> vector<8x73xf32>
    %292 = vector.broadcast %15 : vector<1x73xf32> to vector<8x73xf32>
    %293 = arith.addf %291, %292 : vector<8x73xf32>
    %cst_100 = arith.constant dense<0.000000e+00> : vector<8x73xf32>
    %294 = tpu.matmul %290, %14, %cst_100 {dimension_numbers = #tpu.dot_dimension_numbers<[1], [0], [0], [1], [0, 0, 1, 1], [], []>} : vector<8x8xf32>, vector<8x73xf32>, vector<8x73xf32> -> vector<8x73xf32>
    %295 = vector.broadcast %16 : vector<1x73xf32> to vector<8x73xf32>
    %296 = arith.addf %294, %295 : vector<8x73xf32>
    %297 = arith.mulf %293, %296 : vector<8x73xf32>
    %cst_101 = arith.constant dense<0.000000e+00> : vector<8x8xf32>
    %298 = tpu.matmul %297, %17, %cst_101 {dimension_numbers = #tpu.dot_dimension_numbers<[1], [0], [0], [1], [0, 0, 1, 1], [], []>} : vector<8x73xf32>, vector<73x8xf32>, vector<8x8xf32> -> vector<8x8xf32>
    %299 = vector.broadcast %279 : f32 to vector<8x8xf32>
    %300 = arith.mulf %299, %298 : vector<8x8xf32>
    %301 = arith.addf %277, %300 : vector<8x8xf32>
    %cst_102 = arith.constant dense<0.000000e+00> : vector<8x73xf32>
    %302 = tpu.matmul %301, %13, %cst_102 {dimension_numbers = #tpu.dot_dimension_numbers<[1], [0], [0], [1], [0, 0, 1, 1], [], []>} : vector<8x8xf32>, vector<8x73xf32>, vector<8x73xf32> -> vector<8x73xf32>
    %303 = vector.broadcast %15 : vector<1x73xf32> to vector<8x73xf32>
    %304 = arith.addf %302, %303 : vector<8x73xf32>
    %cst_103 = arith.constant dense<0.000000e+00> : vector<8x73xf32>
    %305 = tpu.matmul %301, %14, %cst_103 {dimension_numbers = #tpu.dot_dimension_numbers<[1], [0], [0], [1], [0, 0, 1, 1], [], []>} : vector<8x8xf32>, vector<8x73xf32>, vector<8x73xf32> -> vector<8x73xf32>
    %306 = vector.broadcast %16 : vector<1x73xf32> to vector<8x73xf32>
    %307 = arith.addf %305, %306 : vector<8x73xf32>
    %308 = arith.mulf %304, %307 : vector<8x73xf32>
    %cst_104 = arith.constant dense<0.000000e+00> : vector<8x8xf32>
    %309 = tpu.matmul %308, %17, %cst_104 {dimension_numbers = #tpu.dot_dimension_numbers<[1], [0], [0], [1], [0, 0, 1, 1], [], []>} : vector<8x73xf32>, vector<73x8xf32>, vector<8x8xf32> -> vector<8x8xf32>
    %310 = vector.broadcast %278 : f32 to vector<8x8xf32>
    %311 = arith.mulf %310, %309 : vector<8x8xf32>
    %312 = arith.addf %277, %311 : vector<8x8xf32>
    %cst_105 = arith.constant dense<0.000000e+00> : vector<8x73xf32>
    %313 = tpu.matmul %312, %13, %cst_105 {dimension_numbers = #tpu.dot_dimension_numbers<[1], [0], [0], [1], [0, 0, 1, 1], [], []>} : vector<8x8xf32>, vector<8x73xf32>, vector<8x73xf32> -> vector<8x73xf32>
    %314 = vector.broadcast %15 : vector<1x73xf32> to vector<8x73xf32>
    %315 = arith.addf %313, %314 : vector<8x73xf32>
    %cst_106 = arith.constant dense<0.000000e+00> : vector<8x73xf32>
    %316 = tpu.matmul %312, %14, %cst_106 {dimension_numbers = #tpu.dot_dimension_numbers<[1], [0], [0], [1], [0, 0, 1, 1], [], []>} : vector<8x8xf32>, vector<8x73xf32>, vector<8x73xf32> -> vector<8x73xf32>
    %317 = vector.broadcast %16 : vector<1x73xf32> to vector<8x73xf32>
    %318 = arith.addf %316, %317 : vector<8x73xf32>
    %319 = arith.mulf %315, %318 : vector<8x73xf32>
    %cst_107 = arith.constant dense<0.000000e+00> : vector<8x8xf32>
    %320 = tpu.matmul %319, %17, %cst_107 {dimension_numbers = #tpu.dot_dimension_numbers<[1], [0], [0], [1], [0, 0, 1, 1], [], []>} : vector<8x73xf32>, vector<73x8xf32>, vector<8x8xf32> -> vector<8x8xf32>
    %cst_108 = arith.constant 0.166666672 : f32
    %321 = arith.mulf %278, %cst_108 : f32
    %322 = arith.addf %298, %309 : vector<8x8xf32>
    %cst_109 = arith.constant 2.000000e+00 : f32
    %323 = vector.broadcast %cst_109 : f32 to vector<8x8xf32>
    %324 = arith.mulf %323, %322 : vector<8x8xf32>
    %325 = arith.addf %287, %324 : vector<8x8xf32>
    %326 = arith.addf %325, %320 : vector<8x8xf32>
    %327 = vector.broadcast %321 : f32 to vector<8x8xf32>
    %328 = arith.mulf %327, %326 : vector<8x8xf32>
    %329 = arith.addf %277, %328 : vector<8x8xf32>
    %c7 = arith.constant 7 : index
    %330 = memref.load %arg1[%c7] : memref<8xf32, #tpu.memory_space<smem>>
    %cst_110 = arith.constant 5.000000e-01 : f32
    %331 = arith.mulf %330, %cst_110 : f32
    %cst_111 = arith.constant dense<0.000000e+00> : vector<8x73xf32>
    %332 = tpu.matmul %329, %13, %cst_111 {dimension_numbers = #tpu.dot_dimension_numbers<[1], [0], [0], [1], [0, 0, 1, 1], [], []>} : vector<8x8xf32>, vector<8x73xf32>, vector<8x73xf32> -> vector<8x73xf32>
    %333 = vector.broadcast %15 : vector<1x73xf32> to vector<8x73xf32>
    %334 = arith.addf %332, %333 : vector<8x73xf32>
    %cst_112 = arith.constant dense<0.000000e+00> : vector<8x73xf32>
    %335 = tpu.matmul %329, %14, %cst_112 {dimension_numbers = #tpu.dot_dimension_numbers<[1], [0], [0], [1], [0, 0, 1, 1], [], []>} : vector<8x8xf32>, vector<8x73xf32>, vector<8x73xf32> -> vector<8x73xf32>
    %336 = vector.broadcast %16 : vector<1x73xf32> to vector<8x73xf32>
    %337 = arith.addf %335, %336 : vector<8x73xf32>
    %338 = arith.mulf %334, %337 : vector<8x73xf32>
    %cst_113 = arith.constant dense<0.000000e+00> : vector<8x8xf32>
    %339 = tpu.matmul %338, %17, %cst_113 {dimension_numbers = #tpu.dot_dimension_numbers<[1], [0], [0], [1], [0, 0, 1, 1], [], []>} : vector<8x73xf32>, vector<73x8xf32>, vector<8x8xf32> -> vector<8x8xf32>
    %340 = vector.broadcast %331 : f32 to vector<8x8xf32>
    %341 = arith.mulf %340, %339 : vector<8x8xf32>
    %342 = arith.addf %329, %341 : vector<8x8xf32>
    %cst_114 = arith.constant dense<0.000000e+00> : vector<8x73xf32>
    %343 = tpu.matmul %342, %13, %cst_114 {dimension_numbers = #tpu.dot_dimension_numbers<[1], [0], [0], [1], [0, 0, 1, 1], [], []>} : vector<8x8xf32>, vector<8x73xf32>, vector<8x73xf32> -> vector<8x73xf32>
    %344 = vector.broadcast %15 : vector<1x73xf32> to vector<8x73xf32>
    %345 = arith.addf %343, %344 : vector<8x73xf32>
    %cst_115 = arith.constant dense<0.000000e+00> : vector<8x73xf32>
    %346 = tpu.matmul %342, %14, %cst_115 {dimension_numbers = #tpu.dot_dimension_numbers<[1], [0], [0], [1], [0, 0, 1, 1], [], []>} : vector<8x8xf32>, vector<8x73xf32>, vector<8x73xf32> -> vector<8x73xf32>
    %347 = vector.broadcast %16 : vector<1x73xf32> to vector<8x73xf32>
    %348 = arith.addf %346, %347 : vector<8x73xf32>
    %349 = arith.mulf %345, %348 : vector<8x73xf32>
    %cst_116 = arith.constant dense<0.000000e+00> : vector<8x8xf32>
    %350 = tpu.matmul %349, %17, %cst_116 {dimension_numbers = #tpu.dot_dimension_numbers<[1], [0], [0], [1], [0, 0, 1, 1], [], []>} : vector<8x73xf32>, vector<73x8xf32>, vector<8x8xf32> -> vector<8x8xf32>
    %351 = vector.broadcast %331 : f32 to vector<8x8xf32>
    %352 = arith.mulf %351, %350 : vector<8x8xf32>
    %353 = arith.addf %329, %352 : vector<8x8xf32>
    %cst_117 = arith.constant dense<0.000000e+00> : vector<8x73xf32>
    %354 = tpu.matmul %353, %13, %cst_117 {dimension_numbers = #tpu.dot_dimension_numbers<[1], [0], [0], [1], [0, 0, 1, 1], [], []>} : vector<8x8xf32>, vector<8x73xf32>, vector<8x73xf32> -> vector<8x73xf32>
    %355 = vector.broadcast %15 : vector<1x73xf32> to vector<8x73xf32>
    %356 = arith.addf %354, %355 : vector<8x73xf32>
    %cst_118 = arith.constant dense<0.000000e+00> : vector<8x73xf32>
    %357 = tpu.matmul %353, %14, %cst_118 {dimension_numbers = #tpu.dot_dimension_numbers<[1], [0], [0], [1], [0, 0, 1, 1], [], []>} : vector<8x8xf32>, vector<8x73xf32>, vector<8x73xf32> -> vector<8x73xf32>
    %358 = vector.broadcast %16 : vector<1x73xf32> to vector<8x73xf32>
    %359 = arith.addf %357, %358 : vector<8x73xf32>
    %360 = arith.mulf %356, %359 : vector<8x73xf32>
    %cst_119 = arith.constant dense<0.000000e+00> : vector<8x8xf32>
    %361 = tpu.matmul %360, %17, %cst_119 {dimension_numbers = #tpu.dot_dimension_numbers<[1], [0], [0], [1], [0, 0, 1, 1], [], []>} : vector<8x73xf32>, vector<73x8xf32>, vector<8x8xf32> -> vector<8x8xf32>
    %362 = vector.broadcast %330 : f32 to vector<8x8xf32>
    %363 = arith.mulf %362, %361 : vector<8x8xf32>
    %364 = arith.addf %329, %363 : vector<8x8xf32>
    %cst_120 = arith.constant dense<0.000000e+00> : vector<8x73xf32>
    %365 = tpu.matmul %364, %13, %cst_120 {dimension_numbers = #tpu.dot_dimension_numbers<[1], [0], [0], [1], [0, 0, 1, 1], [], []>} : vector<8x8xf32>, vector<8x73xf32>, vector<8x73xf32> -> vector<8x73xf32>
    %366 = vector.broadcast %15 : vector<1x73xf32> to vector<8x73xf32>
    %367 = arith.addf %365, %366 : vector<8x73xf32>
    %cst_121 = arith.constant dense<0.000000e+00> : vector<8x73xf32>
    %368 = tpu.matmul %364, %14, %cst_121 {dimension_numbers = #tpu.dot_dimension_numbers<[1], [0], [0], [1], [0, 0, 1, 1], [], []>} : vector<8x8xf32>, vector<8x73xf32>, vector<8x73xf32> -> vector<8x73xf32>
    %369 = vector.broadcast %16 : vector<1x73xf32> to vector<8x73xf32>
    %370 = arith.addf %368, %369 : vector<8x73xf32>
    %371 = arith.mulf %367, %370 : vector<8x73xf32>
    %cst_122 = arith.constant dense<0.000000e+00> : vector<8x8xf32>
    %372 = tpu.matmul %371, %17, %cst_122 {dimension_numbers = #tpu.dot_dimension_numbers<[1], [0], [0], [1], [0, 0, 1, 1], [], []>} : vector<8x73xf32>, vector<73x8xf32>, vector<8x8xf32> -> vector<8x8xf32>
    %cst_123 = arith.constant 0.166666672 : f32
    %373 = arith.mulf %330, %cst_123 : f32
    %374 = arith.addf %350, %361 : vector<8x8xf32>
    %cst_124 = arith.constant 2.000000e+00 : f32
    %375 = vector.broadcast %cst_124 : f32 to vector<8x8xf32>
    %376 = arith.mulf %375, %374 : vector<8x8xf32>
    %377 = arith.addf %339, %376 : vector<8x8xf32>
    %378 = arith.addf %377, %372 : vector<8x8xf32>
    %379 = vector.broadcast %373 : f32 to vector<8x8xf32>
    %380 = arith.mulf %379, %378 : vector<8x8xf32>
    %381 = arith.addf %329, %380 : vector<8x8xf32>
    %382 = tpu.concatenate %12, %69, %121, %173, %225, %277, %329, %381 in 0 : vector<8x8xf32>, vector<8x8xf32>, vector<8x8xf32>, vector<8x8xf32>, vector<8x8xf32>, vector<8x8xf32>, vector<8x8xf32>, vector<8x8xf32> -> vector<64x8xf32>
    %383 = vector.shape_cast %382 : vector<64x8xf32> to vector<8x8x8xf32>
    %c0_125 = arith.constant 0 : index
    %c0_126 = arith.constant 0 : index
    %c0_127 = arith.constant 0 : index
    %384 = vector.load %arg17[%c0_125, %c0_126, %c0_127] : memref<8x8x8xf32, #tpu.memory_space<vmem>>, vector<8x8x8xf32>
    tpu.vector_store %arg17[%c0_125, %c0_126, %c0_127], %383 {strides = array<i32>} : memref<8x8x8xf32, #tpu.memory_space<vmem>>, vector<8x8x8xf32>,
    %c0_128 = arith.constant 0 : index
    %c0_129 = arith.constant 0 : index
    %385 = vector.load %arg12[%c0_128, %c0_129] : memref<8x22xf32, #tpu.memory_space<vmem>>, vector<8x22xf32>
    %cst_130 = arith.constant dense<0.000000e+00> : vector<64x22xf32>
    %386 = tpu.matmul %382, %385, %cst_130 {dimension_numbers = #tpu.dot_dimension_numbers<[1], [0], [0], [1], [0, 0, 1, 1], [], []>} : vector<64x8xf32>, vector<8x22xf32>, vector<64x22xf32> -> vector<64x22xf32>
    %c0_131 = arith.constant 0 : index
    %c0_132 = arith.constant 0 : index
    %387 = vector.load %arg13[%c0_131, %c0_132] : memref<1x22xf32, #tpu.memory_space<vmem>>, vector<1x22xf32>
    %388 = vector.broadcast %387 : vector<1x22xf32> to vector<64x22xf32>
    %389 = arith.addf %386, %388 : vector<64x22xf32>
    %390 = math.tanh %389 : vector<64x22xf32>
    %c0_133 = arith.constant 0 : index
    %c0_134 = arith.constant 0 : index
    %391 = vector.load %arg14[%c0_133, %c0_134] : memref<22x32xf32, #tpu.memory_space<vmem>>, vector<22x32xf32>
    %cst_135 = arith.constant dense<0.000000e+00> : vector<64x32xf32>
    %392 = tpu.matmul %390, %391, %cst_135 {dimension_numbers = #tpu.dot_dimension_numbers<[1], [0], [0], [1], [0, 0, 1, 1], [], []>} : vector<64x22xf32>, vector<22x32xf32>, vector<64x32xf32> -> vector<64x32xf32>
    %c0_136 = arith.constant 0 : index
    %c0_137 = arith.constant 0 : index
    %393 = vector.load %arg15[%c0_136, %c0_137] : memref<1x32xf32, #tpu.memory_space<vmem>>, vector<1x32xf32>
    %394 = vector.broadcast %393 : vector<1x32xf32> to vector<64x32xf32>
    %395 = arith.addf %392, %394 : vector<64x32xf32>
    %396 = vector.shape_cast %395 : vector<64x32xf32> to vector<8x8x32xf32>
    %c0_138 = arith.constant 0 : index
    %c0_139 = arith.constant 0 : index
    %c0_140 = arith.constant 0 : index
    %397 = vector.load %arg16[%c0_138, %c0_139, %c0_140] : memref<8x8x32xf32, #tpu.memory_space<vmem>>, vector<8x8x32xf32>
    tpu.vector_store %arg16[%c0_138, %c0_139, %c0_140], %396 {strides = array<i32>} : memref<8x8x32xf32, #tpu.memory_space<vmem>>, vector<8x8x32xf32>,
    return
  }
  func.func @transform_0(%arg0: i32, %arg1: memref<8xf32, #tpu.memory_space<smem>>) -> (i32, i32) {
    %c0_i32 = arith.constant 0 : i32
    %c0_i32_0 = arith.constant 0 : i32
    return %arg0, %c0_i32 : i32, i32
  }
  func.func @transform_1(%arg0: i32, %arg1: memref<8xf32, #tpu.memory_space<smem>>) -> (i32, i32) {
    %c0_i32 = arith.constant 0 : i32
    %c0_i32_0 = arith.constant 0 : i32
    %c0_i32_1 = arith.constant 0 : i32
    return %c0_i32, %c0_i32_0 : i32, i32
  }
  func.func @transform_2(%arg0: i32, %arg1: memref<8xf32, #tpu.memory_space<smem>>) -> (i32, i32) {
    %c0_i32 = arith.constant 0 : i32
    %c0_i32_0 = arith.constant 0 : i32
    %c0_i32_1 = arith.constant 0 : i32
    return %c0_i32, %c0_i32_0 : i32, i32
  }
  func.func @transform_3(%arg0: i32, %arg1: memref<8xf32, #tpu.memory_space<smem>>) -> (i32, i32) {
    %c0_i32 = arith.constant 0 : i32
    %c0_i32_0 = arith.constant 0 : i32
    %c0_i32_1 = arith.constant 0 : i32
    return %c0_i32, %c0_i32_0 : i32, i32
  }
  func.func @transform_4(%arg0: i32, %arg1: memref<8xf32, #tpu.memory_space<smem>>) -> (i32, i32) {
    %c0_i32 = arith.constant 0 : i32
    %c0_i32_0 = arith.constant 0 : i32
    %c0_i32_1 = arith.constant 0 : i32
    return %c0_i32, %c0_i32_0 : i32, i32
  }
  func.func @transform_5(%arg0: i32, %arg1: memref<8xf32, #tpu.memory_space<smem>>) -> (i32, i32) {
    %c0_i32 = arith.constant 0 : i32
    %c0_i32_0 = arith.constant 0 : i32
    %c0_i32_1 = arith.constant 0 : i32
    return %c0_i32, %c0_i32_0 : i32, i32
  }
  func.func @transform_6(%arg0: i32, %arg1: memref<8xf32, #tpu.memory_space<smem>>) -> (i32, i32) {
    %c0_i32 = arith.constant 0 : i32
    %c0_i32_0 = arith.constant 0 : i32
    %c0_i32_1 = arith.constant 0 : i32
    return %c0_i32, %c0_i32_0 : i32, i32
  }
  func.func @transform_7(%arg0: i32, %arg1: memref<8xf32, #tpu.memory_space<smem>>) -> (i32, i32) {
    %c0_i32 = arith.constant 0 : i32
    %c0_i32_0 = arith.constant 0 : i32
    %c0_i32_1 = arith.constant 0 : i32
    return %c0_i32, %c0_i32_0 : i32, i32
  }
  func.func @transform_8(%arg0: i32, %arg1: memref<8xf32, #tpu.memory_space<smem>>) -> (i32, i32) {
    %c0_i32 = arith.constant 0 : i32
    %c0_i32_0 = arith.constant 0 : i32
    %c0_i32_1 = arith.constant 0 : i32
    return %c0_i32, %c0_i32_0 : i32, i32
  }
  func.func @transform_9(%arg0: i32, %arg1: memref<8xf32, #tpu.memory_space<smem>>) -> (i32, i32) {
    %c0_i32 = arith.constant 0 : i32
    %c0_i32_0 = arith.constant 0 : i32
    %c0_i32_1 = arith.constant 0 : i32
    return %c0_i32, %c0_i32_0 : i32, i32
  }
  func.func @transform_10(%arg0: i32, %arg1: memref<8xf32, #tpu.memory_space<smem>>) -> (i32, i32) {
    %c0_i32 = arith.constant 0 : i32
    %c0_i32_0 = arith.constant 0 : i32
    %c0_i32_1 = arith.constant 0 : i32
    return %c0_i32, %c0_i32_0 : i32, i32
  }
  func.func @transform_11(%arg0: i32, %arg1: memref<8xf32, #tpu.memory_space<smem>>) -> (i32, i32) {
    %c0_i32 = arith.constant 0 : i32
    %c0_i32_0 = arith.constant 0 : i32
    %c0_i32_1 = arith.constant 0 : i32
    return %c0_i32, %c0_i32_0 : i32, i32
  }
  func.func @transform_12(%arg0: i32, %arg1: memref<8xf32, #tpu.memory_space<smem>>) -> (i32, i32) {
    %c0_i32 = arith.constant 0 : i32
    %c0_i32_0 = arith.constant 0 : i32
    %c0_i32_1 = arith.constant 0 : i32
    return %c0_i32, %c0_i32_0 : i32, i32
  }
  func.func @transform_13(%arg0: i32, %arg1: memref<8xf32, #tpu.memory_space<smem>>) -> (i32, i32) {
    %c0_i32 = arith.constant 0 : i32
    %c0_i32_0 = arith.constant 0 : i32
    %c0_i32_1 = arith.constant 0 : i32
    return %c0_i32, %c0_i32_0 : i32, i32
  }
  func.func @transform_14(%arg0: i32, %arg1: memref<8xf32, #tpu.memory_space<smem>>) -> (i32, i32, i32) {
    %c0_i32 = arith.constant 0 : i32
    %c0_i32_0 = arith.constant 0 : i32
    %c0_i32_1 = arith.constant 0 : i32
    return %c0_i32, %arg0, %c0_i32_0 : i32, i32, i32
  }
  func.func @transform_15(%arg0: i32, %arg1: memref<8xf32, #tpu.memory_space<smem>>) -> (i32, i32, i32) {
    %c0_i32 = arith.constant 0 : i32
    %c0_i32_0 = arith.constant 0 : i32
    %c0_i32_1 = arith.constant 0 : i32
    return %c0_i32, %arg0, %c0_i32_0 : i32, i32, i32
  }
}

</mosaic_0001>

<bundles_post_ra>
// kernel: tpu_custom_call.1
= control target key start
LH: loop header
LB: loop body
LE: loop exit
PB: predicated region body
PF: predicated region fallthrough
CT: control target
= control target key end

     0   :  { %s10068_s0 = inlined_call_operand.vmem [shape: f32[8], index: 0, kind: input, shape index: {}]   ;;  %s10069_s1 = inlined_call_operand.vmem [shape: f32[8,36], index: 1, kind: input, shape index: {}]   ;;  %s10070_s2 = inlined_call_operand.vmem [shape: f32[36,22], index: 2, kind: input, shape index: {}]   ;;  %s10071_s3 = inlined_call_operand.vmem [shape: f32[1,22], index: 3, kind: input, shape index: {}]   ;;  %s10072_s4 = inlined_call_operand.vmem [shape: f32[22,8], index: 4, kind: input, shape index: {}]   ;;  %s10073_s5 = inlined_call_operand.vmem [shape: f32[1,8], index: 5, kind: input, shape index: {}]   ;;  %s10074_s6 = inlined_call_operand.vmem [shape: f32[8,73], index: 6, kind: input, shape index: {}]   ;;  %s10075_s7 = inlined_call_operand.vmem [shape: f32[8,73], index: 7, kind: input, shape index: {}]   ;;  %s10076_s8 = inlined_call_operand.vmem [shape: f32[1,73], index: 8, kind: input, shape index: {}]   ;;  %s10077_s9 = inlined_call_operand.vmem [shape: f32[1,73], index: 9, kind: input, shape index: {}]   ;;  %s10078_s10 = inlined_call_operand.vmem [shape: f32[73,8], index: 10, kind: input, shape index: {}]   ;;  %s10079_s11 = inlined_call_operand.vmem [shape: f32[8,22], index: 11, kind: input, shape index: {}]   ;;  %s10080_s12 = inlined_call_operand.vmem [shape: f32[1,22], index: 12, kind: input, shape index: {}]   ;;  %s10081_s13 = inlined_call_operand.vmem [shape: f32[22,32], index: 13, kind: input, shape index: {}]   ;;  %s10082_s14 = inlined_call_operand.vmem [shape: f32[1,32], index: 14, kind: input, shape index: {}]   ;;  %s10083_s15 = inlined_call_operand.hbm [shape: f32[8,8,32], index: 15, kind: output, shape index: {0}]   ;;  %s10084_s16 = inlined_call_operand.hbm [shape: f32[8,8,8], index: 16, kind: output, shape index: {1}]  }
   0x1   :  { %10086 = sst [smem:[#allocation11_spill]] %s10068_s0 }
   0x2   :  { %10087 = sst [smem:[#allocation12_spill]] %s10077_s9 }
   0x3   :  { %s10088_s23 = sld [smem:[#allocation11_spill]] }
   0x9   :  { %s22_s9 = sshll.u32 %s10088_s23, 4  ;;  %s23_s9 = int_to_ptr.vmem [resolvable:$true] %s22_s9 }
   0xa   :  { %s8417_s24 = scalar_lea.vmem %s23_s9, 16  ;;  %p8422_p1 = scmp.lt.s32.totalorder %s23_s9, %s23_s9 }
   0xb   :  { %p8418_p0 = scmp.ne.s32.totalorder %s23_s9, %s8417_s24  ;;  %p8423_p2 = scmp.lt.s32.totalorder %s8417_s24, %s8417_s24 }
   0xd   :  { %p8424_p3 = por %p8423_p2, %p8422_p1 }
   0xf   :  { %p8425_p4 = pnand %p8424_p3, %p8418_p0 }
  0x11   :  { %8428 = shalt.err (!%p8425_p4)  }
  0x12   :  { %s8475_s25 = smov [#allocation3]  }
  0x13   :  { %25 = dma.vmem_to_smem %s23_s9, 16, %s8475_s25, [#allocation2] }
  0x14   :  { %8469 = dma.done.wait [#allocation2], 16 }
  0x15   :  { %8470 = vsyncadd [#allocation2], 4294967280 }
  0x16   :  { %27 = sfence }
  0x17   :  { %28 = vsyncpa [#allocation5], 0  ;;  %v63_v0 = vld [vmem:[%s10070_s2 + $0x20] sm:$0xf]  ;;  %vm75_vm0 = vcmask 1043456   ;;  %v8476_v1 = vmov 0.0  }
  0x18   :  { %7384 = vmatprep.subr.mxu1 %v8476_v1  ;;  %v62_v2 = vld [vmem:[%s10070_s2 + $0x18] sm:$0xff]  ;;  %7406 = vmatprep.subr.mxu0 %v8476_v1  ;;  %vm8477_vm1 = vmmov 0  }
  0x19   :  { %7385 = vmatpush3.msk.msra.mxu1 %vm75_vm0, %v63_v0  ;;  %7394 = vmatprep.mubr.msk.f32.mxu1 %vm8477_vm1, %v8476_v1 }
  0x1a   :  { %29 = vsyncpa [#allocation7], 0  ;;  %7386 = vmatprep.subr.mxu1 %v8476_v1  ;;  %v61_v3 = vld [vmem:[%s10070_s2 + $0x10] sm:$0xff]  ;;  %7408 = vmatprep.mubr.msk.f32.mxu0 %vm8477_vm1, %v8476_v1  ;;  %v60_v4 = vld [vmem:[%s10070_s2 + $0x8] sm:$0xff]  ;;  %vm71_vm2 = vcmask 293888   ;;  %vm164_vm3 = vcmask 1045504  }
  0x1b   :  { %7387 = vmatpush3.msra.mxu1 %v62_v2  ;;  %v59_v5 = vld [vmem:[%s10070_s2] sm:$0xff]  ;;  %v152_v7 = vld [vmem:[%s10072_s4 + $0x10] sm:$0x3f]  ;;  %v151_v8 = vld [vmem:[%s10072_s4 + $0x8] sm:$0xff]  ;;  %vm160_vm4 = vcmask 179200   ;;  %vm416_vm5 = vcmask 1040384  }
  0x1c   :  { %7388 = vmatprep.subr.mxu1 %v8476_v1  ;;  %v58_v6 = vld [vmem:[%s10069_s1] sm:$0xff]  ;;  %v8630_v16 = vld [vmem:[%s10078_s10 + $0x48] sm:$0x1]  ;;  %v8643_v18 = vld [vmem:[%s10078_s10 + $0x38] sm:$0xff]  ;;  %vm261_vm6 = vcmask 64512   ;;  %s10089_s19 = sld [smem:[#allocation12_spill]] }
  0x1d   :  { %7389 = vmatpush3.msra.mxu1 %v61_v3  ;;  %v150_v9 = vld [vmem:[%s10072_s4] sm:$0xff]  ;;  %v8650_v19 = vld [vmem:[%s10078_s10 + $0x30] sm:$0xff]  ;;  %v8657_v20 = vld [vmem:[%s10078_s10 + $0x28] sm:$0xff]  ;;  %vm412_vm7 = vcmask 596992   ;;  %s8739_s20 = sld [smem:[#allocation3 + $0x1]]  ;;  %vm6747_vm8 = vcmask 261120  }
  0x1e   :  { %7390 = vmatprep.subr.mxu1 %v8476_v1  ;;  %v6788_v10 = vld [vmem:[%s10071_s3] ss:$0 sm:$0xff]  ;;  %v8697_v28 = vld [vmem:[%s10078_s10 + $0x18] sm:$0xff]  ;;  %v8704_v29 = vld [vmem:[%s10078_s10 + $0x10] sm:$0xff]  ;;  %s8906_s23 = sld [smem:[#allocation3 + $0x2]] }
  0x1f   :  { %7391 = vmatpush3.msra.mxu1 %v60_v4  ;;  %v8623_v15 = vld [vmem:[%s10074_s6] sm:$0xff]  ;;  %v8711_v30 = vld [vmem:[%s10078_s10 + $0x8] sm:$0xff]  ;;  %s9310_s0 = sld [smem:[#allocation3 + $0x4]] }
  0x20   :  { %7392 = vmatprep.subr.mxu1 %v8476_v1  ;;  %7407 = vmatpush3.msra.mxu0 %v8623_v15  ;;  %v8635_v17 = vld [vmem:[%s10078_s10 + $0x40] sm:$0xff] }
  0x21   :  { %7393 = vmatpush3.msra.mxu1 %v59_v5  ;;  %7411 = vmatprep.subr.mxu0 %v8476_v1  ;;  %v6791_v21 = vld [vmem:[%s10073_s5] ss:$0 sm:$0xff]  ;;  %s9073_s5 = sld [smem:[#allocation3 + $0x3]] }
  0x22   :  { %7395 = vmatmul.mubr.msk.f32.vlgmr.msra.gmra.mxu1 %vm71_vm2, %v58_v6  ;;  %7397 = vmatprep.subr.mxu1 %v8476_v1  ;;  %v8669_v25 = vld [vmem:[%s10075_s7] sm:$0xff] }
  0x23   :  { %7403 = vmatprep.mubr.msk.f32.mxu1 %vm8477_vm1, %v8476_v1  ;;  %7398 = vmatpush3.msk.msra.mxu1 %vm164_vm3, %v152_v7  ;;  %v8690_v27 = vld [vmem:[%s10078_s10 + $0x20] sm:$0xff]  ;;  %s254_s21 = smul.f32 0.5, %s8739_s20  ;;  %v929_v0 = vstv %s8739_s20 }
  0x24   :  { %7399 = vmatprep.subr.mxu1 %v8476_v1  ;;  %v8718_v31 = vld [vmem:[%s10078_s10] sm:$0xff]  ;;  %s1149_s22 = smul.f32 0.16666667, %s8739_s20  ;;  %s9477_s20 = sld [smem:[#allocation3 + $0x5]] }
  0x25   :  { %7400 = vmatpush3.msra.mxu1 %v151_v8  ;;  %v8725_v33 = vld [vmem:[%s10076_s8] ss:$0 sm:$0xff]  ;;  %v490_v41 = vstv %s254_s21  ;;  %s1158_s2 = smul.f32 0.5, %s8906_s23 }
  0x26   :  { %7401 = vmatprep.subr.mxu1 %v8476_v1  ;;  %v8730_v35 = vld [vmem:[%s10089_s19] ss:$0 sm:$0xff]  ;;  %s2035_s24 = smul.f32 0.16666667, %s8906_s23 }
  0x27   :  { %7402 = vmatpush3.msra.mxu1 %v150_v9  ;;  %s2044_s1 = smul.f32 0.5, %s9073_s5 }
  0x28   :  { %7416 = vmatprep.subr.mxu1 %v8476_v1  ;;  %s2921_s27 = smul.f32 0.16666667, %s9073_s5 }
  0x29   :  { %s2930_s17 = smul.f32 0.5, %s9310_s0 }
  0x2a   :  { %s3807_s18 = smul.f32 0.16666667, %s9310_s0 }
  0x2b   :  { %s3816_s21 = smul.f32 0.5, %s9477_s20 }
  0xe2   :  { %v145_v11 = vpop.f32.mrf.mxu1 }
  0xe3   :  { %v146_v12 = vadd.f32 %v6788_v10, %v145_v11 }
  0xe4   :  { %v7396_v13 = vpop.f32.mrf.mxu1 }
  0xe5   :  { %8369 = vtanh.f32 %v146_v12 }
  0xf2   :  { %v8370_v14 = vpop.eup %8369 }
  0xf3   :  { %7404 = vmatmul.mubr.msk.f32.vlgmr.msra.gmra.mxu1 %vm160_vm4, %v8370_v14 }
  0xf4   :  { %7436 = vmatprep.mubr.msk.f32.mxu1 %vm8477_vm1, %v8476_v1  ;;  %7417 = vmatpush3.msk.msra.mxu1 %vm416_vm5, %v8630_v16 }
  0xf5   :  { %7418 = vmatprep.subr.mxu1 %v8476_v1 }
  0xf6   :  { %7419 = vmatpush3.msra.mxu1 %v8635_v17 }
  0xf7   :  { %7420 = vmatprep.subr.mxu1 %v8476_v1 }
  0xf8   :  { %7421 = vmatpush3.msra.mxu1 %v8643_v18 }
  0xf9   :  { %7422 = vmatprep.subr.mxu1 %v8476_v1 }
  0xfa   :  { %7423 = vmatpush3.msra.mxu1 %v8650_v19 }
  0xfb   :  { %7424 = vmatprep.subr.mxu1 %v8476_v1 }
  0xfc   :  { %7425 = vmatpush3.msra.mxu1 %v8657_v20 }
  0xfd   :  { %7426 = vmatprep.subr.mxu1 %v8476_v1 }
  0xfe   :  { %7427 = vmatpush3.msra.mxu1 %v8690_v27 }
  0xff   :  { %7428 = vmatprep.subr.mxu1 %v8476_v1 }
 0x100   :  { %7429 = vmatpush3.msra.mxu1 %v8697_v28 }
 0x101   :  { %7430 = vmatprep.subr.mxu1 %v8476_v1 }
 0x102   :  { %7431 = vmatpush3.msra.mxu1 %v8704_v29 }
 0x103   :  { %7432 = vmatprep.subr.mxu1 %v8476_v1 }
 0x104   :  { %7433 = vmatpush3.msra.mxu1 %v8711_v30 }
 0x105   :  { %7434 = vmatprep.subr.mxu1 %v8476_v1 }
 0x106   :  { %7435 = vmatpush3.msra.mxu1 %v8718_v31 }
 0x107   :  { %7472 = vmatprep.subr.mxu1 %v8476_v1 }
 0x1b3   :  { %v234_v22 = vpop.f32.mrf.mxu1 }
 0x1b4   :  { %v235_v23 = vadd.f32 %v6791_v21, %v234_v22 }
 0x1b5   :  { %v7405_v24 = vpop.f32.mrf.mxu1 }
 0x1b6   :  { %8371 = vtanh.f32 %v235_v23  ;;  %v1154_v23 = vstv %s1149_s22  ;;  %s4693_s22 = smul.f32 0.16666667, %s9477_s20 }
 0x1c3   :  { %v8671_v26 = vpop.eup %8371 }
 0x1c4   :  { %7409 = vmatmul.mubr.msk.f32.vlgmr.msra.gmra.mxu0 %vm261_vm6, %v8671_v26  ;;  %6473 = vst.msk [vmem:[#allocation6] sm:$0xff] %vm261_vm6, %v8671_v26 }
 0x1c5   :  { %7412 = vmatpush3.msra.mxu0 %v8669_v25  ;;  %7413 = vmatprep.mubr.msk.f32.mxu0 %vm8477_vm1, %v8476_v1 }
 0x1c6   :  { %7439 = vmatprep.subr.mxu0 %v8476_v1 }
 0x1c8   :  { %7414 = vmatmul.mubr.msk.f32.vlgmr.msra.gmra.mxu0 %vm261_vm6, %v8671_v26 }
 0x1c9   :  { %7440 = vmatpush3.msra.mxu0 %v8623_v15  ;;  %7441 = vmatprep.mubr.msk.f32.mxu0 %vm8477_vm1, %v8476_v1 }
 0x1ca   :  { %7444 = vmatprep.subr.mxu0 %v8476_v1 }
 0x284   :  { %v331_v32 = vpop.f32.mrf.mxu0 }
 0x285   :  { %v332_v37 = vadd.f32 %v8725_v33, %v331_v32 }
 0x286   :  { %v7410_v34 = vpop.f32.mrf.mxu0 }
 0x288   :  { %v407_v36 = vpop.f32.mrf.mxu0 }
 0x289   :  { %v408_v38 = vadd.f32 %v8730_v35, %v407_v36 }
 0x28a   :  { %v7415_v39 = vpop.f32.mrf.mxu0 }
 0x28b   :  { %v411_v40 = vmul.f32 %v408_v38, %v332_v37 }
 0x28d   :  { %7437 = vmatmul.mubr.msk.f32.vlgmr.msra.gmra.mxu1 %vm412_vm7, %v411_v40 }
 0x28e   :  { %7473 = vmatpush3.msra.mxu1 %v8623_v15  ;;  %7474 = vmatprep.mubr.msk.f32.mxu1 %vm8477_vm1, %v8476_v1 }
 0x28f   :  { %7477 = vmatprep.subr.mxu1 %v8476_v1 }
 0x34d   :  { %v8742_v42 = vpop.f32.mrf.mxu1 }
 0x34e   :  { %v491_v43 = vmul.f32 %v490_v41, %v8742_v42 }
 0x34f   :  { %v7438_v44 = vpop.f32.mrf.mxu1 }
 0x350   :  { %v492_v45 = vadd.f32 %v8671_v26, %v491_v43  ;;  %v1376_v44 = vstv %s1158_s2 }
 0x352   :  { %7442 = vmatmul.mubr.msk.f32.vlgmr.msra.gmra.mxu0 %vm261_vm6, %v492_v45 }
 0x353   :  { %7445 = vmatpush3.msra.mxu0 %v8669_v25  ;;  %7446 = vmatprep.mubr.msk.f32.mxu0 %vm8477_vm1, %v8476_v1 }
 0x354   :  { %7449 = vmatprep.subr.mxu0 %v8476_v1 }
 0x356   :  { %7447 = vmatmul.mubr.msk.f32.vlgmr.msra.gmra.mxu0 %vm261_vm6, %v492_v45 }
 0x357   :  { %7450 = vmatpush3.msk.msra.mxu0 %vm416_vm5, %v8630_v16  ;;  %7469 = vmatprep.mubr.msk.f32.mxu0 %vm8477_vm1, %v8476_v1 }
 0x358   :  { %7451 = vmatprep.subr.mxu0 %v8476_v1 }
 0x359   :  { %7452 = vmatpush3.msra.mxu0 %v8635_v17 }
 0x35a   :  { %7453 = vmatprep.subr.mxu0 %v8476_v1 }
 0x35b   :  { %7454 = vmatpush3.msra.mxu0 %v8643_v18 }
 0x35c   :  { %7455 = vmatprep.subr.mxu0 %v8476_v1 }
 0x35d   :  { %7456 = vmatpush3.msra.mxu0 %v8650_v19 }
 0x35e   :  { %7457 = vmatprep.subr.mxu0 %v8476_v1 }
 0x35f   :  { %7458 = vmatpush3.msra.mxu0 %v8657_v20 }
 0x360   :  { %7459 = vmatprep.subr.mxu0 %v8476_v1 }
 0x361   :  { %7460 = vmatpush3.msra.mxu0 %v8690_v27 }
 0x362   :  { %7461 = vmatprep.subr.mxu0 %v8476_v1 }
 0x363   :  { %7462 = vmatpush3.msra.mxu0 %v8697_v28 }
 0x364   :  { %7463 = vmatprep.subr.mxu0 %v8476_v1 }
 0x365   :  { %7464 = vmatpush3.msra.mxu0 %v8704_v29 }
 0x366   :  { %7465 = vmatprep.subr.mxu0 %v8476_v1 }
 0x367   :  { %7466 = vmatpush3.msra.mxu0 %v8711_v30 }
 0x368   :  { %7467 = vmatprep.subr.mxu0 %v8476_v1 }
 0x369   :  { %7468 = vmatpush3.msra.mxu0 %v8718_v31 }
 0x36a   :  { %7505 = vmatprep.subr.mxu0 %v8476_v1 }
 0x412   :  { %v562_v46 = vpop.f32.mrf.mxu0 }
 0x413   :  { %v563_v49 = vadd.f32 %v8725_v33, %v562_v46 }
 0x414   :  { %v7443_v47 = vpop.f32.mrf.mxu0 }
 0x416   :  { %v632_v48 = vpop.f32.mrf.mxu0 }
 0x417   :  { %v633_v50 = vadd.f32 %v8730_v35, %v632_v48 }
 0x418   :  { %v7448_v51 = vpop.f32.mrf.mxu0 }
 0x419   :  { %v636_v52 = vmul.f32 %v633_v50, %v563_v49 }
 0x41b   :  { %7470 = vmatmul.mubr.msk.f32.vlgmr.msra.gmra.mxu0 %vm412_vm7, %v636_v52 }
 0x41c   :  { %7506 = vmatpush3.msra.mxu0 %v8623_v15  ;;  %7507 = vmatprep.mubr.msk.f32.mxu0 %vm8477_vm1, %v8476_v1 }
 0x41d   :  { %7510 = vmatprep.subr.mxu0 %v8476_v1 }
 0x4db   :  { %v8782_v53 = vpop.f32.mrf.mxu0 }
 0x4dc   :  { %v710_v54 = vmul.f32 %v8782_v53, %v490_v41 }
 0x4dd   :  { %v7471_v55 = vpop.f32.mrf.mxu0 }
 0x4de   :  { %v711_v56 = vadd.f32 %v8671_v26, %v710_v54 }
 0x4e0   :  { %7475 = vmatmul.mubr.msk.f32.vlgmr.msra.gmra.mxu1 %vm261_vm6, %v711_v56 }
 0x4e1   :  { %7478 = vmatpush3.msra.mxu1 %v8669_v25  ;;  %7479 = vmatprep.mubr.msk.f32.mxu1 %vm8477_vm1, %v8476_v1 }
 0x4e2   :  { %7482 = vmatprep.subr.mxu1 %v8476_v1 }
 0x4e4   :  { %7480 = vmatmul.mubr.msk.f32.vlgmr.msra.gmra.mxu1 %vm261_vm6, %v711_v56 }
 0x4e5   :  { %7483 = vmatpush3.msk.msra.mxu1 %vm416_vm5, %v8630_v16  ;;  %7502 = vmatprep.mubr.msk.f32.mxu1 %vm8477_vm1, %v8476_v1 }
 0x4e6   :  { %7484 = vmatprep.subr.mxu1 %v8476_v1 }
 0x4e7   :  { %7485 = vmatpush3.msra.mxu1 %v8635_v17 }
 0x4e8   :  { %7486 = vmatprep.subr.mxu1 %v8476_v1 }
 0x4e9   :  { %7487 = vmatpush3.msra.mxu1 %v8643_v18 }
 0x4ea   :  { %7488 = vmatprep.subr.mxu1 %v8476_v1 }
 0x4eb   :  { %7489 = vmatpush3.msra.mxu1 %v8650_v19 }
 0x4ec   :  { %7490 = vmatprep.subr.mxu1 %v8476_v1 }
 0x4ed   :  { %7491 = vmatpush3.msra.mxu1 %v8657_v20 }
 0x4ee   :  { %7492 = vmatprep.subr.mxu1 %v8476_v1 }
 0x4ef   :  { %7493 = vmatpush3.msra.mxu1 %v8690_v27 }
 0x4f0   :  { %7494 = vmatprep.subr.mxu1 %v8476_v1 }
 0x4f1   :  { %7495 = vmatpush3.msra.mxu1 %v8697_v28 }
 0x4f2   :  { %7496 = vmatprep.subr.mxu1 %v8476_v1 }
 0x4f3   :  { %7497 = vmatpush3.msra.mxu1 %v8704_v29 }
 0x4f4   :  { %7498 = vmatprep.subr.mxu1 %v8476_v1 }
 0x4f5   :  { %7499 = vmatpush3.msra.mxu1 %v8711_v30 }
 0x4f6   :  { %7500 = vmatprep.subr.mxu1 %v8476_v1 }
 0x4f7   :  { %7501 = vmatpush3.msra.mxu1 %v8718_v31 }
 0x4f8   :  { %7538 = vmatprep.subr.mxu1 %v8476_v1 }
 0x5a0   :  { %v781_v57 = vpop.f32.mrf.mxu1 }
 0x5a1   :  { %v782_v60 = vadd.f32 %v8725_v33, %v781_v57 }
 0x5a2   :  { %v7476_v58 = vpop.f32.mrf.mxu1 }
 0x5a4   :  { %v851_v59 = vpop.f32.mrf.mxu1 }
 0x5a5   :  { %v852_v61 = vadd.f32 %v8730_v35, %v851_v59 }
 0x5a6   :  { %v7481_v62 = vpop.f32.mrf.mxu1 }
 0x5a7   :  { %v855_v63 = vmul.f32 %v852_v61, %v782_v60 }
 0x5a9   :  { %7503 = vmatmul.mubr.msk.f32.vlgmr.msra.gmra.mxu1 %vm412_vm7, %v855_v63 }
 0x5aa   :  { %7539 = vmatpush3.msra.mxu1 %v8623_v15  ;;  %7540 = vmatprep.mubr.msk.f32.mxu1 %vm8477_vm1, %v8476_v1 }
 0x5ab   :  { %7543 = vmatprep.subr.mxu1 %v8476_v1 }
 0x669   :  { %v925_v2 = vpop.f32.mrf.mxu1 }
 0x66a   :  { %v930_v3 = vmul.f32 %v929_v0, %v925_v2  ;;  %v1150_v13 = vadd.f32 %v925_v2, %v8782_v53 }
 0x66b   :  { %v7504_v4 = vpop.f32.mrf.mxu1 }
 0x66c   :  { %v931_v5 = vadd.f32 %v8671_v26, %v930_v3  ;;  %v1151_v14 = vmul.f32 2.0, %v1150_v13  ;;  %v1815_v4 = vstv %s8906_s23  ;;  %s9644_s23 = sld [smem:[#allocation3 + $0x6]] }
 0x66e   :  { %7508 = vmatmul.mubr.msk.f32.vlgmr.msra.gmra.mxu0 %vm261_vm6, %v931_v5  ;;  %v1152_v21 = vadd.f32 %v1151_v14, %v8742_v42 }
 0x66f   :  { %7511 = vmatpush3.msra.mxu0 %v8669_v25  ;;  %7512 = vmatprep.mubr.msk.f32.mxu0 %vm8477_vm1, %v8476_v1 }
 0x670   :  { %7515 = vmatprep.subr.mxu0 %v8476_v1 }
 0x672   :  { %7513 = vmatmul.mubr.msk.f32.vlgmr.msra.gmra.mxu0 %vm261_vm6, %v931_v5  ;;  %s4702_s2 = smul.f32 0.5, %s9644_s23 }
 0x673   :  { %7516 = vmatpush3.msk.msra.mxu0 %vm416_vm5, %v8630_v16  ;;  %7535 = vmatprep.mubr.msk.f32.mxu0 %vm8477_vm1, %v8476_v1 }
 0x674   :  { %7517 = vmatprep.subr.mxu0 %v8476_v1 }
 0x675   :  { %7518 = vmatpush3.msra.mxu0 %v8635_v17 }
 0x676   :  { %7519 = vmatprep.subr.mxu0 %v8476_v1 }
 0x677   :  { %7520 = vmatpush3.msra.mxu0 %v8643_v18 }
 0x678   :  { %7521 = vmatprep.subr.mxu0 %v8476_v1 }
 0x679   :  { %7522 = vmatpush3.msra.mxu0 %v8650_v19 }
 0x67a   :  { %7523 = vmatprep.subr.mxu0 %v8476_v1 }
 0x67b   :  { %7524 = vmatpush3.msra.mxu0 %v8657_v20 }
 0x67c   :  { %7525 = vmatprep.subr.mxu0 %v8476_v1 }
 0x67d   :  { %7526 = vmatpush3.msra.mxu0 %v8690_v27 }
 0x67e   :  { %7527 = vmatprep.subr.mxu0 %v8476_v1 }
 0x67f   :  { %7528 = vmatpush3.msra.mxu0 %v8697_v28 }
 0x680   :  { %7529 = vmatprep.subr.mxu0 %v8476_v1 }
 0x681   :  { %7530 = vmatpush3.msra.mxu0 %v8704_v29 }
 0x682   :  { %7531 = vmatprep.subr.mxu0 %v8476_v1 }
 0x683   :  { %7532 = vmatpush3.msra.mxu0 %v8711_v30 }
 0x684   :  { %7533 = vmatprep.subr.mxu0 %v8476_v1 }
 0x685   :  { %7534 = vmatpush3.msra.mxu0 %v8718_v31 }
 0x686   :  { %7571 = vmatprep.subr.mxu0 %v8476_v1 }
 0x72e   :  { %v1001_v6 = vpop.f32.mrf.mxu0 }
 0x72f   :  { %v1002_v9 = vadd.f32 %v8725_v33, %v1001_v6 }
 0x730   :  { %v7509_v7 = vpop.f32.mrf.mxu0 }
 0x732   :  { %v1071_v8 = vpop.f32.mrf.mxu0 }
 0x733   :  { %v1072_v10 = vadd.f32 %v8730_v35, %v1071_v8 }
 0x734   :  { %v7514_v11 = vpop.f32.mrf.mxu0 }
 0x735   :  { %v1075_v12 = vmul.f32 %v1072_v10, %v1002_v9 }
 0x737   :  { %7536 = vmatmul.mubr.msk.f32.vlgmr.msra.gmra.mxu0 %vm412_vm7, %v1075_v12 }
 0x738   :  { %7572 = vmatpush3.msra.mxu0 %v8623_v15  ;;  %7573 = vmatprep.mubr.msk.f32.mxu0 %vm8477_vm1, %v8476_v1 }
 0x739   :  { %7576 = vmatprep.subr.mxu0 %v8476_v1 }
 0x7f7   :  { %v1145_v22 = vpop.f32.mrf.mxu0 }
 0x7f8   :  { %v1153_v24 = vadd.f32 %v1152_v21, %v1145_v22 }
 0x7f9   :  { %v7537_v32 = vpop.f32.mrf.mxu0 }
 0x7fa   :  { %v1155_v34 = vmul.f32 %v1154_v23, %v1153_v24 }
 0x7fc   :  { %v8864_v36 = vadd.f32 %v8671_v26, %v1155_v34  ;;  %v2040_v34 = vstv %s2035_s24 }
 0x7fe   :  { %6474 = vst.msk [vmem:[#allocation6 + $0x8] sm:$0xff] %vm261_vm6, %v8864_v36  ;;  %7541 = vmatmul.mubr.msk.f32.vlgmr.msra.gmra.mxu1 %vm261_vm6, %v8864_v36 }
 0x7ff   :  { %7544 = vmatpush3.msra.mxu1 %v8669_v25  ;;  %7545 = vmatprep.mubr.msk.f32.mxu1 %vm8477_vm1, %v8476_v1 }
 0x800   :  { %7548 = vmatprep.subr.mxu1 %v8476_v1 }
 0x802   :  { %7546 = vmatmul.mubr.msk.f32.vlgmr.msra.gmra.mxu1 %vm261_vm6, %v8864_v36 }
 0x803   :  { %7549 = vmatpush3.msk.msra.mxu1 %vm416_vm5, %v8630_v16  ;;  %7568 = vmatprep.mubr.msk.f32.mxu1 %vm8477_vm1, %v8476_v1 }
 0x804   :  { %7550 = vmatprep.subr.mxu1 %v8476_v1 }
 0x805   :  { %7551 = vmatpush3.msra.mxu1 %v8635_v17 }
 0x806   :  { %7552 = vmatprep.subr.mxu1 %v8476_v1 }
 0x807   :  { %7553 = vmatpush3.msra.mxu1 %v8643_v18 }
 0x808   :  { %7554 = vmatprep.subr.mxu1 %v8476_v1 }
 0x809   :  { %7555 = vmatpush3.msra.mxu1 %v8650_v19 }
 0x80a   :  { %7556 = vmatprep.subr.mxu1 %v8476_v1 }
 0x80b   :  { %7557 = vmatpush3.msra.mxu1 %v8657_v20 }
 0x80c   :  { %7558 = vmatprep.subr.mxu1 %v8476_v1 }
 0x80d   :  { %7559 = vmatpush3.msra.mxu1 %v8690_v27 }
 0x80e   :  { %7560 = vmatprep.subr.mxu1 %v8476_v1 }
 0x80f   :  { %7561 = vmatpush3.msra.mxu1 %v8697_v28 }
 0x810   :  { %7562 = vmatprep.subr.mxu1 %v8476_v1 }
 0x811   :  { %7563 = vmatpush3.msra.mxu1 %v8704_v29 }
 0x812   :  { %7564 = vmatprep.subr.mxu1 %v8476_v1 }
 0x813   :  { %7565 = vmatpush3.msra.mxu1 %v8711_v30 }
 0x814   :  { %7566 = vmatprep.subr.mxu1 %v8476_v1 }
 0x815   :  { %7567 = vmatpush3.msra.mxu1 %v8718_v31 }
 0x816   :  { %7604 = vmatprep.subr.mxu1 %v8476_v1 }
 0x8be   :  { %v1228_v37 = vpop.f32.mrf.mxu1 }
 0x8bf   :  { %v1229_v40 = vadd.f32 %v8725_v33, %v1228_v37 }
 0x8c0   :  { %v7542_v38 = vpop.f32.mrf.mxu1 }
 0x8c2   :  { %v1298_v39 = vpop.f32.mrf.mxu1 }
 0x8c3   :  { %v1299_v41 = vadd.f32 %v8730_v35, %v1298_v39 }
 0x8c4   :  { %v7547_v42 = vpop.f32.mrf.mxu1 }
 0x8c5   :  { %v1302_v43 = vmul.f32 %v1299_v41, %v1229_v40 }
 0x8c7   :  { %7569 = vmatmul.mubr.msk.f32.vlgmr.msra.gmra.mxu1 %vm412_vm7, %v1302_v43 }
 0x8c8   :  { %7605 = vmatpush3.msra.mxu1 %v8623_v15  ;;  %7606 = vmatprep.mubr.msk.f32.mxu1 %vm8477_vm1, %v8476_v1 }
 0x8c9   :  { %7609 = vmatprep.subr.mxu1 %v8476_v1 }
 0x987   :  { %v8909_v45 = vpop.f32.mrf.mxu1 }
 0x988   :  { %v1377_v46 = vmul.f32 %v1376_v44, %v8909_v45 }
 0x989   :  { %v7570_v47 = vpop.f32.mrf.mxu1 }
 0x98a   :  { %v1378_v48 = vadd.f32 %v1377_v46, %v8864_v36 }
 0x98c   :  { %7574 = vmatmul.mubr.msk.f32.vlgmr.msra.gmra.mxu0 %vm261_vm6, %v1378_v48 }
 0x98d   :  { %7577 = vmatpush3.msra.mxu0 %v8669_v25  ;;  %7578 = vmatprep.mubr.msk.f32.mxu0 %vm8477_vm1, %v8476_v1 }
 0x98e   :  { %7581 = vmatprep.subr.mxu0 %v8476_v1 }
 0x990   :  { %7579 = vmatmul.mubr.msk.f32.vlgmr.msra.gmra.mxu0 %vm261_vm6, %v1378_v48  ;;  %v2262_v48 = vstv %s2044_s1  ;;  %s5579_s1 = smul.f32 0.16666667, %s9644_s23 }
 0x991   :  { %7582 = vmatpush3.msk.msra.mxu0 %vm416_vm5, %v8630_v16  ;;  %7601 = vmatprep.mubr.msk.f32.mxu0 %vm8477_vm1, %v8476_v1 }
 0x992   :  { %7583 = vmatprep.subr.mxu0 %v8476_v1 }
 0x993   :  { %7584 = vmatpush3.msra.mxu0 %v8635_v17 }
 0x994   :  { %7585 = vmatprep.subr.mxu0 %v8476_v1 }
 0x995   :  { %7586 = vmatpush3.msra.mxu0 %v8643_v18 }
 0x996   :  { %7587 = vmatprep.subr.mxu0 %v8476_v1 }
 0x997   :  { %7588 = vmatpush3.msra.mxu0 %v8650_v19 }
 0x998   :  { %7589 = vmatprep.subr.mxu0 %v8476_v1 }
 0x999   :  { %7590 = vmatpush3.msra.mxu0 %v8657_v20 }
 0x99a   :  { %7591 = vmatprep.subr.mxu0 %v8476_v1 }
 0x99b   :  { %7592 = vmatpush3.msra.mxu0 %v8690_v27 }
 0x99c   :  { %7593 = vmatprep.subr.mxu0 %v8476_v1 }
 0x99d   :  { %7594 = vmatpush3.msra.mxu0 %v8697_v28 }
 0x99e   :  { %7595 = vmatprep.subr.mxu0 %v8476_v1 }
 0x99f   :  { %7596 = vmatpush3.msra.mxu0 %v8704_v29 }
 0x9a0   :  { %7597 = vmatprep.subr.mxu0 %v8476_v1 }
 0x9a1   :  { %7598 = vmatpush3.msra.mxu0 %v8711_v30 }
 0x9a2   :  { %7599 = vmatprep.subr.mxu0 %v8476_v1 }
 0x9a3   :  { %7600 = vmatpush3.msra.mxu0 %v8718_v31 }
 0x9a4   :  { %7637 = vmatprep.subr.mxu0 %v8476_v1 }
 0xa4c   :  { %v1448_v49 = vpop.f32.mrf.mxu0 }
 0xa4d   :  { %v1449_v52 = vadd.f32 %v8725_v33, %v1448_v49 }
 0xa4e   :  { %v7575_v50 = vpop.f32.mrf.mxu0 }
 0xa50   :  { %v1518_v51 = vpop.f32.mrf.mxu0 }
 0xa51   :  { %v1519_v53 = vadd.f32 %v8730_v35, %v1518_v51 }
 0xa52   :  { %v7580_v54 = vpop.f32.mrf.mxu0 }
 0xa53   :  { %v1522_v55 = vmul.f32 %v1519_v53, %v1449_v52 }
 0xa55   :  { %7602 = vmatmul.mubr.msk.f32.vlgmr.msra.gmra.mxu0 %vm412_vm7, %v1522_v55 }
 0xa56   :  { %7638 = vmatpush3.msra.mxu0 %v8623_v15  ;;  %7639 = vmatprep.mubr.msk.f32.mxu0 %vm8477_vm1, %v8476_v1 }
 0xa57   :  { %7642 = vmatprep.subr.mxu0 %v8476_v1 }
 0xb15   :  { %v8949_v56 = vpop.f32.mrf.mxu0 }
 0xb16   :  { %v1596_v57 = vmul.f32 %v8949_v56, %v1376_v44 }
 0xb17   :  { %v7603_v58 = vpop.f32.mrf.mxu0 }
 0xb18   :  { %v1597_v59 = vadd.f32 %v1596_v57, %v8864_v36 }
 0xb1a   :  { %7607 = vmatmul.mubr.msk.f32.vlgmr.msra.gmra.mxu1 %vm261_vm6, %v1597_v59 }
 0xb1b   :  { %7610 = vmatpush3.msra.mxu1 %v8669_v25  ;;  %7611 = vmatprep.mubr.msk.f32.mxu1 %vm8477_vm1, %v8476_v1 }
 0xb1c   :  { %7614 = vmatprep.subr.mxu1 %v8476_v1 }
 0xb1e   :  { %7612 = vmatmul.mubr.msk.f32.vlgmr.msra.gmra.mxu1 %vm261_vm6, %v1597_v59 }
 0xb1f   :  { %7615 = vmatpush3.msk.msra.mxu1 %vm416_vm5, %v8630_v16  ;;  %7634 = vmatprep.mubr.msk.f32.mxu1 %vm8477_vm1, %v8476_v1 }
 0xb20   :  { %7616 = vmatprep.subr.mxu1 %v8476_v1 }
 0xb21   :  { %7617 = vmatpush3.msra.mxu1 %v8635_v17 }
 0xb22   :  { %7618 = vmatprep.subr.mxu1 %v8476_v1 }
 0xb23   :  { %7619 = vmatpush3.msra.mxu1 %v8643_v18 }
 0xb24   :  { %7620 = vmatprep.subr.mxu1 %v8476_v1 }
 0xb25   :  { %7621 = vmatpush3.msra.mxu1 %v8650_v19 }
 0xb26   :  { %7622 = vmatprep.subr.mxu1 %v8476_v1 }
 0xb27   :  { %7623 = vmatpush3.msra.mxu1 %v8657_v20 }
 0xb28   :  { %7624 = vmatprep.subr.mxu1 %v8476_v1 }
 0xb29   :  { %7625 = vmatpush3.msra.mxu1 %v8690_v27 }
 0xb2a   :  { %7626 = vmatprep.subr.mxu1 %v8476_v1 }
 0xb2b   :  { %7627 = vmatpush3.msra.mxu1 %v8697_v28 }
 0xb2c   :  { %7628 = vmatprep.subr.mxu1 %v8476_v1 }
 0xb2d   :  { %7629 = vmatpush3.msra.mxu1 %v8704_v29 }
 0xb2e   :  { %7630 = vmatprep.subr.mxu1 %v8476_v1 }
 0xb2f   :  { %7631 = vmatpush3.msra.mxu1 %v8711_v30 }
 0xb30   :  { %7632 = vmatprep.subr.mxu1 %v8476_v1 }
 0xb31   :  { %7633 = vmatpush3.msra.mxu1 %v8718_v31 }
 0xb32   :  { %7670 = vmatprep.subr.mxu1 %v8476_v1 }
 0xbda   :  { %v1667_v60 = vpop.f32.mrf.mxu1 }
 0xbdb   :  { %v1668_v63 = vadd.f32 %v8725_v33, %v1667_v60 }
 0xbdc   :  { %v7608_v61 = vpop.f32.mrf.mxu1 }
 0xbde   :  { %v1737_v62 = vpop.f32.mrf.mxu1 }
 0xbdf   :  { %v1738_v0 = vadd.f32 %v8730_v35, %v1737_v62 }
 0xbe0   :  { %v7613_v2 = vpop.f32.mrf.mxu1 }
 0xbe1   :  { %v1741_v3 = vmul.f32 %v1738_v0, %v1668_v63 }
 0xbe3   :  { %7635 = vmatmul.mubr.msk.f32.vlgmr.msra.gmra.mxu1 %vm412_vm7, %v1741_v3 }
 0xbe4   :  { %7671 = vmatpush3.msra.mxu1 %v8623_v15  ;;  %7672 = vmatprep.mubr.msk.f32.mxu1 %vm8477_vm1, %v8476_v1 }
 0xbe5   :  { %7675 = vmatprep.subr.mxu1 %v8476_v1 }
 0xca3   :  { %v1811_v5 = vpop.f32.mrf.mxu1 }
 0xca4   :  { %v1816_v6 = vmul.f32 %v1815_v4, %v1811_v5  ;;  %v2036_v22 = vadd.f32 %v1811_v5, %v8949_v56 }
 0xca5   :  { %v7636_v7 = vpop.f32.mrf.mxu1 }
 0xca6   :  { %v1817_v8 = vadd.f32 %v1816_v6, %v8864_v36  ;;  %v2037_v23 = vmul.f32 2.0, %v2036_v22  ;;  %v9212_v22 = vld [vmem:[%s10075_s7] sm:$0xff] }
 0xca8   :  { %7640 = vmatmul.mubr.msk.f32.vlgmr.msra.gmra.mxu0 %vm261_vm6, %v1817_v8  ;;  %v2038_v24 = vadd.f32 %v2037_v23, %v8909_v45  ;;  %v9223_v23 = vld [vmem:[%s10078_s10 + $0x48] sm:$0x1] }
 0xca9   :  { %7643 = vmatpush3.msra.mxu0 %v8669_v25  ;;  %7644 = vmatprep.mubr.msk.f32.mxu0 %vm8477_vm1, %v8476_v1 }
 0xcaa   :  { %7647 = vmatprep.subr.mxu0 %v8476_v1 }
 0xcac   :  { %7645 = vmatmul.mubr.msk.f32.vlgmr.msra.gmra.mxu0 %vm261_vm6, %v1817_v8  ;;  %v2701_v8 = vstv %s9073_s5 }
 0xcad   :  { %7648 = vmatpush3.msk.msra.mxu0 %vm416_vm5, %v8630_v16  ;;  %7667 = vmatprep.mubr.msk.f32.mxu0 %vm8477_vm1, %v8476_v1 }
 0xcae   :  { %7649 = vmatprep.subr.mxu0 %v8476_v1 }
 0xcaf   :  { %7650 = vmatpush3.msra.mxu0 %v8635_v17 }
 0xcb0   :  { %7651 = vmatprep.subr.mxu0 %v8476_v1 }
 0xcb1   :  { %7652 = vmatpush3.msra.mxu0 %v8643_v18 }
 0xcb2   :  { %7653 = vmatprep.subr.mxu0 %v8476_v1 }
 0xcb3   :  { %7654 = vmatpush3.msra.mxu0 %v8650_v19 }
 0xcb4   :  { %7655 = vmatprep.subr.mxu0 %v8476_v1 }
 0xcb5   :  { %7656 = vmatpush3.msra.mxu0 %v8657_v20 }
 0xcb6   :  { %7657 = vmatprep.subr.mxu0 %v8476_v1 }
 0xcb7   :  { %7658 = vmatpush3.msra.mxu0 %v8690_v27 }
 0xcb8   :  { %7659 = vmatprep.subr.mxu0 %v8476_v1 }
 0xcb9   :  { %7660 = vmatpush3.msra.mxu0 %v8697_v28 }
 0xcba   :  { %7661 = vmatprep.subr.mxu0 %v8476_v1 }
 0xcbb   :  { %7662 = vmatpush3.msra.mxu0 %v8704_v29 }
 0xcbc   :  { %7663 = vmatprep.subr.mxu0 %v8476_v1 }
 0xcbd   :  { %7664 = vmatpush3.msra.mxu0 %v8711_v30 }
 0xcbe   :  { %7665 = vmatprep.subr.mxu0 %v8476_v1 }
 0xcbf   :  { %7666 = vmatpush3.msra.mxu0 %v8718_v31 }
 0xcc0   :  { %7703 = vmatprep.subr.mxu0 %v8476_v1 }
 0xd68   :  { %v1887_v9 = vpop.f32.mrf.mxu0 }
 0xd69   :  { %v1888_v12 = vadd.f32 %v8725_v33, %v1887_v9 }
 0xd6a   :  { %v7641_v10 = vpop.f32.mrf.mxu0 }
 0xd6c   :  { %v1957_v11 = vpop.f32.mrf.mxu0 }
 0xd6d   :  { %v1958_v13 = vadd.f32 %v8730_v35, %v1957_v11 }
 0xd6e   :  { %v7646_v14 = vpop.f32.mrf.mxu0 }
 0xd6f   :  { %v1961_v21 = vmul.f32 %v1958_v13, %v1888_v12 }
 0xd71   :  { %7668 = vmatmul.mubr.msk.f32.vlgmr.msra.gmra.mxu0 %vm412_vm7, %v1961_v21 }
 0xd72   :  { %7704 = vmatpush3.msra.mxu0 %v8623_v15  ;;  %7705 = vmatprep.mubr.msk.f32.mxu0 %vm8477_vm1, %v8476_v1 }
 0xd73   :  { %7708 = vmatprep.subr.mxu0 %v8476_v1 }
 0xe31   :  { %v2031_v32 = vpop.f32.mrf.mxu0 }
 0xe32   :  { %v2039_v37 = vadd.f32 %v2038_v24, %v2031_v32  ;;  %v9233_v24 = vld [vmem:[%s10078_s10 + $0x40] sm:$0xff]  ;;  %v9240_v32 = vld [vmem:[%s10078_s10 + $0x38] sm:$0xff] }
 0xe33   :  { %v7669_v38 = vpop.f32.mrf.mxu0 }
 0xe34   :  { %v2041_v39 = vmul.f32 %v2040_v34, %v2039_v37  ;;  %v9247_v34 = vld [vmem:[%s10078_s10 + $0x30] sm:$0xff]  ;;  %v9254_v37 = vld [vmem:[%s10078_s10 + $0x28] sm:$0xff]  ;;  %v9261_v38 = vld [vmem:[%s10078_s10 + $0x20] sm:$0xff] }
 0xe36   :  { %v9031_v40 = vadd.f32 %v2041_v39, %v8864_v36  ;;  %v9268_v39 = vld [vmem:[%s10078_s10 + $0x18] sm:$0xff] }
 0xe38   :  { %6475 = vst.msk [vmem:[#allocation6 + $0x10] sm:$0xff] %vm261_vm6, %v9031_v40  ;;  %7673 = vmatmul.mubr.msk.f32.vlgmr.msra.gmra.mxu1 %vm261_vm6, %v9031_v40 }
 0xe39   :  { %7676 = vmatpush3.msra.mxu1 %v8669_v25  ;;  %7677 = vmatprep.mubr.msk.f32.mxu1 %vm8477_vm1, %v8476_v1 }
 0xe3a   :  { %7680 = vmatprep.subr.mxu1 %v8476_v1 }
 0xe3c   :  { %7678 = vmatmul.mubr.msk.f32.vlgmr.msra.gmra.mxu1 %vm261_vm6, %v9031_v40 }
 0xe3d   :  { %7681 = vmatpush3.msk.msra.mxu1 %vm416_vm5, %v8630_v16  ;;  %7700 = vmatprep.mubr.msk.f32.mxu1 %vm8477_vm1, %v8476_v1 }
 0xe3e   :  { %7682 = vmatprep.subr.mxu1 %v8476_v1 }
 0xe3f   :  { %7683 = vmatpush3.msra.mxu1 %v8635_v17 }
 0xe40   :  { %7684 = vmatprep.subr.mxu1 %v8476_v1 }
 0xe41   :  { %7685 = vmatpush3.msra.mxu1 %v8643_v18 }
 0xe42   :  { %7686 = vmatprep.subr.mxu1 %v8476_v1 }
 0xe43   :  { %7687 = vmatpush3.msra.mxu1 %v8650_v19 }
 0xe44   :  { %7688 = vmatprep.subr.mxu1 %v8476_v1 }
 0xe45   :  { %7689 = vmatpush3.msra.mxu1 %v8657_v20 }
 0xe46   :  { %7690 = vmatprep.subr.mxu1 %v8476_v1 }
 0xe47   :  { %7691 = vmatpush3.msra.mxu1 %v8690_v27 }
 0xe48   :  { %7692 = vmatprep.subr.mxu1 %v8476_v1 }
 0xe49   :  { %7693 = vmatpush3.msra.mxu1 %v8697_v28 }
 0xe4a   :  { %7694 = vmatprep.subr.mxu1 %v8476_v1 }
 0xe4b   :  { %7695 = vmatpush3.msra.mxu1 %v8704_v29 }
 0xe4c   :  { %7696 = vmatprep.subr.mxu1 %v8476_v1 }
 0xe4d   :  { %7697 = vmatpush3.msra.mxu1 %v8711_v30 }
 0xe4e   :  { %7698 = vmatprep.subr.mxu1 %v8476_v1 }
 0xe4f   :  { %7699 = vmatpush3.msra.mxu1 %v8718_v31 }
 0xe50   :  { %7736 = vmatprep.subr.mxu1 %v8476_v1 }
 0xef8   :  { %v2114_v41 = vpop.f32.mrf.mxu1 }
 0xef9   :  { %v2115_v44 = vadd.f32 %v8725_v33, %v2114_v41  ;;  %v9275_v41 = vld [vmem:[%s10078_s10 + $0x10] sm:$0xff] }
 0xefa   :  { %v7674_v42 = vpop.f32.mrf.mxu1 }
 0xefb   :  { %v9282_v42 = vld [vmem:[%s10078_s10 + $0x8] sm:$0xff] }
 0xefc   :  { %v2184_v43 = vpop.f32.mrf.mxu1 }
 0xefd   :  { %v2185_v45 = vadd.f32 %v8730_v35, %v2184_v43  ;;  %v9289_v43 = vld [vmem:[%s10078_s10] sm:$0xff] }
 0xefe   :  { %v7679_v46 = vpop.f32.mrf.mxu1 }
 0xeff   :  { %v2188_v47 = vmul.f32 %v2185_v45, %v2115_v44 }
 0xf01   :  { %7701 = vmatmul.mubr.msk.f32.vlgmr.msra.gmra.mxu1 %vm412_vm7, %v2188_v47  ;;  %v9296_v47 = vld [vmem:[%s10076_s8] ss:$0 sm:$0xff] }
 0xf02   :  { %7737 = vmatpush3.msra.mxu1 %v8623_v15  ;;  %7738 = vmatprep.mubr.msk.f32.mxu1 %vm8477_vm1, %v8476_v1 }
 0xf03   :  { %7741 = vmatprep.subr.mxu1 %v8476_v1 }
 0xfc1   :  { %v9076_v49 = vpop.f32.mrf.mxu1 }
 0xfc2   :  { %v2263_v50 = vmul.f32 %v2262_v48, %v9076_v49 }
 0xfc3   :  { %v7702_v51 = vpop.f32.mrf.mxu1 }
 0xfc4   :  { %v2264_v52 = vadd.f32 %v2263_v50, %v9031_v40 }
 0xfc6   :  { %7706 = vmatmul.mubr.msk.f32.vlgmr.msra.gmra.mxu0 %vm261_vm6, %v2264_v52 }
 0xfc7   :  { %7709 = vmatpush3.msra.mxu0 %v8669_v25  ;;  %7710 = vmatprep.mubr.msk.f32.mxu0 %vm8477_vm1, %v8476_v1 }
 0xfc8   :  { %7713 = vmatprep.subr.mxu0 %v8476_v1 }
 0xfca   :  { %7711 = vmatmul.mubr.msk.f32.vlgmr.msra.gmra.mxu0 %vm261_vm6, %v2264_v52 }
 0xfcb   :  { %7714 = vmatpush3.msk.msra.mxu0 %vm416_vm5, %v8630_v16  ;;  %7733 = vmatprep.mubr.msk.f32.mxu0 %vm8477_vm1, %v8476_v1 }
 0xfcc   :  { %7715 = vmatprep.subr.mxu0 %v8476_v1 }
 0xfcd   :  { %7716 = vmatpush3.msra.mxu0 %v8635_v17 }
 0xfce   :  { %7717 = vmatprep.subr.mxu0 %v8476_v1 }
 0xfcf   :  { %7718 = vmatpush3.msra.mxu0 %v8643_v18 }
 0xfd0   :  { %7719 = vmatprep.subr.mxu0 %v8476_v1 }
 0xfd1   :  { %7720 = vmatpush3.msra.mxu0 %v8650_v19 }
 0xfd2   :  { %7721 = vmatprep.subr.mxu0 %v8476_v1 }
 0xfd3   :  { %7722 = vmatpush3.msra.mxu0 %v8657_v20 }
 0xfd4   :  { %7723 = vmatprep.subr.mxu0 %v8476_v1 }
 0xfd5   :  { %7724 = vmatpush3.msra.mxu0 %v8690_v27 }
 0xfd6   :  { %7725 = vmatprep.subr.mxu0 %v8476_v1 }
 0xfd7   :  { %7726 = vmatpush3.msra.mxu0 %v8697_v28 }
 0xfd8   :  { %7727 = vmatprep.subr.mxu0 %v8476_v1 }
 0xfd9   :  { %7728 = vmatpush3.msra.mxu0 %v8704_v29 }
 0xfda   :  { %7729 = vmatprep.subr.mxu0 %v8476_v1 }
 0xfdb   :  { %7730 = vmatpush3.msra.mxu0 %v8711_v30 }
 0xfdc   :  { %7731 = vmatprep.subr.mxu0 %v8476_v1 }
 0xfdd   :  { %7732 = vmatpush3.msra.mxu0 %v8718_v31 }
 0xfde   :  { %7769 = vmatprep.subr.mxu0 %v8476_v1 }
0x1086   :  { %v2334_v53 = vpop.f32.mrf.mxu0 }
0x1087   :  { %v2335_v56 = vadd.f32 %v8725_v33, %v2334_v53  ;;  %v3148_v53 = vstv %s2930_s17 }
0x1088   :  { %v7707_v54 = vpop.f32.mrf.mxu0 }
0x108a   :  { %v2404_v55 = vpop.f32.mrf.mxu0 }
0x108b   :  { %v2405_v57 = vadd.f32 %v8730_v35, %v2404_v55 }
0x108c   :  { %v7712_v58 = vpop.f32.mrf.mxu0 }
0x108d   :  { %v2408_v59 = vmul.f32 %v2405_v57, %v2335_v56 }
0x108f   :  { %7734 = vmatmul.mubr.msk.f32.vlgmr.msra.gmra.mxu0 %vm412_vm7, %v2408_v59 }
0x1090   :  { %7770 = vmatpush3.msra.mxu0 %v8623_v15  ;;  %7771 = vmatprep.mubr.msk.f32.mxu0 %vm8477_vm1, %v8476_v1 }
0x1091   :  { %7774 = vmatprep.subr.mxu0 %v8476_v1 }
0x114f   :  { %v9116_v60 = vpop.f32.mrf.mxu0 }
0x1150   :  { %v2482_v61 = vmul.f32 %v9116_v60, %v2262_v48 }
0x1151   :  { %v7735_v62 = vpop.f32.mrf.mxu0 }
0x1152   :  { %v2483_v63 = vadd.f32 %v2482_v61, %v9031_v40 }
0x1154   :  { %7739 = vmatmul.mubr.msk.f32.vlgmr.msra.gmra.mxu1 %vm261_vm6, %v2483_v63 }
0x1155   :  { %7742 = vmatpush3.msra.mxu1 %v8669_v25  ;;  %7743 = vmatprep.mubr.msk.f32.mxu1 %vm8477_vm1, %v8476_v1 }
0x1156   :  { %7746 = vmatprep.subr.mxu1 %v8476_v1 }
0x1158   :  { %7744 = vmatmul.mubr.msk.f32.vlgmr.msra.gmra.mxu1 %vm261_vm6, %v2483_v63 }
0x1159   :  { %7747 = vmatpush3.msk.msra.mxu1 %vm416_vm5, %v8630_v16  ;;  %7766 = vmatprep.mubr.msk.f32.mxu1 %vm8477_vm1, %v8476_v1 }
0x115a   :  { %7748 = vmatprep.subr.mxu1 %v8476_v1 }
0x115b   :  { %7749 = vmatpush3.msra.mxu1 %v8635_v17 }
0x115c   :  { %7750 = vmatprep.subr.mxu1 %v8476_v1 }
0x115d   :  { %7751 = vmatpush3.msra.mxu1 %v8643_v18 }
0x115e   :  { %7752 = vmatprep.subr.mxu1 %v8476_v1 }
0x115f   :  { %7753 = vmatpush3.msra.mxu1 %v8650_v19 }
0x1160   :  { %7754 = vmatprep.subr.mxu1 %v8476_v1 }
0x1161   :  { %7755 = vmatpush3.msra.mxu1 %v8657_v20 }
0x1162   :  { %7756 = vmatprep.subr.mxu1 %v8476_v1 }
0x1163   :  { %7757 = vmatpush3.msra.mxu1 %v8690_v27 }
0x1164   :  { %7758 = vmatprep.subr.mxu1 %v8476_v1 }
0x1165   :  { %7759 = vmatpush3.msra.mxu1 %v8697_v28 }
0x1166   :  { %7760 = vmatprep.subr.mxu1 %v8476_v1 }
0x1167   :  { %7761 = vmatpush3.msra.mxu1 %v8704_v29 }
0x1168   :  { %7762 = vmatprep.subr.mxu1 %v8476_v1 }
0x1169   :  { %7763 = vmatpush3.msra.mxu1 %v8711_v30 }
0x116a   :  { %7764 = vmatprep.subr.mxu1 %v8476_v1 }
0x116b   :  { %7765 = vmatpush3.msra.mxu1 %v8718_v31 }
0x116c   :  { %7802 = vmatprep.subr.mxu1 %v8476_v1 }
0x1214   :  { %v2553_v0 = vpop.f32.mrf.mxu1 }
0x1215   :  { %v2554_v4 = vadd.f32 %v8725_v33, %v2553_v0 }
0x1216   :  { %v7740_v2 = vpop.f32.mrf.mxu1 }
0x1218   :  { %v2623_v3 = vpop.f32.mrf.mxu1 }
0x1219   :  { %v2624_v5 = vadd.f32 %v8730_v35, %v2623_v3 }
0x121a   :  { %v7745_v6 = vpop.f32.mrf.mxu1 }
0x121b   :  { %v2627_v7 = vmul.f32 %v2624_v5, %v2554_v4 }
0x121d   :  { %7767 = vmatmul.mubr.msk.f32.vlgmr.msra.gmra.mxu1 %vm412_vm7, %v2627_v7 }
0x121e   :  { %7803 = vmatpush3.msra.mxu1 %v8623_v15  ;;  %7804 = vmatprep.mubr.msk.f32.mxu1 %vm8477_vm1, %v8476_v1 }
0x121f   :  { %7807 = vmatprep.subr.mxu1 %v8476_v1 }
0x12dd   :  { %v2697_v9 = vpop.f32.mrf.mxu1 }
0x12de   :  { %v2702_v10 = vmul.f32 %v2701_v8, %v2697_v9 }
0x12df   :  { %v7768_v11 = vpop.f32.mrf.mxu1 }
0x12e0   :  { %v2703_v12 = vadd.f32 %v2702_v10, %v9031_v40 }
0x12e2   :  { %7772 = vmatmul.mubr.msk.f32.vlgmr.msra.gmra.mxu0 %vm261_vm6, %v2703_v12 }
0x12e3   :  { %7775 = vmatpush3.msra.mxu0 %v8669_v25  ;;  %7776 = vmatprep.mubr.msk.f32.mxu0 %vm8477_vm1, %v8476_v1 }
0x12e4   :  { %7779 = vmatprep.subr.mxu0 %v8476_v1 }
0x12e6   :  { %7777 = vmatmul.mubr.msk.f32.vlgmr.msra.gmra.mxu0 %vm261_vm6, %v2703_v12 }
0x12e7   :  { %7780 = vmatpush3.msk.msra.mxu0 %vm416_vm5, %v8630_v16  ;;  %7799 = vmatprep.mubr.msk.f32.mxu0 %vm8477_vm1, %v8476_v1 }
0x12e8   :  { %7781 = vmatprep.subr.mxu0 %v8476_v1 }
0x12e9   :  { %7782 = vmatpush3.msra.mxu0 %v8635_v17 }
0x12ea   :  { %7783 = vmatprep.subr.mxu0 %v8476_v1 }
0x12eb   :  { %7784 = vmatpush3.msra.mxu0 %v8643_v18 }
0x12ec   :  { %7785 = vmatprep.subr.mxu0 %v8476_v1 }
0x12ed   :  { %7786 = vmatpush3.msra.mxu0 %v8650_v19 }
0x12ee   :  { %7787 = vmatprep.subr.mxu0 %v8476_v1 }
0x12ef   :  { %7788 = vmatpush3.msra.mxu0 %v8657_v20 }
0x12f0   :  { %7789 = vmatprep.subr.mxu0 %v8476_v1 }
0x12f1   :  { %7790 = vmatpush3.msra.mxu0 %v8690_v27  ;;  %v9193_v27 = vld [vmem:[%s10074_s6] sm:$0xff] }
0x12f2   :  { %7791 = vmatprep.subr.mxu0 %v8476_v1 }
0x12f3   :  { %7792 = vmatpush3.msra.mxu0 %v8697_v28  ;;  %v2922_v28 = vadd.f32 %v2697_v9, %v9116_v60 }
0x12f4   :  { %7793 = vmatprep.subr.mxu0 %v8476_v1 }
0x12f5   :  { %7794 = vmatpush3.msra.mxu0 %v8704_v29  ;;  %v2923_v29 = vmul.f32 2.0, %v2922_v28 }
0x12f6   :  { %7795 = vmatprep.subr.mxu0 %v8476_v1 }
0x12f7   :  { %7796 = vmatpush3.msra.mxu0 %v8711_v30  ;;  %v2924_v30 = vadd.f32 %v2923_v29, %v9076_v49  ;;  %v9302_v49 = vld [vmem:[%s10089_s19] ss:$0 sm:$0xff] }
0x12f8   :  { %7797 = vmatprep.subr.mxu0 %v8476_v1 }
0x12f9   :  { %7798 = vmatpush3.msra.mxu0 %v8718_v31 }
0x12fa   :  { %7835 = vmatprep.subr.mxu0 %v8476_v1 }
0x13a2   :  { %v2773_v15 = vpop.f32.mrf.mxu0 }
0x13a3   :  { %v2774_v18 = vadd.f32 %v8725_v33, %v2773_v15  ;;  %v2926_v33 = vstv %s2921_s27  ;;  %v3587_v15 = vstv %s9310_s0 }
0x13a4   :  { %v7773_v16 = vpop.f32.mrf.mxu0 }
0x13a6   :  { %v2843_v17 = vpop.f32.mrf.mxu0 }
0x13a7   :  { %v2844_v19 = vadd.f32 %v8730_v35, %v2843_v17 }
0x13a8   :  { %v7778_v20 = vpop.f32.mrf.mxu0 }
0x13a9   :  { %v2847_v25 = vmul.f32 %v2844_v19, %v2774_v18 }
0x13ab   :  { %7800 = vmatmul.mubr.msk.f32.vlgmr.msra.gmra.mxu0 %vm412_vm7, %v2847_v25 }
0x13ac   :  { %7836 = vmatpush3.msra.mxu0 %v9193_v27  ;;  %7837 = vmatprep.mubr.msk.f32.mxu0 %vm8477_vm1, %v8476_v1 }
0x13ad   :  { %7840 = vmatprep.subr.mxu0 %v8476_v1 }
0x146b   :  { %v2917_v31 = vpop.f32.mrf.mxu0 }
0x146c   :  { %v2925_v35 = vadd.f32 %v2924_v30, %v2917_v31 }
0x146d   :  { %v7801_v13 = vpop.f32.mrf.mxu0 }
0x146e   :  { %v2927_v14 = vmul.f32 %v2926_v33, %v2925_v35 }
0x1470   :  { %v9203_v21 = vadd.f32 %v2927_v14, %v9031_v40 }
0x1472   :  { %6476 = vst.msk [vmem:[#allocation6 + $0x18] sm:$0xff] %vm261_vm6, %v9203_v21  ;;  %7805 = vmatmul.mubr.msk.f32.vlgmr.msra.gmra.mxu1 %vm261_vm6, %v9203_v21 }
0x1473   :  { %7808 = vmatpush3.msra.mxu1 %v9212_v22  ;;  %7809 = vmatprep.mubr.msk.f32.mxu1 %vm8477_vm1, %v8476_v1 }
0x1474   :  { %7812 = vmatprep.subr.mxu1 %v8476_v1 }
0x1476   :  { %7810 = vmatmul.mubr.msk.f32.vlgmr.msra.gmra.mxu1 %vm261_vm6, %v9203_v21 }
0x1477   :  { %7813 = vmatpush3.msk.msra.mxu1 %vm416_vm5, %v9223_v23  ;;  %7832 = vmatprep.mubr.msk.f32.mxu1 %vm8477_vm1, %v8476_v1 }
0x1478   :  { %7814 = vmatprep.subr.mxu1 %v8476_v1 }
0x1479   :  { %7815 = vmatpush3.msra.mxu1 %v9233_v24 }
0x147a   :  { %7816 = vmatprep.subr.mxu1 %v8476_v1 }
0x147b   :  { %7817 = vmatpush3.msra.mxu1 %v9240_v32 }
0x147c   :  { %7818 = vmatprep.subr.mxu1 %v8476_v1 }
0x147d   :  { %7819 = vmatpush3.msra.mxu1 %v9247_v34 }
0x147e   :  { %7820 = vmatprep.subr.mxu1 %v8476_v1 }
0x147f   :  { %7821 = vmatpush3.msra.mxu1 %v9254_v37 }
0x1480   :  { %7822 = vmatprep.subr.mxu1 %v8476_v1 }
0x1481   :  { %7823 = vmatpush3.msra.mxu1 %v9261_v38 }
0x1482   :  { %7824 = vmatprep.subr.mxu1 %v8476_v1 }
0x1483   :  { %7825 = vmatpush3.msra.mxu1 %v9268_v39 }
0x1484   :  { %7826 = vmatprep.subr.mxu1 %v8476_v1 }
0x1485   :  { %7827 = vmatpush3.msra.mxu1 %v9275_v41 }
0x1486   :  { %7828 = vmatprep.subr.mxu1 %v8476_v1 }
0x1487   :  { %7829 = vmatpush3.msra.mxu1 %v9282_v42 }
0x1488   :  { %7830 = vmatprep.subr.mxu1 %v8476_v1 }
0x1489   :  { %7831 = vmatpush3.msra.mxu1 %v9289_v43 }
0x148a   :  { %7868 = vmatprep.subr.mxu1 %v8476_v1 }
0x1532   :  { %v3000_v44 = vpop.f32.mrf.mxu1 }
0x1533   :  { %v3001_v48 = vadd.f32 %v9296_v47, %v3000_v44 }
0x1534   :  { %v7806_v45 = vpop.f32.mrf.mxu1 }
0x1535   :  { %v3812_v45 = vstv %s3807_s18 }
0x1536   :  { %v3070_v46 = vpop.f32.mrf.mxu1 }
0x1537   :  { %v3071_v50 = vadd.f32 %v9302_v49, %v3070_v46 }
0x1538   :  { %v7811_v51 = vpop.f32.mrf.mxu1 }
0x1539   :  { %v3074_v52 = vmul.f32 %v3071_v50, %v3001_v48 }
0x153b   :  { %7833 = vmatmul.mubr.msk.f32.vlgmr.msra.gmra.mxu1 %vm412_vm7, %v3074_v52 }
0x153c   :  { %7869 = vmatpush3.msra.mxu1 %v9193_v27  ;;  %7870 = vmatprep.mubr.msk.f32.mxu1 %vm8477_vm1, %v8476_v1 }
0x153d   :  { %7873 = vmatprep.subr.mxu1 %v8476_v1 }
0x15fb   :  { %v9313_v54 = vpop.f32.mrf.mxu1 }
0x15fc   :  { %v3149_v55 = vmul.f32 %v3148_v53, %v9313_v54 }
0x15fd   :  { %v7834_v56 = vpop.f32.mrf.mxu1 }
0x15fe   :  { %v3150_v57 = vadd.f32 %v3149_v55, %v9203_v21 }
0x1600   :  { %7838 = vmatmul.mubr.msk.f32.vlgmr.msra.gmra.mxu0 %vm261_vm6, %v3150_v57 }
0x1601   :  { %7841 = vmatpush3.msra.mxu0 %v9212_v22  ;;  %7842 = vmatprep.mubr.msk.f32.mxu0 %vm8477_vm1, %v8476_v1 }
0x1602   :  { %7845 = vmatprep.subr.mxu0 %v8476_v1 }
0x1604   :  { %7843 = vmatmul.mubr.msk.f32.vlgmr.msra.gmra.mxu0 %vm261_vm6, %v3150_v57 }
0x1605   :  { %7846 = vmatpush3.msk.msra.mxu0 %vm416_vm5, %v9223_v23  ;;  %7865 = vmatprep.mubr.msk.f32.mxu0 %vm8477_vm1, %v8476_v1 }
0x1606   :  { %7847 = vmatprep.subr.mxu0 %v8476_v1 }
0x1607   :  { %7848 = vmatpush3.msra.mxu0 %v9233_v24 }
0x1608   :  { %7849 = vmatprep.subr.mxu0 %v8476_v1 }
0x1609   :  { %7850 = vmatpush3.msra.mxu0 %v9240_v32 }
0x160a   :  { %7851 = vmatprep.subr.mxu0 %v8476_v1 }
0x160b   :  { %7852 = vmatpush3.msra.mxu0 %v9247_v34 }
0x160c   :  { %7853 = vmatprep.subr.mxu0 %v8476_v1 }
0x160d   :  { %7854 = vmatpush3.msra.mxu0 %v9254_v37 }
0x160e   :  { %7855 = vmatprep.subr.mxu0 %v8476_v1 }
0x160f   :  { %7856 = vmatpush3.msra.mxu0 %v9261_v38 }
0x1610   :  { %7857 = vmatprep.subr.mxu0 %v8476_v1 }
0x1611   :  { %7858 = vmatpush3.msra.mxu0 %v9268_v39 }
0x1612   :  { %7859 = vmatprep.subr.mxu0 %v8476_v1 }
0x1613   :  { %7860 = vmatpush3.msra.mxu0 %v9275_v41 }
0x1614   :  { %7861 = vmatprep.subr.mxu0 %v8476_v1 }
0x1615   :  { %7862 = vmatpush3.msra.mxu0 %v9282_v42 }
0x1616   :  { %7863 = vmatprep.subr.mxu0 %v8476_v1 }
0x1617   :  { %7864 = vmatpush3.msra.mxu0 %v9289_v43 }
0x1618   :  { %7901 = vmatprep.subr.mxu0 %v8476_v1 }
0x16c0   :  { %v3220_v58 = vpop.f32.mrf.mxu0 }
0x16c1   :  { %v3221_v61 = vadd.f32 %v9296_v47, %v3220_v58 }
0x16c2   :  { %v7839_v59 = vpop.f32.mrf.mxu0 }
0x16c3   :  { %v4034_v59 = vstv %s3816_s21 }
0x16c4   :  { %v3290_v60 = vpop.f32.mrf.mxu0 }
0x16c5   :  { %v3291_v62 = vadd.f32 %v9302_v49, %v3290_v60 }
0x16c6   :  { %v7844_v63 = vpop.f32.mrf.mxu0 }
0x16c7   :  { %v3294_v0 = vmul.f32 %v3291_v62, %v3221_v61 }
0x16c9   :  { %7866 = vmatmul.mubr.msk.f32.vlgmr.msra.gmra.mxu0 %vm412_vm7, %v3294_v0 }
0x16ca   :  { %7902 = vmatpush3.msra.mxu0 %v9193_v27  ;;  %7903 = vmatprep.mubr.msk.f32.mxu0 %vm8477_vm1, %v8476_v1 }
0x16cb   :  { %7906 = vmatprep.subr.mxu0 %v8476_v1 }
0x1789   :  { %v9353_v2 = vpop.f32.mrf.mxu0 }
0x178a   :  { %v3368_v3 = vmul.f32 %v9353_v2, %v3148_v53 }
0x178b   :  { %v7867_v4 = vpop.f32.mrf.mxu0 }
0x178c   :  { %v3369_v5 = vadd.f32 %v3368_v3, %v9203_v21 }
0x178e   :  { %7871 = vmatmul.mubr.msk.f32.vlgmr.msra.gmra.mxu1 %vm261_vm6, %v3369_v5 }
0x178f   :  { %7874 = vmatpush3.msra.mxu1 %v9212_v22  ;;  %7875 = vmatprep.mubr.msk.f32.mxu1 %vm8477_vm1, %v8476_v1 }
0x1790   :  { %7878 = vmatprep.subr.mxu1 %v8476_v1 }
0x1792   :  { %7876 = vmatmul.mubr.msk.f32.vlgmr.msra.gmra.mxu1 %vm261_vm6, %v3369_v5 }
0x1793   :  { %7879 = vmatpush3.msk.msra.mxu1 %vm416_vm5, %v9223_v23  ;;  %7898 = vmatprep.mubr.msk.f32.mxu1 %vm8477_vm1, %v8476_v1 }
0x1794   :  { %7880 = vmatprep.subr.mxu1 %v8476_v1 }
0x1795   :  { %7881 = vmatpush3.msra.mxu1 %v9233_v24 }
0x1796   :  { %7882 = vmatprep.subr.mxu1 %v8476_v1 }
0x1797   :  { %7883 = vmatpush3.msra.mxu1 %v9240_v32 }
0x1798   :  { %7884 = vmatprep.subr.mxu1 %v8476_v1 }
0x1799   :  { %7885 = vmatpush3.msra.mxu1 %v9247_v34 }
0x179a   :  { %7886 = vmatprep.subr.mxu1 %v8476_v1 }
0x179b   :  { %7887 = vmatpush3.msra.mxu1 %v9254_v37 }
0x179c   :  { %7888 = vmatprep.subr.mxu1 %v8476_v1 }
0x179d   :  { %7889 = vmatpush3.msra.mxu1 %v9261_v38 }
0x179e   :  { %7890 = vmatprep.subr.mxu1 %v8476_v1 }
0x179f   :  { %7891 = vmatpush3.msra.mxu1 %v9268_v39 }
0x17a0   :  { %7892 = vmatprep.subr.mxu1 %v8476_v1 }
0x17a1   :  { %7893 = vmatpush3.msra.mxu1 %v9275_v41 }
0x17a2   :  { %7894 = vmatprep.subr.mxu1 %v8476_v1 }
0x17a3   :  { %7895 = vmatpush3.msra.mxu1 %v9282_v42 }
0x17a4   :  { %7896 = vmatprep.subr.mxu1 %v8476_v1 }
0x17a5   :  { %7897 = vmatpush3.msra.mxu1 %v9289_v43 }
0x17a6   :  { %7934 = vmatprep.subr.mxu1 %v8476_v1 }
0x184e   :  { %v3439_v6 = vpop.f32.mrf.mxu1 }
0x184f   :  { %v3440_v9 = vadd.f32 %v9296_v47, %v3439_v6 }
0x1850   :  { %v7872_v7 = vpop.f32.mrf.mxu1 }
0x1852   :  { %v3509_v8 = vpop.f32.mrf.mxu1 }
0x1853   :  { %v3510_v10 = vadd.f32 %v9302_v49, %v3509_v8 }
0x1854   :  { %v7877_v11 = vpop.f32.mrf.mxu1 }
0x1855   :  { %v3513_v12 = vmul.f32 %v3510_v10, %v3440_v9 }
0x1857   :  { %7899 = vmatmul.mubr.msk.f32.vlgmr.msra.gmra.mxu1 %vm412_vm7, %v3513_v12 }
0x1858   :  { %7935 = vmatpush3.msra.mxu1 %v9193_v27  ;;  %7936 = vmatprep.mubr.msk.f32.mxu1 %vm8477_vm1, %v8476_v1 }
0x1859   :  { %7939 = vmatprep.subr.mxu1 %v8476_v1 }
0x1917   :  { %v3583_v16 = vpop.f32.mrf.mxu1 }
0x1918   :  { %v3588_v17 = vmul.f32 %v3587_v15, %v3583_v16  ;;  %v3808_v35 = vadd.f32 %v3583_v16, %v9353_v2 }
0x1919   :  { %v7900_v18 = vpop.f32.mrf.mxu1 }
0x191a   :  { %v3589_v19 = vadd.f32 %v3588_v17, %v9203_v21  ;;  %v3809_v13 = vmul.f32 2.0, %v3808_v35 }
0x191c   :  { %7904 = vmatmul.mubr.msk.f32.vlgmr.msra.gmra.mxu0 %vm261_vm6, %v3589_v19  ;;  %v3810_v14 = vadd.f32 %v3809_v13, %v9313_v54 }
0x191d   :  { %7907 = vmatpush3.msra.mxu0 %v9212_v22  ;;  %7908 = vmatprep.mubr.msk.f32.mxu0 %vm8477_vm1, %v8476_v1 }
0x191e   :  { %7911 = vmatprep.subr.mxu0 %v8476_v1 }
0x1920   :  { %7909 = vmatmul.mubr.msk.f32.vlgmr.msra.gmra.mxu0 %vm261_vm6, %v3589_v19 }
0x1921   :  { %7912 = vmatpush3.msk.msra.mxu0 %vm416_vm5, %v9223_v23  ;;  %7931 = vmatprep.mubr.msk.f32.mxu0 %vm8477_vm1, %v8476_v1 }
0x1922   :  { %7913 = vmatprep.subr.mxu0 %v8476_v1 }
0x1923   :  { %7914 = vmatpush3.msra.mxu0 %v9233_v24 }
0x1924   :  { %7915 = vmatprep.subr.mxu0 %v8476_v1 }
0x1925   :  { %7916 = vmatpush3.msra.mxu0 %v9240_v32 }
0x1926   :  { %7917 = vmatprep.subr.mxu0 %v8476_v1 }
0x1927   :  { %7918 = vmatpush3.msra.mxu0 %v9247_v34 }
0x1928   :  { %7919 = vmatprep.subr.mxu0 %v8476_v1 }
0x1929   :  { %7920 = vmatpush3.msra.mxu0 %v9254_v37 }
0x192a   :  { %7921 = vmatprep.subr.mxu0 %v8476_v1 }
0x192b   :  { %7922 = vmatpush3.msra.mxu0 %v9261_v38 }
0x192c   :  { %7923 = vmatprep.subr.mxu0 %v8476_v1 }
0x192d   :  { %7924 = vmatpush3.msra.mxu0 %v9268_v39 }
0x192e   :  { %7925 = vmatprep.subr.mxu0 %v8476_v1 }
0x192f   :  { %7926 = vmatpush3.msra.mxu0 %v9275_v41 }
0x1930   :  { %7927 = vmatprep.subr.mxu0 %v8476_v1 }
0x1931   :  { %7928 = vmatpush3.msra.mxu0 %v9282_v42 }
0x1932   :  { %7929 = vmatprep.subr.mxu0 %v8476_v1 }
0x1933   :  { %7930 = vmatpush3.msra.mxu0 %v9289_v43 }
0x1934   :  { %7967 = vmatprep.subr.mxu0 %v8476_v1 }
0x19dc   :  { %v3659_v20 = vpop.f32.mrf.mxu0 }
0x19dd   :  { %v3660_v29 = vadd.f32 %v9296_v47, %v3659_v20 }
0x19de   :  { %v7905_v25 = vpop.f32.mrf.mxu0 }
0x19df   :  { %v4473_v25 = vstv %s9477_s20 }
0x19e0   :  { %v3729_v28 = vpop.f32.mrf.mxu0 }
0x19e1   :  { %v3730_v30 = vadd.f32 %v9302_v49, %v3729_v28 }
0x19e2   :  { %v7910_v31 = vpop.f32.mrf.mxu0 }
0x19e3   :  { %v3733_v33 = vmul.f32 %v3730_v30, %v3660_v29 }
0x19e5   :  { %7932 = vmatmul.mubr.msk.f32.vlgmr.msra.gmra.mxu0 %vm412_vm7, %v3733_v33 }
0x19e6   :  { %7968 = vmatpush3.msra.mxu0 %v9193_v27  ;;  %7969 = vmatprep.mubr.msk.f32.mxu0 %vm8477_vm1, %v8476_v1 }
0x19e7   :  { %7972 = vmatprep.subr.mxu0 %v8476_v1 }
0x1aa5   :  { %v3803_v44 = vpop.f32.mrf.mxu0 }
0x1aa6   :  { %v3811_v46 = vadd.f32 %v3810_v14, %v3803_v44 }
0x1aa7   :  { %v7933_v48 = vpop.f32.mrf.mxu0 }
0x1aa8   :  { %v3813_v50 = vmul.f32 %v3812_v45, %v3811_v46 }
0x1aaa   :  { %v9435_v51 = vadd.f32 %v3813_v50, %v9203_v21 }
0x1aac   :  { %6477 = vst.msk [vmem:[#allocation6 + $0x20] sm:$0xff] %vm261_vm6, %v9435_v51  ;;  %7937 = vmatmul.mubr.msk.f32.vlgmr.msra.gmra.mxu1 %vm261_vm6, %v9435_v51 }
0x1aad   :  { %7940 = vmatpush3.msra.mxu1 %v9212_v22  ;;  %7941 = vmatprep.mubr.msk.f32.mxu1 %vm8477_vm1, %v8476_v1 }
0x1aae   :  { %7944 = vmatprep.subr.mxu1 %v8476_v1 }
0x1ab0   :  { %7942 = vmatmul.mubr.msk.f32.vlgmr.msra.gmra.mxu1 %vm261_vm6, %v9435_v51 }
0x1ab1   :  { %7945 = vmatpush3.msk.msra.mxu1 %vm416_vm5, %v9223_v23  ;;  %7964 = vmatprep.mubr.msk.f32.mxu1 %vm8477_vm1, %v8476_v1 }
0x1ab2   :  { %7946 = vmatprep.subr.mxu1 %v8476_v1 }
0x1ab3   :  { %7947 = vmatpush3.msra.mxu1 %v9233_v24 }
0x1ab4   :  { %7948 = vmatprep.subr.mxu1 %v8476_v1 }
0x1ab5   :  { %7949 = vmatpush3.msra.mxu1 %v9240_v32 }
0x1ab6   :  { %7950 = vmatprep.subr.mxu1 %v8476_v1 }
0x1ab7   :  { %7951 = vmatpush3.msra.mxu1 %v9247_v34 }
0x1ab8   :  { %7952 = vmatprep.subr.mxu1 %v8476_v1 }
0x1ab9   :  { %7953 = vmatpush3.msra.mxu1 %v9254_v37 }
0x1aba   :  { %7954 = vmatprep.subr.mxu1 %v8476_v1 }
0x1abb   :  { %7955 = vmatpush3.msra.mxu1 %v9261_v38 }
0x1abc   :  { %7956 = vmatprep.subr.mxu1 %v8476_v1 }
0x1abd   :  { %7957 = vmatpush3.msra.mxu1 %v9268_v39 }
0x1abe   :  { %7958 = vmatprep.subr.mxu1 %v8476_v1 }
0x1abf   :  { %7959 = vmatpush3.msra.mxu1 %v9275_v41 }
0x1ac0   :  { %7960 = vmatprep.subr.mxu1 %v8476_v1 }
0x1ac1   :  { %7961 = vmatpush3.msra.mxu1 %v9282_v42 }
0x1ac2   :  { %7962 = vmatprep.subr.mxu1 %v8476_v1 }
0x1ac3   :  { %7963 = vmatpush3.msra.mxu1 %v9289_v43 }
0x1ac4   :  { %8000 = vmatprep.subr.mxu1 %v8476_v1 }
0x1b6c   :  { %v3886_v52 = vpop.f32.mrf.mxu1 }
0x1b6d   :  { %v3887_v55 = vadd.f32 %v9296_v47, %v3886_v52 }
0x1b6e   :  { %v7938_v53 = vpop.f32.mrf.mxu1 }
0x1b70   :  { %v3956_v54 = vpop.f32.mrf.mxu1 }
0x1b71   :  { %v3957_v56 = vadd.f32 %v9302_v49, %v3956_v54  ;;  %v4698_v54 = vstv %s4693_s22 }
0x1b72   :  { %v7943_v57 = vpop.f32.mrf.mxu1 }
0x1b73   :  { %v3960_v58 = vmul.f32 %v3957_v56, %v3887_v55 }
0x1b75   :  { %7965 = vmatmul.mubr.msk.f32.vlgmr.msra.gmra.mxu1 %vm412_vm7, %v3960_v58 }
0x1b76   :  { %8001 = vmatpush3.msra.mxu1 %v9193_v27  ;;  %8002 = vmatprep.mubr.msk.f32.mxu1 %vm8477_vm1, %v8476_v1 }
0x1b77   :  { %8005 = vmatprep.subr.mxu1 %v8476_v1 }
0x1c35   :  { %v9480_v60 = vpop.f32.mrf.mxu1 }
0x1c36   :  { %v4035_v61 = vmul.f32 %v4034_v59, %v9480_v60 }
0x1c37   :  { %v7966_v62 = vpop.f32.mrf.mxu1 }
0x1c38   :  { %v4036_v63 = vadd.f32 %v4035_v61, %v9435_v51 }
0x1c3a   :  { %7970 = vmatmul.mubr.msk.f32.vlgmr.msra.gmra.mxu0 %vm261_vm6, %v4036_v63 }
0x1c3b   :  { %7973 = vmatpush3.msra.mxu0 %v9212_v22  ;;  %7974 = vmatprep.mubr.msk.f32.mxu0 %vm8477_vm1, %v8476_v1 }
0x1c3c   :  { %7977 = vmatprep.subr.mxu0 %v8476_v1 }
0x1c3e   :  { %7975 = vmatmul.mubr.msk.f32.vlgmr.msra.gmra.mxu0 %vm261_vm6, %v4036_v63 }
0x1c3f   :  { %7978 = vmatpush3.msk.msra.mxu0 %vm416_vm5, %v9223_v23  ;;  %7997 = vmatprep.mubr.msk.f32.mxu0 %vm8477_vm1, %v8476_v1 }
0x1c40   :  { %7979 = vmatprep.subr.mxu0 %v8476_v1 }
0x1c41   :  { %7980 = vmatpush3.msra.mxu0 %v9233_v24 }
0x1c42   :  { %7981 = vmatprep.subr.mxu0 %v8476_v1 }
0x1c43   :  { %7982 = vmatpush3.msra.mxu0 %v9240_v32 }
0x1c44   :  { %7983 = vmatprep.subr.mxu0 %v8476_v1 }
0x1c45   :  { %7984 = vmatpush3.msra.mxu0 %v9247_v34 }
0x1c46   :  { %7985 = vmatprep.subr.mxu0 %v8476_v1 }
0x1c47   :  { %7986 = vmatpush3.msra.mxu0 %v9254_v37 }
0x1c48   :  { %7987 = vmatprep.subr.mxu0 %v8476_v1 }
0x1c49   :  { %7988 = vmatpush3.msra.mxu0 %v9261_v38 }
0x1c4a   :  { %7989 = vmatprep.subr.mxu0 %v8476_v1 }
0x1c4b   :  { %7990 = vmatpush3.msra.mxu0 %v9268_v39 }
0x1c4c   :  { %7991 = vmatprep.subr.mxu0 %v8476_v1 }
0x1c4d   :  { %7992 = vmatpush3.msra.mxu0 %v9275_v41 }
0x1c4e   :  { %7993 = vmatprep.subr.mxu0 %v8476_v1 }
0x1c4f   :  { %7994 = vmatpush3.msra.mxu0 %v9282_v42 }
0x1c50   :  { %7995 = vmatprep.subr.mxu0 %v8476_v1 }
0x1c51   :  { %7996 = vmatpush3.msra.mxu0 %v9289_v43 }
0x1c52   :  { %8033 = vmatprep.subr.mxu0 %v8476_v1 }
0x1cfa   :  { %v4106_v0 = vpop.f32.mrf.mxu0 }
0x1cfb   :  { %v4107_v4 = vadd.f32 %v9296_v47, %v4106_v0 }
0x1cfc   :  { %v7971_v2 = vpop.f32.mrf.mxu0 }
0x1cfe   :  { %v4176_v3 = vpop.f32.mrf.mxu0 }
0x1cff   :  { %v4177_v5 = vadd.f32 %v9302_v49, %v4176_v3  ;;  %v4920_v3 = vstv %s4702_s2 }
0x1d00   :  { %v7976_v6 = vpop.f32.mrf.mxu0 }
0x1d01   :  { %v4180_v7 = vmul.f32 %v4177_v5, %v4107_v4 }
0x1d03   :  { %7998 = vmatmul.mubr.msk.f32.vlgmr.msra.gmra.mxu0 %vm412_vm7, %v4180_v7 }
0x1d04   :  { %8034 = vmatpush3.msra.mxu0 %v9193_v27  ;;  %8035 = vmatprep.mubr.msk.f32.mxu0 %vm8477_vm1, %v8476_v1 }
0x1d05   :  { %8038 = vmatprep.subr.mxu0 %v8476_v1 }
0x1dc3   :  { %v9520_v8 = vpop.f32.mrf.mxu0 }
0x1dc4   :  { %v4254_v9 = vmul.f32 %v9520_v8, %v4034_v59 }
0x1dc5   :  { %v7999_v10 = vpop.f32.mrf.mxu0 }
0x1dc6   :  { %v4255_v11 = vadd.f32 %v4254_v9, %v9435_v51 }
0x1dc8   :  { %8003 = vmatmul.mubr.msk.f32.vlgmr.msra.gmra.mxu1 %vm261_vm6, %v4255_v11 }
0x1dc9   :  { %8006 = vmatpush3.msra.mxu1 %v9212_v22  ;;  %8007 = vmatprep.mubr.msk.f32.mxu1 %vm8477_vm1, %v8476_v1 }
0x1dca   :  { %8010 = vmatprep.subr.mxu1 %v8476_v1 }
0x1dcc   :  { %8008 = vmatmul.mubr.msk.f32.vlgmr.msra.gmra.mxu1 %vm261_vm6, %v4255_v11 }
0x1dcd   :  { %8011 = vmatpush3.msk.msra.mxu1 %vm416_vm5, %v9223_v23  ;;  %8030 = vmatprep.mubr.msk.f32.mxu1 %vm8477_vm1, %v8476_v1 }
0x1dce   :  { %8012 = vmatprep.subr.mxu1 %v8476_v1 }
0x1dcf   :  { %8013 = vmatpush3.msra.mxu1 %v9233_v24 }
0x1dd0   :  { %8014 = vmatprep.subr.mxu1 %v8476_v1 }
0x1dd1   :  { %8015 = vmatpush3.msra.mxu1 %v9240_v32 }
0x1dd2   :  { %8016 = vmatprep.subr.mxu1 %v8476_v1 }
0x1dd3   :  { %8017 = vmatpush3.msra.mxu1 %v9247_v34 }
0x1dd4   :  { %8018 = vmatprep.subr.mxu1 %v8476_v1 }
0x1dd5   :  { %8019 = vmatpush3.msra.mxu1 %v9254_v37 }
0x1dd6   :  { %8020 = vmatprep.subr.mxu1 %v8476_v1 }
0x1dd7   :  { %8021 = vmatpush3.msra.mxu1 %v9261_v38 }
0x1dd8   :  { %8022 = vmatprep.subr.mxu1 %v8476_v1 }
0x1dd9   :  { %8023 = vmatpush3.msra.mxu1 %v9268_v39 }
0x1dda   :  { %8024 = vmatprep.subr.mxu1 %v8476_v1 }
0x1ddb   :  { %8025 = vmatpush3.msra.mxu1 %v9275_v41 }
0x1ddc   :  { %8026 = vmatprep.subr.mxu1 %v8476_v1 }
0x1ddd   :  { %8027 = vmatpush3.msra.mxu1 %v9282_v42 }
0x1dde   :  { %8028 = vmatprep.subr.mxu1 %v8476_v1 }
0x1ddf   :  { %8029 = vmatpush3.msra.mxu1 %v9289_v43 }
0x1de0   :  { %8066 = vmatprep.subr.mxu1 %v8476_v1 }
0x1e88   :  { %v4325_v12 = vpop.f32.mrf.mxu1 }
0x1e89   :  { %v4326_v17 = vadd.f32 %v9296_v47, %v4325_v12 }
0x1e8a   :  { %v8004_v15 = vpop.f32.mrf.mxu1 }
0x1e8c   :  { %v4395_v16 = vpop.f32.mrf.mxu1 }
0x1e8d   :  { %v4396_v18 = vadd.f32 %v9302_v49, %v4395_v16 }
0x1e8e   :  { %v8009_v19 = vpop.f32.mrf.mxu1 }
0x1e8f   :  { %v4399_v20 = vmul.f32 %v4396_v18, %v4326_v17 }
0x1e91   :  { %8031 = vmatmul.mubr.msk.f32.vlgmr.msra.gmra.mxu1 %vm412_vm7, %v4399_v20 }
0x1e92   :  { %8067 = vmatpush3.msra.mxu1 %v9193_v27  ;;  %8068 = vmatprep.mubr.msk.f32.mxu1 %vm8477_vm1, %v8476_v1 }
0x1e93   :  { %8071 = vmatprep.subr.mxu1 %v8476_v1 }
0x1f51   :  { %v4469_v28 = vpop.f32.mrf.mxu1 }
0x1f52   :  { %v4474_v29 = vmul.f32 %v4473_v25, %v4469_v28  ;;  %v4694_v48 = vadd.f32 %v4469_v28, %v9520_v8 }
0x1f53   :  { %v8032_v30 = vpop.f32.mrf.mxu1 }
0x1f54   :  { %v4475_v31 = vadd.f32 %v4474_v29, %v9435_v51  ;;  %v4695_v50 = vmul.f32 2.0, %v4694_v48 }
0x1f56   :  { %8036 = vmatmul.mubr.msk.f32.vlgmr.msra.gmra.mxu0 %vm261_vm6, %v4475_v31  ;;  %v4696_v52 = vadd.f32 %v4695_v50, %v9480_v60 }
0x1f57   :  { %8039 = vmatpush3.msra.mxu0 %v9212_v22  ;;  %8040 = vmatprep.mubr.msk.f32.mxu0 %vm8477_vm1, %v8476_v1 }
0x1f58   :  { %8043 = vmatprep.subr.mxu0 %v8476_v1 }
0x1f5a   :  { %8041 = vmatmul.mubr.msk.f32.vlgmr.msra.gmra.mxu0 %vm261_vm6, %v4475_v31 }
0x1f5b   :  { %8044 = vmatpush3.msk.msra.mxu0 %vm416_vm5, %v9223_v23  ;;  %8063 = vmatprep.mubr.msk.f32.mxu0 %vm8477_vm1, %v8476_v1 }
0x1f5c   :  { %8045 = vmatprep.subr.mxu0 %v8476_v1 }
0x1f5d   :  { %8046 = vmatpush3.msra.mxu0 %v9233_v24 }
0x1f5e   :  { %8047 = vmatprep.subr.mxu0 %v8476_v1 }
0x1f5f   :  { %8048 = vmatpush3.msra.mxu0 %v9240_v32 }
0x1f60   :  { %8049 = vmatprep.subr.mxu0 %v8476_v1 }
0x1f61   :  { %8050 = vmatpush3.msra.mxu0 %v9247_v34 }
0x1f62   :  { %8051 = vmatprep.subr.mxu0 %v8476_v1 }
0x1f63   :  { %8052 = vmatpush3.msra.mxu0 %v9254_v37 }
0x1f64   :  { %8053 = vmatprep.subr.mxu0 %v8476_v1 }
0x1f65   :  { %8054 = vmatpush3.msra.mxu0 %v9261_v38 }
0x1f66   :  { %8055 = vmatprep.subr.mxu0 %v8476_v1 }
0x1f67   :  { %8056 = vmatpush3.msra.mxu0 %v9268_v39 }
0x1f68   :  { %8057 = vmatprep.subr.mxu0 %v8476_v1 }
0x1f69   :  { %8058 = vmatpush3.msra.mxu0 %v9275_v41 }
0x1f6a   :  { %8059 = vmatprep.subr.mxu0 %v8476_v1 }
0x1f6b   :  { %8060 = vmatpush3.msra.mxu0 %v9282_v42 }
0x1f6c   :  { %8061 = vmatprep.subr.mxu0 %v8476_v1 }
0x1f6d   :  { %8062 = vmatpush3.msra.mxu0 %v9289_v43 }
0x1f6e   :  { %8099 = vmatprep.subr.mxu0 %v8476_v1 }
0x2016   :  { %v4545_v33 = vpop.f32.mrf.mxu0 }
0x2017   :  { %v4546_v14 = vadd.f32 %v9296_v47, %v4545_v33 }
0x2018   :  { %v8037_v35 = vpop.f32.mrf.mxu0 }
0x201a   :  { %v4615_v13 = vpop.f32.mrf.mxu0 }
0x201b   :  { %v4616_v44 = vadd.f32 %v9302_v49, %v4615_v13  ;;  %v5359_v13 = vstv %s9644_s23 }
0x201c   :  { %v8042_v45 = vpop.f32.mrf.mxu0 }
0x201d   :  { %v4619_v46 = vmul.f32 %v4616_v44, %v4546_v14 }
0x201f   :  { %8064 = vmatmul.mubr.msk.f32.vlgmr.msra.gmra.mxu0 %vm412_vm7, %v4619_v46 }
0x2020   :  { %8100 = vmatpush3.msra.mxu0 %v9193_v27  ;;  %8101 = vmatprep.mubr.msk.f32.mxu0 %vm8477_vm1, %v8476_v1 }
0x2021   :  { %8104 = vmatprep.subr.mxu0 %v8476_v1 }
0x20df   :  { %v4689_v53 = vpop.f32.mrf.mxu0 }
0x20e0   :  { %v4697_v55 = vadd.f32 %v4696_v52, %v4689_v53  ;;  %v9783_v53 = vld [vmem:[%s10075_s7] sm:$0xff] }
0x20e1   :  { %v8065_v56 = vpop.f32.mrf.mxu0 }
0x20e2   :  { %v4699_v57 = vmul.f32 %v4698_v54, %v4697_v55  ;;  %v9794_v54 = vld [vmem:[%s10078_s10 + $0x48] sm:$0x1]  ;;  %v9804_v55 = vld [vmem:[%s10078_s10 + $0x40] sm:$0xff]  ;;  %v9811_v56 = vld [vmem:[%s10078_s10 + $0x38] sm:$0xff] }
0x20e4   :  { %v9602_v58 = vadd.f32 %v4699_v57, %v9435_v51  ;;  %v9818_v57 = vld [vmem:[%s10078_s10 + $0x30] sm:$0xff] }
0x20e6   :  { %6478 = vst.msk [vmem:[#allocation6 + $0x28] sm:$0xff] %vm261_vm6, %v9602_v58  ;;  %8069 = vmatmul.mubr.msk.f32.vlgmr.msra.gmra.mxu1 %vm261_vm6, %v9602_v58 }
0x20e7   :  { %8072 = vmatpush3.msra.mxu1 %v9212_v22  ;;  %8073 = vmatprep.mubr.msk.f32.mxu1 %vm8477_vm1, %v8476_v1 }
0x20e8   :  { %8076 = vmatprep.subr.mxu1 %v8476_v1 }
0x20ea   :  { %8074 = vmatmul.mubr.msk.f32.vlgmr.msra.gmra.mxu1 %vm261_vm6, %v9602_v58 }
0x20eb   :  { %8077 = vmatpush3.msk.msra.mxu1 %vm416_vm5, %v9223_v23  ;;  %8096 = vmatprep.mubr.msk.f32.mxu1 %vm8477_vm1, %v8476_v1 }
0x20ec   :  { %8078 = vmatprep.subr.mxu1 %v8476_v1 }
0x20ed   :  { %8079 = vmatpush3.msra.mxu1 %v9233_v24 }
0x20ee   :  { %8080 = vmatprep.subr.mxu1 %v8476_v1 }
0x20ef   :  { %8081 = vmatpush3.msra.mxu1 %v9240_v32 }
0x20f0   :  { %8082 = vmatprep.subr.mxu1 %v8476_v1 }
0x20f1   :  { %8083 = vmatpush3.msra.mxu1 %v9247_v34 }
0x20f2   :  { %8084 = vmatprep.subr.mxu1 %v8476_v1 }
0x20f3   :  { %8085 = vmatpush3.msra.mxu1 %v9254_v37 }
0x20f4   :  { %8086 = vmatprep.subr.mxu1 %v8476_v1 }
0x20f5   :  { %8087 = vmatpush3.msra.mxu1 %v9261_v38 }
0x20f6   :  { %8088 = vmatprep.subr.mxu1 %v8476_v1 }
0x20f7   :  { %8089 = vmatpush3.msra.mxu1 %v9268_v39 }
0x20f8   :  { %8090 = vmatprep.subr.mxu1 %v8476_v1 }
0x20f9   :  { %8091 = vmatpush3.msra.mxu1 %v9275_v41 }
0x20fa   :  { %8092 = vmatprep.subr.mxu1 %v8476_v1 }
0x20fb   :  { %8093 = vmatpush3.msra.mxu1 %v9282_v42 }
0x20fc   :  { %8094 = vmatprep.subr.mxu1 %v8476_v1 }
0x20fd   :  { %8095 = vmatpush3.msra.mxu1 %v9289_v43 }
0x20fe   :  { %8132 = vmatprep.subr.mxu1 %v8476_v1 }
0x21a6   :  { %v4772_v59 = vpop.f32.mrf.mxu1 }
0x21a7   :  { %v4773_v62 = vadd.f32 %v9296_v47, %v4772_v59  ;;  %v9825_v59 = vld [vmem:[%s10078_s10 + $0x28] sm:$0xff] }
0x21a8   :  { %v8070_v60 = vpop.f32.mrf.mxu1 }
0x21a9   :  { %v9832_v60 = vld [vmem:[%s10078_s10 + $0x20] sm:$0xff] }
0x21aa   :  { %v4842_v61 = vpop.f32.mrf.mxu1 }
0x21ab   :  { %v4843_v63 = vadd.f32 %v9302_v49, %v4842_v61  ;;  %v9839_v61 = vld [vmem:[%s10078_s10 + $0x18] sm:$0xff] }
0x21ac   :  { %v8075_v0 = vpop.f32.mrf.mxu1 }
0x21ad   :  { %v4846_v2 = vmul.f32 %v4843_v63, %v4773_v62  ;;  %v9846_v62 = vld [vmem:[%s10078_s10 + $0x10] sm:$0xff]  ;;  %v9853_v63 = vld [vmem:[%s10078_s10 + $0x8] sm:$0xff]  ;;  %v9860_v0 = vld [vmem:[%s10078_s10] sm:$0xff] }
0x21af   :  { %8097 = vmatmul.mubr.msk.f32.vlgmr.msra.gmra.mxu1 %vm412_vm7, %v4846_v2 }
0x21b0   :  { %8133 = vmatpush3.msra.mxu1 %v9193_v27  ;;  %8134 = vmatprep.mubr.msk.f32.mxu1 %vm8477_vm1, %v8476_v1 }
0x21b1   :  { %8137 = vmatprep.subr.mxu1 %v8476_v1 }
0x226f   :  { %v9647_v4 = vpop.f32.mrf.mxu1 }
0x2270   :  { %v4921_v5 = vmul.f32 %v4920_v3, %v9647_v4 }
0x2271   :  { %v8098_v6 = vpop.f32.mrf.mxu1 }
0x2272   :  { %v4922_v7 = vadd.f32 %v4921_v5, %v9602_v58  ;;  %v9867_v5 = vld [vmem:[%s10076_s8] ss:$0 sm:$0xff]  ;;  %s9881_s8 = sld [smem:[#allocation3 + $0x7]] }
0x2274   :  { %8102 = vmatmul.mubr.msk.f32.vlgmr.msra.gmra.mxu0 %vm261_vm6, %v4922_v7 }
0x2275   :  { %8105 = vmatpush3.msra.mxu0 %v9212_v22  ;;  %8106 = vmatprep.mubr.msk.f32.mxu0 %vm8477_vm1, %v8476_v1 }
0x2276   :  { %8109 = vmatprep.subr.mxu0 %v8476_v1 }
0x2278   :  { %8107 = vmatmul.mubr.msk.f32.vlgmr.msra.gmra.mxu0 %vm261_vm6, %v4922_v7  ;;  %v9873_v7 = vld [vmem:[%s10089_s19] ss:$0 sm:$0xff]  ;;  %s5588_s10 = smul.f32 0.5, %s9881_s8 }
0x2279   :  { %8110 = vmatpush3.msk.msra.mxu0 %vm416_vm5, %v9223_v23  ;;  %8129 = vmatprep.mubr.msk.f32.mxu0 %vm8477_vm1, %v8476_v1 }
0x227a   :  { %8111 = vmatprep.subr.mxu0 %v8476_v1 }
0x227b   :  { %8112 = vmatpush3.msra.mxu0 %v9233_v24 }
0x227c   :  { %8113 = vmatprep.subr.mxu0 %v8476_v1 }
0x227d   :  { %8114 = vmatpush3.msra.mxu0 %v9240_v32 }
0x227e   :  { %8115 = vmatprep.subr.mxu0 %v8476_v1 }
0x227f   :  { %8116 = vmatpush3.msra.mxu0 %v9247_v34 }
0x2280   :  { %8117 = vmatprep.subr.mxu0 %v8476_v1 }
0x2281   :  { %8118 = vmatpush3.msra.mxu0 %v9254_v37 }
0x2282   :  { %8119 = vmatprep.subr.mxu0 %v8476_v1 }
0x2283   :  { %8120 = vmatpush3.msra.mxu0 %v9261_v38 }
0x2284   :  { %8121 = vmatprep.subr.mxu0 %v8476_v1 }
0x2285   :  { %8122 = vmatpush3.msra.mxu0 %v9268_v39 }
0x2286   :  { %8123 = vmatprep.subr.mxu0 %v8476_v1 }
0x2287   :  { %8124 = vmatpush3.msra.mxu0 %v9275_v41 }
0x2288   :  { %8125 = vmatprep.subr.mxu0 %v8476_v1 }
0x2289   :  { %8126 = vmatpush3.msra.mxu0 %v9282_v42 }
0x228a   :  { %8127 = vmatprep.subr.mxu0 %v8476_v1 }
0x228b   :  { %8128 = vmatpush3.msra.mxu0 %v9289_v43 }
0x228c   :  { %8165 = vmatprep.subr.mxu0 %v8476_v1 }
0x2334   :  { %v4992_v8 = vpop.f32.mrf.mxu0 }
0x2335   :  { %v4993_v11 = vadd.f32 %v9296_v47, %v4992_v8 }
0x2336   :  { %v8103_v9 = vpop.f32.mrf.mxu0 }
0x2338   :  { %v5062_v10 = vpop.f32.mrf.mxu0 }
0x2339   :  { %v5063_v12 = vadd.f32 %v9302_v49, %v5062_v10 }
0x233a   :  { %v8108_v15 = vpop.f32.mrf.mxu0 }
0x233b   :  { %v5066_v16 = vmul.f32 %v5063_v12, %v4993_v11  ;;  %v5806_v11 = vstv %s5588_s10 }
0x233d   :  { %8130 = vmatmul.mubr.msk.f32.vlgmr.msra.gmra.mxu0 %vm412_vm7, %v5066_v16 }
0x233e   :  { %8166 = vmatpush3.msra.mxu0 %v9193_v27  ;;  %8167 = vmatprep.mubr.msk.f32.mxu0 %vm8477_vm1, %v8476_v1 }
0x233f   :  { %8170 = vmatprep.subr.mxu0 %v8476_v1 }
0x23fd   :  { %v9687_v17 = vpop.f32.mrf.mxu0 }
0x23fe   :  { %v5140_v18 = vmul.f32 %v9687_v17, %v4920_v3 }
0x23ff   :  { %v8131_v19 = vpop.f32.mrf.mxu0 }
0x2400   :  { %v5141_v20 = vadd.f32 %v5140_v18, %v9602_v58 }
0x2402   :  { %8135 = vmatmul.mubr.msk.f32.vlgmr.msra.gmra.mxu1 %vm261_vm6, %v5141_v20 }
0x2403   :  { %8138 = vmatpush3.msra.mxu1 %v9212_v22  ;;  %8139 = vmatprep.mubr.msk.f32.mxu1 %vm8477_vm1, %v8476_v1 }
0x2404   :  { %8142 = vmatprep.subr.mxu1 %v8476_v1 }
0x2406   :  { %8140 = vmatmul.mubr.msk.f32.vlgmr.msra.gmra.mxu1 %vm261_vm6, %v5141_v20 }
0x2407   :  { %8143 = vmatpush3.msk.msra.mxu1 %vm416_vm5, %v9223_v23  ;;  %8162 = vmatprep.mubr.msk.f32.mxu1 %vm8477_vm1, %v8476_v1 }
0x2408   :  { %8144 = vmatprep.subr.mxu1 %v8476_v1 }
0x2409   :  { %8145 = vmatpush3.msra.mxu1 %v9233_v24 }
0x240a   :  { %8146 = vmatprep.subr.mxu1 %v8476_v1 }
0x240b   :  { %8147 = vmatpush3.msra.mxu1 %v9240_v32 }
0x240c   :  { %8148 = vmatprep.subr.mxu1 %v8476_v1 }
0x240d   :  { %8149 = vmatpush3.msra.mxu1 %v9247_v34 }
0x240e   :  { %8150 = vmatprep.subr.mxu1 %v8476_v1 }
0x240f   :  { %8151 = vmatpush3.msra.mxu1 %v9254_v37 }
0x2410   :  { %8152 = vmatprep.subr.mxu1 %v8476_v1 }
0x2411   :  { %8153 = vmatpush3.msra.mxu1 %v9261_v38 }
0x2412   :  { %8154 = vmatprep.subr.mxu1 %v8476_v1 }
0x2413   :  { %8155 = vmatpush3.msra.mxu1 %v9268_v39 }
0x2414   :  { %8156 = vmatprep.subr.mxu1 %v8476_v1 }
0x2415   :  { %8157 = vmatpush3.msra.mxu1 %v9275_v41 }
0x2416   :  { %8158 = vmatprep.subr.mxu1 %v8476_v1 }
0x2417   :  { %8159 = vmatpush3.msra.mxu1 %v9282_v42 }
0x2418   :  { %8160 = vmatprep.subr.mxu1 %v8476_v1 }
0x2419   :  { %8161 = vmatpush3.msra.mxu1 %v9289_v43 }
0x241a   :  { %8198 = vmatprep.subr.mxu1 %v8476_v1 }
0x24c2   :  { %v5211_v25 = vpop.f32.mrf.mxu1 }
0x24c3   :  { %v5212_v30 = vadd.f32 %v9296_v47, %v5211_v25 }
0x24c4   :  { %v8136_v28 = vpop.f32.mrf.mxu1 }
0x24c6   :  { %v5281_v29 = vpop.f32.mrf.mxu1 }
0x24c7   :  { %v5282_v31 = vadd.f32 %v9302_v49, %v5281_v29 }
0x24c8   :  { %v8141_v33 = vpop.f32.mrf.mxu1 }
0x24c9   :  { %v5285_v35 = vmul.f32 %v5282_v31, %v5212_v30 }
0x24cb   :  { %8163 = vmatmul.mubr.msk.f32.vlgmr.msra.gmra.mxu1 %vm412_vm7, %v5285_v35 }
0x24cc   :  { %8199 = vmatpush3.msra.mxu1 %v9193_v27  ;;  %8200 = vmatprep.mubr.msk.f32.mxu1 %vm8477_vm1, %v8476_v1 }
0x24cd   :  { %8203 = vmatprep.subr.mxu1 %v8476_v1 }
0x258b   :  { %v5355_v14 = vpop.f32.mrf.mxu1 }
0x258c   :  { %v5360_v44 = vmul.f32 %v5359_v13, %v5355_v14 }
0x258d   :  { %v8164_v45 = vpop.f32.mrf.mxu1 }
0x258e   :  { %v5361_v46 = vadd.f32 %v5360_v44, %v9602_v58 }
0x2590   :  { %8168 = vmatmul.mubr.msk.f32.vlgmr.msra.gmra.mxu0 %vm261_vm6, %v5361_v46 }
0x2591   :  { %8171 = vmatpush3.msra.mxu0 %v9212_v22  ;;  %8172 = vmatprep.mubr.msk.f32.mxu0 %vm8477_vm1, %v8476_v1 }
0x2592   :  { %8175 = vmatprep.subr.mxu0 %v8476_v1 }
0x2594   :  { %8173 = vmatmul.mubr.msk.f32.vlgmr.msra.gmra.mxu0 %vm261_vm6, %v5361_v46 }
0x2595   :  { %8176 = vmatpush3.msk.msra.mxu0 %vm416_vm5, %v9223_v23  ;;  %8195 = vmatprep.mubr.msk.f32.mxu0 %vm8477_vm1, %v8476_v1 }
0x2596   :  { %8177 = vmatprep.subr.mxu0 %v8476_v1 }
0x2597   :  { %8178 = vmatpush3.msra.mxu0 %v9233_v24 }
0x2598   :  { %8179 = vmatprep.subr.mxu0 %v8476_v1 }
0x2599   :  { %8180 = vmatpush3.msra.mxu0 %v9240_v32 }
0x259a   :  { %8181 = vmatprep.subr.mxu0 %v8476_v1 }
0x259b   :  { %8182 = vmatpush3.msra.mxu0 %v9247_v34 }
0x259c   :  { %8183 = vmatprep.subr.mxu0 %v8476_v1 }
0x259d   :  { %8184 = vmatpush3.msra.mxu0 %v9254_v37 }
0x259e   :  { %8185 = vmatprep.subr.mxu0 %v8476_v1 }
0x259f   :  { %8186 = vmatpush3.msra.mxu0 %v9261_v38  ;;  %v9764_v38 = vld [vmem:[%s10074_s6] sm:$0xff] }
0x25a0   :  { %8187 = vmatprep.subr.mxu0 %v8476_v1 }
0x25a1   :  { %8188 = vmatpush3.msra.mxu0 %v9268_v39  ;;  %v5580_v39 = vadd.f32 %v5355_v14, %v9687_v17  ;;  %v6481_v14 = vld [vmem:[%s10079_s11] sm:$0xff] }
0x25a2   :  { %8189 = vmatprep.subr.mxu0 %v8476_v1 }
0x25a3   :  { %8190 = vmatpush3.msra.mxu0 %v9275_v41  ;;  %v5581_v41 = vmul.f32 2.0, %v5580_v39 }
0x25a4   :  { %8191 = vmatprep.subr.mxu0 %v8476_v1 }
0x25a5   :  { %8192 = vmatpush3.msra.mxu0 %v9282_v42  ;;  %v5582_v42 = vadd.f32 %v5581_v41, %v9647_v4 }
0x25a6   :  { %8193 = vmatprep.subr.mxu0 %v8476_v1 }
0x25a7   :  { %8194 = vmatpush3.msra.mxu0 %v9289_v43 }
0x25a8   :  { %8231 = vmatprep.subr.mxu0 %v8476_v1 }
0x2650   :  { %v5431_v27 = vpop.f32.mrf.mxu0 }
0x2651   :  { %v5432_v24 = vadd.f32 %v9296_v47, %v5431_v27  ;;  %v5584_v47 = vstv %s5579_s1 }
0x2652   :  { %v8169_v22 = vpop.f32.mrf.mxu0 }
0x2654   :  { %v5501_v23 = vpop.f32.mrf.mxu0 }
0x2655   :  { %v5502_v32 = vadd.f32 %v9302_v49, %v5501_v23 }
0x2656   :  { %v8174_v34 = vpop.f32.mrf.mxu0 }
0x2657   :  { %v5505_v37 = vmul.f32 %v5502_v32, %v5432_v24 }
0x2659   :  { %8196 = vmatmul.mubr.msk.f32.vlgmr.msra.gmra.mxu0 %vm412_vm7, %v5505_v37 }
0x265a   :  { %8232 = vmatpush3.msra.mxu0 %v9764_v38  ;;  %8233 = vmatprep.mubr.msk.f32.mxu0 %vm8477_vm1, %v8476_v1 }
0x265b   :  { %8236 = vmatprep.subr.mxu0 %v8476_v1 }
0x2719   :  { %v5575_v43 = vpop.f32.mrf.mxu0 }
0x271a   :  { %v5583_v49 = vadd.f32 %v5582_v42, %v5575_v43 }
0x271b   :  { %v8197_v48 = vpop.f32.mrf.mxu0 }
0x271c   :  { %v5585_v50 = vmul.f32 %v5584_v47, %v5583_v49 }
0x271e   :  { %v9774_v52 = vadd.f32 %v5585_v50, %v9602_v58 }
0x2720   :  { %6479 = vst.msk [vmem:[#allocation6 + $0x30] sm:$0xff] %vm261_vm6, %v9774_v52  ;;  %8201 = vmatmul.mubr.msk.f32.vlgmr.msra.gmra.mxu1 %vm261_vm6, %v9774_v52 }
0x2721   :  { %8204 = vmatpush3.msra.mxu1 %v9783_v53  ;;  %8205 = vmatprep.mubr.msk.f32.mxu1 %vm8477_vm1, %v8476_v1 }
0x2722   :  { %8208 = vmatprep.subr.mxu1 %v8476_v1 }
0x2724   :  { %8206 = vmatmul.mubr.msk.f32.vlgmr.msra.gmra.mxu1 %vm261_vm6, %v9774_v52 }
0x2725   :  { %8209 = vmatpush3.msk.msra.mxu1 %vm416_vm5, %v9794_v54  ;;  %8228 = vmatprep.mubr.msk.f32.mxu1 %vm8477_vm1, %v8476_v1 }
0x2726   :  { %8210 = vmatprep.subr.mxu1 %v8476_v1 }
0x2727   :  { %8211 = vmatpush3.msra.mxu1 %v9804_v55 }
0x2728   :  { %8212 = vmatprep.subr.mxu1 %v8476_v1 }
0x2729   :  { %8213 = vmatpush3.msra.mxu1 %v9811_v56 }
0x272a   :  { %8214 = vmatprep.subr.mxu1 %v8476_v1 }
0x272b   :  { %8215 = vmatpush3.msra.mxu1 %v9818_v57 }
0x272c   :  { %8216 = vmatprep.subr.mxu1 %v8476_v1 }
0x272d   :  { %8217 = vmatpush3.msra.mxu1 %v9825_v59 }
0x272e   :  { %8218 = vmatprep.subr.mxu1 %v8476_v1 }
0x272f   :  { %8219 = vmatpush3.msra.mxu1 %v9832_v60 }
0x2730   :  { %8220 = vmatprep.subr.mxu1 %v8476_v1 }
0x2731   :  { %8221 = vmatpush3.msra.mxu1 %v9839_v61 }
0x2732   :  { %8222 = vmatprep.subr.mxu1 %v8476_v1 }
0x2733   :  { %8223 = vmatpush3.msra.mxu1 %v9846_v62 }
0x2734   :  { %8224 = vmatprep.subr.mxu1 %v8476_v1 }
0x2735   :  { %8225 = vmatpush3.msra.mxu1 %v9853_v63 }
0x2736   :  { %8226 = vmatprep.subr.mxu1 %v8476_v1 }
0x2737   :  { %8227 = vmatpush3.msra.mxu1 %v9860_v0 }
0x2738   :  { %8264 = vmatprep.subr.mxu1 %v8476_v1 }
0x27e0   :  { %v5658_v2 = vpop.f32.mrf.mxu1 }
0x27e1   :  { %v5659_v6 = vadd.f32 %v9867_v5, %v5658_v2 }
0x27e2   :  { %v8202_v3 = vpop.f32.mrf.mxu1 }
0x27e4   :  { %v5728_v4 = vpop.f32.mrf.mxu1 }
0x27e5   :  { %v5729_v8 = vadd.f32 %v9873_v7, %v5728_v4 }
0x27e6   :  { %v8207_v9 = vpop.f32.mrf.mxu1 }
0x27e7   :  { %v5732_v10 = vmul.f32 %v5729_v8, %v5659_v6 }
0x27e9   :  { %8229 = vmatmul.mubr.msk.f32.vlgmr.msra.gmra.mxu1 %vm412_vm7, %v5732_v10 }
0x27ea   :  { %8265 = vmatpush3.msra.mxu1 %v9764_v38  ;;  %8266 = vmatprep.mubr.msk.f32.mxu1 %vm8477_vm1, %v8476_v1 }
0x27eb   :  { %8269 = vmatprep.subr.mxu1 %v8476_v1 }
0x28a9   :  { %v9884_v12 = vpop.f32.mrf.mxu1 }
0x28aa   :  { %v5807_v15 = vmul.f32 %v5806_v11, %v9884_v12 }
0x28ab   :  { %v8230_v16 = vpop.f32.mrf.mxu1 }
0x28ac   :  { %v5808_v17 = vadd.f32 %v5807_v15, %v9774_v52 }
0x28ae   :  { %8234 = vmatmul.mubr.msk.f32.vlgmr.msra.gmra.mxu0 %vm261_vm6, %v5808_v17 }
0x28af   :  { %8237 = vmatpush3.msra.mxu0 %v9783_v53  ;;  %8238 = vmatprep.mubr.msk.f32.mxu0 %vm8477_vm1, %v8476_v1 }
0x28b0   :  { %8241 = vmatprep.subr.mxu0 %v8476_v1 }
0x28b2   :  { %8239 = vmatmul.mubr.msk.f32.vlgmr.msra.gmra.mxu0 %vm261_vm6, %v5808_v17  ;;  %v6924_v17 = vld [vmem:[%s10082_s14] ss:$0 sm:$0xff]  ;;  %s8478_s14 = smov [#allocation6]  }
0x28b3   :  { %8242 = vmatpush3.msk.msra.mxu0 %vm416_vm5, %v9794_v54  ;;  %8261 = vmatprep.mubr.msk.f32.mxu0 %vm8477_vm1, %v8476_v1  ;;  %s6773_s18 = sshll.u32 %s8478_s14, 4  ;;  %s6774_s18 = int_to_ptr.vmem [resolvable:$true] %s6773_s18 }
0x28b4   :  { %8243 = vmatprep.subr.mxu0 %v8476_v1  ;;  %s8429_s20 = scalar_lea.vmem %s6774_s18, 1024  ;;  %p8434_p6 = scmp.lt.s32.totalorder %s6774_s18, %s6774_s18 }
0x28b5   :  { %8244 = vmatpush3.msra.mxu0 %v9804_v55  ;;  %p8430_p5 = scmp.ne.s32.totalorder %s6774_s18, %s8429_s20  ;;  %p8435_p7 = scmp.lt.s32.totalorder %s8429_s20, %s8429_s20 }
0x28b6   :  { %8245 = vmatprep.subr.mxu0 %v8476_v1 }
0x28b7   :  { %8246 = vmatpush3.msra.mxu0 %v9811_v56  ;;  %p8436_p8 = por %p8435_p7, %p8434_p6 }
0x28b8   :  { %8247 = vmatprep.subr.mxu0 %v8476_v1 }
0x28b9   :  { %8248 = vmatpush3.msra.mxu0 %v9818_v57  ;;  %p8437_p9 = pnand %p8436_p8, %p8430_p5 }
0x28ba   :  { %8249 = vmatprep.subr.mxu0 %v8476_v1 }
0x28bb   :  { %8250 = vmatpush3.msra.mxu0 %v9825_v59 }
0x28bc   :  { %8251 = vmatprep.subr.mxu0 %v8476_v1 }
0x28bd   :  { %8252 = vmatpush3.msra.mxu0 %v9832_v60 }
0x28be   :  { %8253 = vmatprep.subr.mxu0 %v8476_v1 }
0x28bf   :  { %8254 = vmatpush3.msra.mxu0 %v9839_v61 }
0x28c0   :  { %8255 = vmatprep.subr.mxu0 %v8476_v1 }
0x28c1   :  { %8256 = vmatpush3.msra.mxu0 %v9846_v62 }
0x28c2   :  { %8257 = vmatprep.subr.mxu0 %v8476_v1 }
0x28c3   :  { %8258 = vmatpush3.msra.mxu0 %v9853_v63 }
0x28c4   :  { %8259 = vmatprep.subr.mxu0 %v8476_v1 }
0x28c5   :  { %8260 = vmatpush3.msra.mxu0 %v9860_v0 }
0x28c6   :  { %8297 = vmatprep.subr.mxu0 %v8476_v1 }
0x296e   :  { %v5878_v18 = vpop.f32.mrf.mxu0 }
0x296f   :  { %v5879_v25 = vadd.f32 %v9867_v5, %v5878_v18 }
0x2970   :  { %v8235_v19 = vpop.f32.mrf.mxu0 }
0x2972   :  { %v5948_v20 = vpop.f32.mrf.mxu0 }
0x2973   :  { %v5949_v28 = vadd.f32 %v9873_v7, %v5948_v20 }
0x2974   :  { %v8240_v29 = vpop.f32.mrf.mxu0 }
0x2975   :  { %v5952_v30 = vmul.f32 %v5949_v28, %v5879_v25 }
0x2977   :  { %8262 = vmatmul.mubr.msk.f32.vlgmr.msra.gmra.mxu0 %vm412_vm7, %v5952_v30 }
0x2978   :  { %8298 = vmatpush3.msra.mxu0 %v9764_v38  ;;  %8299 = vmatprep.mubr.msk.f32.mxu0 %vm8477_vm1, %v8476_v1  ;;  %v10016_v38 = vld [vmem:[%s10080_s12] ss:$0 sm:$0xff] }
0x2979   :  { %8302 = vmatprep.subr.mxu0 %v8476_v1 }
0x2a37   :  { %v9924_v31 = vpop.f32.mrf.mxu0 }
0x2a38   :  { %v6026_v33 = vmul.f32 %v9924_v31, %v5806_v11 }
0x2a39   :  { %v8263_v35 = vpop.f32.mrf.mxu0 }
0x2a3a   :  { %v6027_v13 = vadd.f32 %v6026_v33, %v9774_v52 }
0x2a3c   :  { %8267 = vmatmul.mubr.msk.f32.vlgmr.msra.gmra.mxu1 %vm261_vm6, %v6027_v13 }
0x2a3d   :  { %8270 = vmatpush3.msra.mxu1 %v9783_v53  ;;  %8271 = vmatprep.mubr.msk.f32.mxu1 %vm8477_vm1, %v8476_v1 }
0x2a3e   :  { %8274 = vmatprep.subr.mxu1 %v8476_v1 }
0x2a40   :  { %8272 = vmatmul.mubr.msk.f32.vlgmr.msra.gmra.mxu1 %vm261_vm6, %v6027_v13 }
0x2a41   :  { %8275 = vmatpush3.msk.msra.mxu1 %vm416_vm5, %v9794_v54  ;;  %8294 = vmatprep.mubr.msk.f32.mxu1 %vm8477_vm1, %v8476_v1 }
0x2a42   :  { %8276 = vmatprep.subr.mxu1 %v8476_v1 }
0x2a43   :  { %8277 = vmatpush3.msra.mxu1 %v9804_v55 }
0x2a44   :  { %8278 = vmatprep.subr.mxu1 %v8476_v1 }
0x2a45   :  { %8279 = vmatpush3.msra.mxu1 %v9811_v56 }
0x2a46   :  { %8280 = vmatprep.subr.mxu1 %v8476_v1 }
0x2a47   :  { %8281 = vmatpush3.msra.mxu1 %v9818_v57 }
0x2a48   :  { %8282 = vmatprep.subr.mxu1 %v8476_v1 }
0x2a49   :  { %8283 = vmatpush3.msra.mxu1 %v9825_v59 }
0x2a4a   :  { %8284 = vmatprep.subr.mxu1 %v8476_v1 }
0x2a4b   :  { %8285 = vmatpush3.msra.mxu1 %v9832_v60 }
0x2a4c   :  { %8286 = vmatprep.subr.mxu1 %v8476_v1 }
0x2a4d   :  { %8287 = vmatpush3.msra.mxu1 %v9839_v61 }
0x2a4e   :  { %8288 = vmatprep.subr.mxu1 %v8476_v1 }
0x2a4f   :  { %8289 = vmatpush3.msra.mxu1 %v9846_v62 }
0x2a50   :  { %8290 = vmatprep.subr.mxu1 %v8476_v1 }
0x2a51   :  { %8291 = vmatpush3.msra.mxu1 %v9853_v63 }
0x2a52   :  { %8292 = vmatprep.subr.mxu1 %v8476_v1 }
0x2a53   :  { %8293 = vmatpush3.msra.mxu1 %v9860_v0 }
0x2a54   :  { %8330 = vmatprep.subr.mxu1 %v6481_v14 }
0x2afc   :  { %v6097_v44 = vpop.f32.mrf.mxu1 }
0x2afd   :  { %v6098_v27 = vadd.f32 %v9867_v5, %v6097_v44 }
0x2afe   :  { %v8268_v45 = vpop.f32.mrf.mxu1 }
0x2b00   :  { %v6167_v46 = vpop.f32.mrf.mxu1 }
0x2b01   :  { %v6168_v22 = vadd.f32 %v9873_v7, %v6167_v46 }
0x2b02   :  { %v8273_v23 = vpop.f32.mrf.mxu1 }
0x2b03   :  { %v6171_v24 = vmul.f32 %v6168_v22, %v6098_v27 }
0x2b05   :  { %8295 = vmatmul.mubr.msk.f32.vlgmr.msra.gmra.mxu1 %vm412_vm7, %v6171_v24 }
0x2b06   :  { %8332 = vmatprep.mubr.msk.f32.mxu1 %vm261_vm6, %v8671_v26  ;;  %8331 = vmatpush3.msra.mxu1 %v6481_v14  ;;  %v6245_v26 = vstv %s9881_s8 }
0x2b09   :  { %8333 = vmatmul.mubr.msk.f32.vlgmr.msra.gmra.mxu1 %vm261_vm6, %v8864_v36 }
0x2b0a   :  { %8335 = vmatprep.mubr.msk.f32.mxu1 %vm261_vm6, %v9031_v40 }
0x2b0d   :  { %8336 = vmatmul.mubr.msk.f32.gmra.mxu1 %vm261_vm6, %v9203_v21  ;;  %v6607_v21 = vld [vmem:[%s10081_s13 + $0x10] sm:$0x3f] }
0x2b0e   :  { %8338 = vmatprep.mubr.msk.f32.mxu1 %vm261_vm6, %v9435_v51 }
0x2b11   :  { %8339 = vmatmul.mubr.msk.f32.gmra.mxu1 %vm261_vm6, %v9602_v58 }
0x2b12   :  { %8341 = vmatprep.mubr.msk.f32.mxu1 %vm261_vm6, %v9774_v52 }
0x2bc5   :  { %v9977_v32 = vpop.f32.mrf.mxu1 }
0x2bc6   :  { %v6246_v36 = vmul.f32 %v6245_v26, %v9977_v32  ;;  %v6466_v6 = vadd.f32 %v9977_v32, %v9924_v31 }
0x2bc7   :  { %v8296_v34 = vpop.f32.mrf.mxu1 }
0x2bc8   :  { %v6247_v40 = vadd.f32 %v6246_v36, %v9774_v52 }
0x2bc9   :  { %v8334_v51 = vpop.f32.mrf.mxu1 }
0x2bca   :  { %8300 = vmatmul.mubr.msk.f32.vlgmr.msra.gmra.mxu0 %vm261_vm6, %v6247_v40  ;;  %v6564_v42 = vadd.f32 %v8334_v51, %v10016_v38 }
0x2bcb   :  { %8303 = vmatpush3.msra.mxu0 %v9783_v53  ;;  %8304 = vmatprep.mubr.msk.f32.mxu0 %vm8477_vm1, %v8476_v1  ;;  %v6558_v58 = vpop.f32.mrf.mxu1 }
0x2bcc   :  { %8307 = vmatprep.subr.mxu0 %v8476_v1  ;;  %v6559_v41 = vadd.f32 %v10016_v38, %v6558_v58 }
0x2bcd   :  { %v8337_v37 = vpop.f32.mrf.mxu1 }
0x2bce   :  { %8305 = vmatmul.mubr.msk.f32.vlgmr.msra.gmra.mxu0 %vm261_vm6, %v6247_v40  ;;  %8373 = vtanh.f32 %v6559_v41  ;;  %v6574_v48 = vadd.f32 %v8337_v37, %v10016_v38 }
0x2bcf   :  { %8308 = vmatpush3.msk.msra.mxu0 %vm416_vm5, %v9794_v54  ;;  %8327 = vmatprep.mubr.msk.f32.mxu0 %vm8477_vm1, %v8476_v1  ;;  %v6568_v39 = vpop.f32.mrf.mxu1  ;;  %8375 = vtanh.f32 %v6564_v42 }
0x2bd0   :  { %8309 = vmatprep.subr.mxu0 %v8476_v1  ;;  %v6569_v43 = vadd.f32 %v10016_v38, %v6568_v39 }
0x2bd1   :  { %8310 = vmatpush3.msra.mxu0 %v9804_v55 }
0x2bd2   :  { %8311 = vmatprep.subr.mxu0 %v8476_v1  ;;  %8377 = vtanh.f32 %v6569_v43 }
0x2bd3   :  { %8312 = vmatpush3.msra.mxu0 %v9811_v56  ;;  %8379 = vtanh.f32 %v6574_v48 }
0x2bd4   :  { %8313 = vmatprep.subr.mxu0 %v8476_v1 }
0x2bd5   :  { %8314 = vmatpush3.msra.mxu0 %v9818_v57 }
0x2bd6   :  { %8315 = vmatprep.subr.mxu0 %v8476_v1 }
0x2bd7   :  { %8316 = vmatpush3.msra.mxu0 %v9825_v59 }
0x2bd8   :  { %8317 = vmatprep.subr.mxu0 %v8476_v1 }
0x2bd9   :  { %8318 = vmatpush3.msra.mxu0 %v9832_v60 }
0x2bda   :  { %8319 = vmatprep.subr.mxu0 %v8476_v1 }
0x2bdb   :  { %8320 = vmatpush3.msra.mxu0 %v9839_v61  ;;  %v6606_v61 = vld [vmem:[%s10081_s13 + $0x8] sm:$0xff] }
0x2bdc   :  { %8321 = vmatprep.subr.mxu0 %v8476_v1 }
0x2bdd   :  { %8322 = vmatpush3.msra.mxu0 %v9846_v62  ;;  %v8374_v62 = vpop.eup %8373 }
0x2bde   :  { %8323 = vmatprep.subr.mxu0 %v8476_v1 }
0x2bdf   :  { %8324 = vmatpush3.msra.mxu0 %v9853_v63  ;;  %v6605_v63 = vld [vmem:[%s10081_s13] sm:$0xff]  ;;  %s6465_s13 = smul.f32 0.16666667, %s9881_s8 }
0x2be0   :  { %8325 = vmatprep.subr.mxu0 %v8476_v1  ;;  %v8340_v1 = vpop.f32.mrf.mxu1 }
0x2be1   :  { %8326 = vmatpush3.msra.mxu0 %v9860_v0  ;;  %v6584_v55 = vadd.f32 %v8340_v1, %v10016_v38  ;;  %v8376_v0 = vpop.eup %8375  ;;  %v6470_v10 = vstv %s6465_s13 }
0x2be2   :  { %8344 = vmatprep.subr.msk.mxu0 %vm164_vm3, %v6607_v21  ;;  %v6578_v47 = vpop.f32.mrf.mxu1  ;;  %v8378_v2 = vpop.eup %8377 }
0x2be3   :  { %v6579_v50 = vadd.f32 %v10016_v38, %v6578_v47  ;;  %v8380_v3 = vpop.eup %8379 }
0x2be5   :  { %8381 = vtanh.f32 %v6579_v50 }
0x2be6   :  { %8383 = vtanh.f32 %v6584_v55 }
0x2bf2   :  { %v8382_v4 = vpop.eup %8381 }
0x2c8a   :  { %v6317_v49 = vpop.f32.mrf.mxu0 }
0x2c8b   :  { %v6318_v56 = vadd.f32 %v9867_v5, %v6317_v49  ;;  %v8384_v5 = vpop.eup %8383 }
0x2c8c   :  { %v8301_v53 = vpop.f32.mrf.mxu0 }
0x2c8e   :  { %v6387_v54 = vpop.f32.mrf.mxu0 }
0x2c8f   :  { %v6388_v57 = vadd.f32 %v9873_v7, %v6387_v54  ;;  %v6467_v7 = vmul.f32 2.0, %v6466_v6 }
0x2c90   :  { %v8306_v59 = vpop.f32.mrf.mxu0 }
0x2c91   :  { %v6391_v60 = vmul.f32 %v6388_v57, %v6318_v56  ;;  %v6468_v8 = vadd.f32 %v6467_v7, %v9884_v12 }
0x2c93   :  { %8328 = vmatmul.mubr.msk.f32.vlgmr.msra.gmra.mxu0 %vm412_vm7, %v6391_v60 }
0x2c94   :  { %8345 = vmatpush3.msk.msra.mxu0 %vm164_vm3, %v6607_v21  ;;  %8350 = vmatprep.mubr.msk.f32.mxu0 %vm160_vm4, %v8374_v62 }
0x2c95   :  { %8346 = vmatprep.subr.mxu0 %v6606_v61 }
0x2c96   :  { %8347 = vmatpush3.msra.mxu0 %v6606_v61 }
0x2c97   :  { %8348 = vmatprep.subr.mxu0 %v6605_v63 }
0x2c98   :  { %8349 = vmatpush3.msra.mxu0 %v6605_v63 }
0x2c99   :  { %8351 = vmatmul.mubr.msk.f32.vlgmr.msra.gmra.mxu0 %vm160_vm4, %v8376_v0 }
0x2c9a   :  { %8353 = vmatprep.mubr.msk.f32.mxu0 %vm160_vm4, %v8378_v2 }
0x2c9d   :  { %8354 = vmatmul.mubr.msk.f32.gmra.mxu0 %vm160_vm4, %v8380_v3 }
0x2c9e   :  { %8356 = vmatprep.mubr.msk.f32.mxu0 %vm160_vm4, %v8382_v4 }
0x2ca1   :  { %8357 = vmatmul.mubr.msk.f32.gmra.mxu0 %vm160_vm4, %v8384_v5 }
0x2d53   :  { %v6461_v9 = vpop.f32.mrf.mxu0 }
0x2d54   :  { %v6469_v11 = vadd.f32 %v6468_v8, %v6461_v9 }
0x2d55   :  { %v8329_v15 = vpop.f32.mrf.mxu0 }
0x2d56   :  { %v6471_v16 = vmul.f32 %v6470_v10, %v6469_v11 }
0x2d58   :  { %v6472_v18 = vadd.f32 %v6471_v16, %v9774_v52 }
0x2d59   :  { %v8352_v19 = vpop.f32.mrf.mxu0 }
0x2d5a   :  { %6480 = vst.msk [vmem:[#allocation6 + $0x38] sm:$0xff] %vm261_vm6, %v6472_v18  ;;  %v6714_v20 = vadd.f32 %v8352_v19, %v6924_v17  ;;  %8342 = vmatmul.mubr.msk.f32.gmra.mxu1 %vm261_vm6, %v6472_v18 }
0x2d5b   :  { %v6708_v25 = vpop.f32.mrf.mxu0 }
0x2d5c   :  { %6749 = vst.msk [vmem:[#allocation4 + $0x8] sm:$0xff] %vm6747_vm8, %v6714_v20  ;;  %v6709_v12 = vadd.f32 %v6924_v17, %v6708_v25 }
0x2d5d   :  { %v8355_v28 = vpop.f32.mrf.mxu0 }
0x2d5e   :  { %6748 = vst.msk [vmem:[#allocation4] sm:$0xff] %vm6747_vm8, %v6709_v12  ;;  %v6724_v29 = vadd.f32 %v8355_v28, %v6924_v17 }
0x2d5f   :  { %v6718_v30 = vpop.f32.mrf.mxu0 }
0x2d60   :  { %6751 = vst.msk [vmem:[#allocation4 + $0x18] sm:$0xff] %vm6747_vm8, %v6724_v29  ;;  %v6719_v31 = vadd.f32 %v6924_v17, %v6718_v30 }
0x2d61   :  { %v8358_v52 = vpop.f32.mrf.mxu0 }
0x2d62   :  { %6750 = vst.msk [vmem:[#allocation4 + $0x10] sm:$0xff] %vm6747_vm8, %v6719_v31  ;;  %v6734_v33 = vadd.f32 %v8358_v52, %v6924_v17 }
0x2d63   :  { %v6728_v35 = vpop.f32.mrf.mxu0 }
0x2d64   :  { %6753 = vst.msk [vmem:[#allocation4 + $0x28] sm:$0xff] %vm6747_vm8, %v6734_v33  ;;  %v6729_v13 = vadd.f32 %v6924_v17, %v6728_v35 }
0x2d66   :  { %6752 = vst.msk [vmem:[#allocation4 + $0x20] sm:$0xff] %vm6747_vm8, %v6729_v13 }
0x2e1a   :  { %v8343_v14 = vpop.f32.mrf.mxu1 }
0x2e1b   :  { %v6594_v44 = vadd.f32 %v8343_v14, %v10016_v38 }
0x2e1c   :  { %v6588_v45 = vpop.f32.mrf.mxu1 }
0x2e1d   :  { %v6589_v46 = vadd.f32 %v10016_v38, %v6588_v45 }
0x2e1f   :  { %8385 = vtanh.f32 %v6589_v46 }
0x2e20   :  { %8387 = vtanh.f32 %v6594_v44 }
0x2e2c   :  { %v8386_v27 = vpop.eup %8385 }
0x2e2d   :  { %v8388_v22 = vpop.eup %8387  ;;  %8359 = vmatprep.mubr.msk.f32.mxu0 %vm160_vm4, %v8386_v27 }
0x2e2e   :  { %8360 = vmatmul.mubr.msk.f32.gmra.mxu0 %vm160_vm4, %v8388_v22 }
0x2e2f   :  { %8440 = shalt.err (!%p8437_p9)
}
0x2e30   :  { %s8479_s21 = smov 128   ;;  %s8480_s22 = smov 8  }
0x2e31   :  { %6779 = dma.vmem_to_hbm [thread:$0]  %s6774_s18, 1024, %s10084_s16, [#allocation7], %s8479_s21, %s8479_s21, %s8480_s22  }
0x2e32   :  { %s8481_s24 = smov [#allocation4]  }
0x2e33   :  { %s6761_s5 = sshll.u32 %s8481_s24, 4  ;;  %s6762_s5 = int_to_ptr.vmem [resolvable:$true] %s6761_s5 }
0x2e34   :  { %s8449_s1 = scalar_lea.vmem %s6762_s5, 1024  ;;  %p8454_p11 = scmp.lt.s32.totalorder %s6762_s5, %s6762_s5 }
0x2e35   :  { %p8450_p10 = scmp.ne.s32.totalorder %s6762_s5, %s8449_s1  ;;  %p8455_p12 = scmp.lt.s32.totalorder %s8449_s1, %s8449_s1 }
0x2e37   :  { %p8456_p13 = por %p8455_p12, %p8454_p11 }
0x2e39   :  { %p8457_p0 = pnand %p8456_p13, %p8450_p10 }
0x2eee   :  { %v8361_v23 = vpop.f32.mrf.mxu0 }
0x2eef   :  { %v6744_v24 = vadd.f32 %v8361_v23, %v6924_v17 }
0x2ef0   :  { %v6738_v26 = vpop.f32.mrf.mxu0 }
0x2ef1   :  { %6755 = vst.msk [vmem:[#allocation4 + $0x38] sm:$0xff] %vm6747_vm8, %v6744_v24  ;;  %v6739_v32 = vadd.f32 %v6924_v17, %v6738_v26 }
0x2ef3   :  { %6754 = vst.msk [vmem:[#allocation4 + $0x30] sm:$0xff] %vm6747_vm8, %v6739_v32 }
0x2ef4   :  { %8460 = shalt.err (!%p8457_p0)
}
0x2ef5   :  { %6767 = dma.vmem_to_hbm [thread:$0]  %s6762_s5, 1024, %s10083_s15, [#allocation5], %s8479_s21, %s8479_s21, %s8480_s22  }
0x2ef6   :  { %8471 = dma.done.wait [#allocation5], 1024  }
0x2ef7   :  { %8472 = vsyncadd [#allocation5], 4294966272 }
0x2ef8   :  { %8473 = dma.done.wait [#allocation7], 1024  }
0x2ef9   :  { %8474 = vsyncadd [#allocation7], 4294966272 }
0x2efa   :  { %6786 = vsyncpa [#allocation5], 1 }
0x2efb   :  { %6787 = vsyncpa [#allocation7], 1 }

</bundles_post_ra>
